<compile_context>
chip_gen: v6e
topology: v6e:2x2x1
jax: 0.10.0
libtpu: 0.0.40
codegen_flags: <defaults>
</compile_context>

<pallas_src>
import functools
import math

import jax
import jax.numpy as jnp
import numpy as np
from jax.experimental import pallas as pl
from jax.experimental.pallas import tpu as pltpu


def dagmm_forward_kernel(
    x_ref,
    # encoder params (weights bf16, biases f32)
    ew1, eb1, ew2, eb2, ew3, eb3, ew4, eb4,
    # decoder params
    dw1, db1, dw2, db2, dw3, db3, dw4, db4,
    # estimation params (sw1 pre-split into enc / euclid / cosine pieces)
    sw1_z, sw1_eu, sw1_cos, sb1, sw2, sb2,
    # outputs
    enc_ref, xrec_ref, z_ref, gamma_ref,
):
    f32 = jnp.float32
    bf16 = jnp.bfloat16
    x = x_ref[...].astype(f32)
    latent = enc_ref.shape[1]

    def lin(h, w_ref, b_ref):
        # bf16 x bf16 MXU matmul, f32 accumulation, f32 bias add.
        return (
            jnp.dot(h.astype(bf16), w_ref[...], preferred_element_type=f32)
            + b_ref[...]
        )

    # ---- encoder: Linear/Tanh x3 + Linear ----
    h = jnp.tanh(lin(x, ew1, eb1))
    h = jnp.tanh(lin(h, ew2, eb2))
    h = jnp.tanh(lin(h, ew3, eb3))
    enc = lin(h, ew4, eb4)                                   # (n, latent)

    # ---- decoder: Linear/Tanh x3 + Linear ----
    h = jnp.tanh(lin(enc, dw1, db1))
    h = jnp.tanh(lin(h, dw2, db2))
    h = jnp.tanh(lin(h, dw3, db3))
    x_rec = lin(h, dw4, db4)                                 # (n, D)

    # ---- reconstruction features (per-row reductions, f32) ----
    dot_xy = jnp.sum(x * x_rec, axis=1, keepdims=True)
    nx = jnp.maximum(jnp.sqrt(jnp.sum(x * x, axis=1, keepdims=True)), 1e-8)
    ny = jnp.maximum(jnp.sqrt(jnp.sum(x_rec * x_rec, axis=1, keepdims=True)), 1e-8)
    cos = dot_xy * pl.reciprocal(nx * ny, approx=True)       # F.cosine_similarity
    rec_cosine = 1.0 - cos                                   # (n, 1)
    diff = x - x_rec
    rec_euclid = jnp.sqrt(jnp.sum(diff * diff, axis=1, keepdims=True))  # (n, 1)

    # ---- estimation net: Linear -> Tanh -> Linear -> Softmax(dim=1) ----
    # z @ sw1 is split: enc matmul + two rank-1 FMAs (no lane concat needed).
    eh_pre = (
        jnp.dot(enc.astype(bf16), sw1_z[...], preferred_element_type=f32)
        + rec_euclid * sw1_eu[...].astype(f32)
        + rec_cosine * sw1_cos[...].astype(f32)
        + sb1[...]
    )
    eh = jnp.tanh(eh_pre)
    logits = jnp.dot(eh.astype(bf16), sw2[...], preferred_element_type=f32) + sb2[...]
    logits = logits - jnp.max(logits, axis=1, keepdims=True)
    e = jnp.exp(logits)
    gamma = e * pl.reciprocal(jnp.sum(e, axis=1, keepdims=True), approx=True)

    # ---- writes ----
    enc_ref[...] = enc.astype(enc_ref.dtype)
    xrec_ref[...] = x_rec.astype(xrec_ref.dtype)
    # z = cat([enc, euclid, cosine], dim=1), written as slice stores.
    z_ref[:, :latent] = enc.astype(z_ref.dtype)
    z_ref[:, latent:latent + 1] = rec_euclid.astype(z_ref.dtype)
    z_ref[:, latent + 1:latent + 2] = rec_cosine.astype(z_ref.dtype)
    gamma_ref[...] = gamma.astype(gamma_ref.dtype)


_PARAM_ORDER = (
    "ew1", "eb1", "ew2", "eb2", "ew3", "eb3", "ew4", "eb4",
    "dw1", "db1", "dw2", "db2", "dw3", "db3", "dw4", "db4",
)


def _cost_estimate(n_rows, dims_enc, dims_dec, dims_est, weight_bytes, io_bytes):
    mm = sum(din * dout for din, dout in dims_enc + dims_dec + dims_est)
    flops = 2 * n_rows * mm + 10 * n_rows * dims_enc[0][0]
    tanh_count = (1024 + 256 + 64) * 2 + 10
    transcendentals = n_rows * (tanh_count + dims_est[-1][1] + 4)
    return pl.CostEstimate(
        flops=int(flops),
        transcendentals=int(transcendentals),
        bytes_accessed=int(weight_bytes + io_bytes),
    )


@functools.partial(jax.jit, static_argnames=("block_n",))
def dagmm_forward(x, params, block_n=256):
    """Runs the DAGMM forward pass. Returns (enc, x_rec, z, gamma)."""
    N, D = x.shape
    latent_dim = params["ew4"].shape[1]
    n_gmm = params["sw2"].shape[1]

    # Row tiling: single full-size block for small batches, 256-row tiles
    # (v7x-safe VMEM budget) otherwise, padding N up to a tile multiple.
    if N <= block_n:
        bn = N
        n_pad = N
    else:
        bn = block_n
        n_pad = pl.cdiv(N, bn) * bn
    x_p = jnp.pad(x, ((0, n_pad - N), (0, 0))) if n_pad != N else x
    grid = (n_pad // bn,)

    # Cast weights to bf16 (MXU-native), keep biases f32.
    def w(name):
        return params[name].astype(jnp.bfloat16)

    def b(name):
        return params[name].astype(jnp.float32)

    weight_args = []
    for i in range(0, len(_PARAM_ORDER), 2):
        weight_args.append(w(_PARAM_ORDER[i]))
        weight_args.append(b(_PARAM_ORDER[i + 1]))

    # Split sw1 so the kernel never builds the width-(latent+2) concat.
    sw1 = params["sw1"].astype(jnp.bfloat16)
    est_args = [
        sw1[:latent_dim, :],                 # (latent, 10)
        sw1[latent_dim:latent_dim + 1, :],   # (1, 10)  euclid column
        sw1[latent_dim + 1:latent_dim + 2, :],  # (1, 10)  cosine column
        b("sb1"),
        w("sw2"),
        b("sb2"),
    ]
    args = [x_p] + weight_args + est_args

    # Specs: x / outputs stream over the batch grid; params are resident
    # (constant block index -> fetched once, no re-DMA across grid steps).
    row_spec = lambda cols: pl.BlockSpec((bn, cols), lambda i: (i, 0))
    const_spec = pl.BlockSpec  # built per-param below
    param_specs = [
        pl.BlockSpec(p.shape, lambda i: (0, 0)) for p in (weight_args + est_args)
    ]
    in_specs = [row_spec(D)] + param_specs
    out_specs = (
        row_spec(latent_dim),
        row_spec(D),
        row_spec(latent_dim + 2),
        row_spec(n_gmm),
    )
    out_shape = (
        jax.ShapeDtypeStruct((n_pad, latent_dim), jnp.float32),      # enc
        jax.ShapeDtypeStruct((n_pad, D), jnp.float32),               # x_rec
        jax.ShapeDtypeStruct((n_pad, latent_dim + 2), jnp.float32),  # z
        jax.ShapeDtypeStruct((n_pad, n_gmm), jnp.float32),           # gamma
    )

    dims_enc = [(D, 1024), (1024, 256), (256, 64), (64, latent_dim)]
    dims_dec = [(latent_dim, 64), (64, 256), (256, 1024), (1024, D)]
    dims_est = [(latent_dim + 2, 10), (10, n_gmm)]
    weight_bytes = sum(int(np.prod(a.shape)) * a.dtype.itemsize
                       for a in weight_args + est_args)
    io_bytes = 4 * n_pad * (D + latent_dim + D + latent_dim + 2 + n_gmm)

    enc, x_rec, z, gamma = pl.pallas_call(
        dagmm_forward_kernel,
        out_shape=out_shape,
        grid=grid,
        in_specs=in_specs,
        out_specs=out_specs,
        compiler_params=pltpu.CompilerParams(
            dimension_semantics=("parallel",),
            vmem_limit_bytes=32 * 1024 * 1024,
        ),
        cost_estimate=_cost_estimate(
            n_pad, dims_enc, dims_dec, dims_est, weight_bytes, io_bytes
        ),
    )(*args)

    if n_pad != N:
        enc, x_rec, z, gamma = enc[:N], x_rec[:N], z[:N], gamma[:N]
    return enc, x_rec, z, gamma


# ----------------------------------------------------------------------------
# Parameter construction + pure-JAX reference (for a sanity check).
# ----------------------------------------------------------------------------

def _linear_params(key, in_dim, out_dim):
    """PyTorch nn.Linear default init: U(-1/sqrt(in), 1/sqrt(in))."""
    kw, kb = jax.random.split(key)
    bound = 1.0 / math.sqrt(in_dim)
    w = jax.random.uniform(kw, (in_dim, out_dim), jnp.float32, -bound, bound)
    b = jax.random.uniform(kb, (1, out_dim), jnp.float32, -bound, bound)
    return w, b


def make_dagmm_params(key, input_dim, latent_dim, n_gmm):
    dims_enc = [(input_dim, 1024), (1024, 256), (256, 64), (64, latent_dim)]
    dims_dec = [(latent_dim, 64), (64, 256), (256, 1024), (1024, input_dim)]
    total_latent = latent_dim + 2
    dims_est = [(total_latent, 10), (10, n_gmm)]

    names, dims = [], []
    for i, d in enumerate(dims_enc):
        names += [f"ew{i+1}", f"eb{i+1}"]; dims.append(d)
    for i, d in enumerate(dims_dec):
        names += [f"dw{i+1}", f"db{i+1}"]; dims.append(d)
    for i, d in enumerate(dims_est):
        names += [f"sw{i+1}", f"sb{i+1}"]; dims.append(d)

    keys = jax.random.split(key, len(dims))
    params, ni = {}, 0
    for k, (din, dout) in zip(keys, dims):
        w, b = _linear_params(k, din, dout)
        params[names[ni]] = w
        params[names[ni + 1]] = b
        ni += 2
    return params


def dagmm_forward_ref(x, params):
    """Pure-JAX reference using the same bf16-weight / f32-accum recipe."""
    f32, bf16 = jnp.float32, jnp.bfloat16

    def lin(h, wname, bname):
        return (
            jnp.dot(h.astype(bf16), params[wname].astype(bf16),
                    preferred_element_type=f32)
            + params[bname].astype(f32)
        )

    h = jnp.tanh(lin(x, "ew1", "eb1"))
    h = jnp.tanh(lin(h, "ew2", "eb2"))
    h = jnp.tanh(lin(h, "ew3", "eb3"))
    enc = lin(h, "ew4", "eb4")
    h = jnp.tanh(lin(enc, "dw1", "db1"))
    h = jnp.tanh(lin(h, "dw2", "db2"))
    h = jnp.tanh(lin(h, "dw3", "db3"))
    x_rec = lin(h, "dw4", "db4")

    dot_xy = jnp.sum(x * x_rec, axis=1, keepdims=True)
    nx = jnp.maximum(jnp.sqrt(jnp.sum(x * x, axis=1, keepdims=True)), 1e-8)
    ny = jnp.maximum(jnp.sqrt(jnp.sum(x_rec * x_rec, axis=1, keepdims=True)), 1e-8)
    rec_cosine = 1.0 - dot_xy / (nx * ny)
    rec_euclid = jnp.sqrt(jnp.sum((x - x_rec) ** 2, axis=1, keepdims=True))
    z = jnp.concatenate([enc, rec_euclid, rec_cosine], axis=1)

    eh = jnp.tanh(lin(z, "sw1", "sb1"))
    logits = lin(eh, "sw2", "sb2")
    gamma = jax.nn.softmax(logits, axis=1)
    return enc, x_rec, z, gamma


if __name__ == "__main__":
    # Small synthetic sizes (the module's hidden widths 1024/256/64 are kept).
    batch = 8
    input_dim = 512
    latent_dim = 16
    n_gmm = 2

    root = jax.random.PRNGKey(0)
    kx, kp = jax.random.split(root)
    x = jax.random.normal(kx, (batch, input_dim), dtype=jnp.float32)
    params = make_dagmm_params(kp, input_dim, latent_dim, n_gmm)

    enc, x_rec, z, gamma = dagmm_forward(x, params)
    jax.block_until_ready((enc, x_rec, z, gamma))

    assert enc.shape == (batch, latent_dim)
    assert x_rec.shape == (batch, input_dim)
    assert z.shape == (batch, latent_dim + 2)
    assert gamma.shape == (batch, n_gmm)
    for a in (enc, x_rec, z, gamma):
        assert bool(jnp.all(jnp.isfinite(a)))

    # Loose-tolerance check against a pure-JAX reference (bf16 weights +
    # approx EUP reciprocals introduce small, bounded drift).
    r_enc, r_xrec, r_z, r_gamma = dagmm_forward_ref(x, params)
    np.testing.assert_allclose(np.asarray(enc), np.asarray(r_enc), rtol=2e-2, atol=2e-2)
    np.testing.assert_allclose(np.asarray(x_rec), np.asarray(r_xrec), rtol=2e-2, atol=2e-2)
    np.testing.assert_allclose(np.asarray(z), np.asarray(r_z), rtol=2e-2, atol=2e-2)
    np.testing.assert_allclose(np.asarray(gamma), np.asarray(r_gamma), rtol=2e-2, atol=2e-2)

    print("KERNEL_OK")
</pallas_src>

<mosaic_0001>
module attributes {stable_mosaic.version = 11 : i64} {
  func.func @dagmm_forward_kernel(%arg0: i32, %arg1: memref<8x512xf32, #tpu.memory_space<vmem>>, %arg2: memref<512x1024xbf16, #tpu.memory_space<vmem>>, %arg3: memref<1x1024xf32, #tpu.memory_space<vmem>>, %arg4: memref<1024x256xbf16, #tpu.memory_space<vmem>>, %arg5: memref<1x256xf32, #tpu.memory_space<vmem>>, %arg6: memref<256x64xbf16, #tpu.memory_space<vmem>>, %arg7: memref<1x64xf32, #tpu.memory_space<vmem>>, %arg8: memref<64x16xbf16, #tpu.memory_space<vmem>>, %arg9: memref<1x16xf32, #tpu.memory_space<vmem>>, %arg10: memref<16x64xbf16, #tpu.memory_space<vmem>>, %arg11: memref<1x64xf32, #tpu.memory_space<vmem>>, %arg12: memref<64x256xbf16, #tpu.memory_space<vmem>>, %arg13: memref<1x256xf32, #tpu.memory_space<vmem>>, %arg14: memref<256x1024xbf16, #tpu.memory_space<vmem>>, %arg15: memref<1x1024xf32, #tpu.memory_space<vmem>>, %arg16: memref<1024x512xbf16, #tpu.memory_space<vmem>>, %arg17: memref<1x512xf32, #tpu.memory_space<vmem>>, %arg18: memref<16x10xbf16, #tpu.memory_space<vmem>>, %arg19: memref<1x10xbf16, #tpu.memory_space<vmem>>, %arg20: memref<1x10xbf16, #tpu.memory_space<vmem>>, %arg21: memref<1x10xf32, #tpu.memory_space<vmem>>, %arg22: memref<10x2xbf16, #tpu.memory_space<vmem>>, %arg23: memref<1x2xf32, #tpu.memory_space<vmem>>, %arg24: memref<8x16xf32, #tpu.memory_space<vmem>>, %arg25: memref<8x512xf32, #tpu.memory_space<vmem>>, %arg26: memref<8x18xf32, #tpu.memory_space<vmem>>, %arg27: memref<8x2xf32, #tpu.memory_space<vmem>>) attributes {dimension_semantics = [#tpu.dimension_semantics<parallel>], iteration_bounds = array<i64: 1>, scalar_prefetch = 0 : i64, scratch_operands = 0 : i64, tpu.core_type = #tpu.core_type<tc>, window_params = [{transform_indices = @transform_0, window_bounds = array<i64: 8, 512>}, {pipeline_mode = #tpu.pipeline_mode<synchronous>, transform_indices = @transform_1, window_bounds = array<i64: 512, 1024>}, {pipeline_mode = #tpu.pipeline_mode<synchronous>, transform_indices = @transform_2, window_bounds = array<i64: 1, 1024>}, {pipeline_mode = #tpu.pipeline_mode<synchronous>, transform_indices = @transform_3, window_bounds = array<i64: 1024, 256>}, {pipeline_mode = #tpu.pipeline_mode<synchronous>, transform_indices = @transform_4, window_bounds = array<i64: 1, 256>}, {pipeline_mode = #tpu.pipeline_mode<synchronous>, transform_indices = @transform_5, window_bounds = array<i64: 256, 64>}, {pipeline_mode = #tpu.pipeline_mode<synchronous>, transform_indices = @transform_6, window_bounds = array<i64: 1, 64>}, {pipeline_mode = #tpu.pipeline_mode<synchronous>, transform_indices = @transform_7, window_bounds = array<i64: 64, 16>}, {pipeline_mode = #tpu.pipeline_mode<synchronous>, transform_indices = @transform_8, window_bounds = array<i64: 1, 16>}, {pipeline_mode = #tpu.pipeline_mode<synchronous>, transform_indices = @transform_9, window_bounds = array<i64: 16, 64>}, {pipeline_mode = #tpu.pipeline_mode<synchronous>, transform_indices = @transform_10, window_bounds = array<i64: 1, 64>}, {pipeline_mode = #tpu.pipeline_mode<synchronous>, transform_indices = @transform_11, window_bounds = array<i64: 64, 256>}, {pipeline_mode = #tpu.pipeline_mode<synchronous>, transform_indices = @transform_12, window_bounds = array<i64: 1, 256>}, {pipeline_mode = #tpu.pipeline_mode<synchronous>, transform_indices = @transform_13, window_bounds = array<i64: 256, 1024>}, {pipeline_mode = #tpu.pipeline_mode<synchronous>, transform_indices = @transform_14, window_bounds = array<i64: 1, 1024>}, {pipeline_mode = #tpu.pipeline_mode<synchronous>, transform_indices = @transform_15, window_bounds = array<i64: 1024, 512>}, {pipeline_mode = #tpu.pipeline_mode<synchronous>, transform_indices = @transform_16, window_bounds = array<i64: 1, 512>}, {pipeline_mode = #tpu.pipeline_mode<synchronous>, transform_indices = @transform_17, window_bounds = array<i64: 16, 10>}, {pipeline_mode = #tpu.pipeline_mode<synchronous>, transform_indices = @transform_18, window_bounds = array<i64: 1, 10>}, {pipeline_mode = #tpu.pipeline_mode<synchronous>, transform_indices = @transform_19, window_bounds = array<i64: 1, 10>}, {pipeline_mode = #tpu.pipeline_mode<synchronous>, transform_indices = @transform_20, window_bounds = array<i64: 1, 10>}, {pipeline_mode = #tpu.pipeline_mode<synchronous>, transform_indices = @transform_21, window_bounds = array<i64: 10, 2>}, {pipeline_mode = #tpu.pipeline_mode<synchronous>, transform_indices = @transform_22, window_bounds = array<i64: 1, 2>}, {transform_indices = @transform_23, window_bounds = array<i64: 8, 16>}, {transform_indices = @transform_24, window_bounds = array<i64: 8, 512>}, {transform_indices = @transform_25, window_bounds = array<i64: 8, 18>}, {transform_indices = @transform_26, window_bounds = array<i64: 8, 2>}]} {
    %c0 = arith.constant 0 : index
    %c0_0 = arith.constant 0 : index
    %0 = vector.load %arg1[%c0, %c0_0] : memref<8x512xf32, #tpu.memory_space<vmem>>, vector<8x512xf32>
    %1 = arith.truncf %0 : vector<8x512xf32> to vector<8x512xbf16>
    %c0_1 = arith.constant 0 : index
    %c0_2 = arith.constant 0 : index
    %2 = vector.load %arg2[%c0_1, %c0_2] : memref<512x1024xbf16, #tpu.memory_space<vmem>>, vector<512x1024xbf16>
    %cst = arith.constant dense<0.000000e+00> : vector<8x1024xf32>
    %3 = tpu.matmul %1, %2, %cst {dimension_numbers = #tpu.dot_dimension_numbers<[1], [0], [0], [1], [0, 0, 1, 1], [], []>} : vector<8x512xbf16>, vector<512x1024xbf16>, vector<8x1024xf32> -> vector<8x1024xf32>
    %c0_3 = arith.constant 0 : index
    %c0_4 = arith.constant 0 : index
    %4 = vector.load %arg3[%c0_3, %c0_4] : memref<1x1024xf32, #tpu.memory_space<vmem>>, vector<1x1024xf32>
    %5 = vector.broadcast %4 : vector<1x1024xf32> to vector<8x1024xf32>
    %6 = arith.addf %3, %5 : vector<8x1024xf32>
    %7 = math.tanh %6 : vector<8x1024xf32>
    %8 = arith.truncf %7 : vector<8x1024xf32> to vector<8x1024xbf16>
    %c0_5 = arith.constant 0 : index
    %c0_6 = arith.constant 0 : index
    %9 = vector.load %arg4[%c0_5, %c0_6] : memref<1024x256xbf16, #tpu.memory_space<vmem>>, vector<1024x256xbf16>
    %cst_7 = arith.constant dense<0.000000e+00> : vector<8x256xf32>
    %10 = tpu.matmul %8, %9, %cst_7 {dimension_numbers = #tpu.dot_dimension_numbers<[1], [0], [0], [1], [0, 0, 1, 1], [], []>} : vector<8x1024xbf16>, vector<1024x256xbf16>, vector<8x256xf32> -> vector<8x256xf32>
    %c0_8 = arith.constant 0 : index
    %c0_9 = arith.constant 0 : index
    %11 = vector.load %arg5[%c0_8, %c0_9] : memref<1x256xf32, #tpu.memory_space<vmem>>, vector<1x256xf32>
    %12 = vector.broadcast %11 : vector<1x256xf32> to vector<8x256xf32>
    %13 = arith.addf %10, %12 : vector<8x256xf32>
    %14 = math.tanh %13 : vector<8x256xf32>
    %15 = arith.truncf %14 : vector<8x256xf32> to vector<8x256xbf16>
    %c0_10 = arith.constant 0 : index
    %c0_11 = arith.constant 0 : index
    %16 = vector.load %arg6[%c0_10, %c0_11] : memref<256x64xbf16, #tpu.memory_space<vmem>>, vector<256x64xbf16>
    %cst_12 = arith.constant dense<0.000000e+00> : vector<8x64xf32>
    %17 = tpu.matmul %15, %16, %cst_12 {dimension_numbers = #tpu.dot_dimension_numbers<[1], [0], [0], [1], [0, 0, 1, 1], [], []>} : vector<8x256xbf16>, vector<256x64xbf16>, vector<8x64xf32> -> vector<8x64xf32>
    %c0_13 = arith.constant 0 : index
    %c0_14 = arith.constant 0 : index
    %18 = vector.load %arg7[%c0_13, %c0_14] : memref<1x64xf32, #tpu.memory_space<vmem>>, vector<1x64xf32>
    %19 = vector.broadcast %18 : vector<1x64xf32> to vector<8x64xf32>
    %20 = arith.addf %17, %19 : vector<8x64xf32>
    %21 = math.tanh %20 : vector<8x64xf32>
    %22 = arith.truncf %21 : vector<8x64xf32> to vector<8x64xbf16>
    %c0_15 = arith.constant 0 : index
    %c0_16 = arith.constant 0 : index
    %23 = vector.load %arg8[%c0_15, %c0_16] : memref<64x16xbf16, #tpu.memory_space<vmem>>, vector<64x16xbf16>
    %cst_17 = arith.constant dense<0.000000e+00> : vector<8x16xf32>
    %24 = tpu.matmul %22, %23, %cst_17 {dimension_numbers = #tpu.dot_dimension_numbers<[1], [0], [0], [1], [0, 0, 1, 1], [], []>} : vector<8x64xbf16>, vector<64x16xbf16>, vector<8x16xf32> -> vector<8x16xf32>
    %c0_18 = arith.constant 0 : index
    %c0_19 = arith.constant 0 : index
    %25 = vector.load %arg9[%c0_18, %c0_19] : memref<1x16xf32, #tpu.memory_space<vmem>>, vector<1x16xf32>
    %26 = vector.broadcast %25 : vector<1x16xf32> to vector<8x16xf32>
    %27 = arith.addf %24, %26 : vector<8x16xf32>
    %28 = arith.truncf %27 : vector<8x16xf32> to vector<8x16xbf16>
    %c0_20 = arith.constant 0 : index
    %c0_21 = arith.constant 0 : index
    %29 = vector.load %arg10[%c0_20, %c0_21] : memref<16x64xbf16, #tpu.memory_space<vmem>>, vector<16x64xbf16>
    %cst_22 = arith.constant dense<0.000000e+00> : vector<8x64xf32>
    %30 = tpu.matmul %28, %29, %cst_22 {dimension_numbers = #tpu.dot_dimension_numbers<[1], [0], [0], [1], [0, 0, 1, 1], [], []>} : vector<8x16xbf16>, vector<16x64xbf16>, vector<8x64xf32> -> vector<8x64xf32>
    %c0_23 = arith.constant 0 : index
    %c0_24 = arith.constant 0 : index
    %31 = vector.load %arg11[%c0_23, %c0_24] : memref<1x64xf32, #tpu.memory_space<vmem>>, vector<1x64xf32>
    %32 = vector.broadcast %31 : vector<1x64xf32> to vector<8x64xf32>
    %33 = arith.addf %30, %32 : vector<8x64xf32>
    %34 = math.tanh %33 : vector<8x64xf32>
    %35 = arith.truncf %34 : vector<8x64xf32> to vector<8x64xbf16>
    %c0_25 = arith.constant 0 : index
    %c0_26 = arith.constant 0 : index
    %36 = vector.load %arg12[%c0_25, %c0_26] : memref<64x256xbf16, #tpu.memory_space<vmem>>, vector<64x256xbf16>
    %cst_27 = arith.constant dense<0.000000e+00> : vector<8x256xf32>
    %37 = tpu.matmul %35, %36, %cst_27 {dimension_numbers = #tpu.dot_dimension_numbers<[1], [0], [0], [1], [0, 0, 1, 1], [], []>} : vector<8x64xbf16>, vector<64x256xbf16>, vector<8x256xf32> -> vector<8x256xf32>
    %c0_28 = arith.constant 0 : index
    %c0_29 = arith.constant 0 : index
    %38 = vector.load %arg13[%c0_28, %c0_29] : memref<1x256xf32, #tpu.memory_space<vmem>>, vector<1x256xf32>
    %39 = vector.broadcast %38 : vector<1x256xf32> to vector<8x256xf32>
    %40 = arith.addf %37, %39 : vector<8x256xf32>
    %41 = math.tanh %40 : vector<8x256xf32>
    %42 = arith.truncf %41 : vector<8x256xf32> to vector<8x256xbf16>
    %c0_30 = arith.constant 0 : index
    %c0_31 = arith.constant 0 : index
    %43 = vector.load %arg14[%c0_30, %c0_31] : memref<256x1024xbf16, #tpu.memory_space<vmem>>, vector<256x1024xbf16>
    %cst_32 = arith.constant dense<0.000000e+00> : vector<8x1024xf32>
    %44 = tpu.matmul %42, %43, %cst_32 {dimension_numbers = #tpu.dot_dimension_numbers<[1], [0], [0], [1], [0, 0, 1, 1], [], []>} : vector<8x256xbf16>, vector<256x1024xbf16>, vector<8x1024xf32> -> vector<8x1024xf32>
    %c0_33 = arith.constant 0 : index
    %c0_34 = arith.constant 0 : index
    %45 = vector.load %arg15[%c0_33, %c0_34] : memref<1x1024xf32, #tpu.memory_space<vmem>>, vector<1x1024xf32>
    %46 = vector.broadcast %45 : vector<1x1024xf32> to vector<8x1024xf32>
    %47 = arith.addf %44, %46 : vector<8x1024xf32>
    %48 = math.tanh %47 : vector<8x1024xf32>
    %49 = arith.truncf %48 : vector<8x1024xf32> to vector<8x1024xbf16>
    %c0_35 = arith.constant 0 : index
    %c0_36 = arith.constant 0 : index
    %50 = vector.load %arg16[%c0_35, %c0_36] : memref<1024x512xbf16, #tpu.memory_space<vmem>>, vector<1024x512xbf16>
    %cst_37 = arith.constant dense<0.000000e+00> : vector<8x512xf32>
    %51 = tpu.matmul %49, %50, %cst_37 {dimension_numbers = #tpu.dot_dimension_numbers<[1], [0], [0], [1], [0, 0, 1, 1], [], []>} : vector<8x1024xbf16>, vector<1024x512xbf16>, vector<8x512xf32> -> vector<8x512xf32>
    %c0_38 = arith.constant 0 : index
    %c0_39 = arith.constant 0 : index
    %52 = vector.load %arg17[%c0_38, %c0_39] : memref<1x512xf32, #tpu.memory_space<vmem>>, vector<1x512xf32>
    %53 = vector.broadcast %52 : vector<1x512xf32> to vector<8x512xf32>
    %54 = arith.addf %51, %53 : vector<8x512xf32>
    %55 = arith.mulf %0, %54 : vector<8x512xf32>
    %cst_40 = arith.constant dense<0.000000e+00> : vector<8xf32>
    %56 = vector.multi_reduction <add>, %55, %cst_40 [1] : vector<8x512xf32> to vector<8xf32>
    %57 = vector.shape_cast %56 : vector<8xf32> to vector<8x1xf32>
    %58 = arith.mulf %0, %0 : vector<8x512xf32>
    %cst_41 = arith.constant dense<0.000000e+00> : vector<8xf32>
    %59 = vector.multi_reduction <add>, %58, %cst_41 [1] : vector<8x512xf32> to vector<8xf32>
    %60 = vector.shape_cast %59 : vector<8xf32> to vector<8x1xf32>
    %61 = math.sqrt %60 : vector<8x1xf32>
    %cst_42 = arith.constant 9.99999993E-9 : f32
    %62 = vector.broadcast %cst_42 : f32 to vector<8x1xf32>
    %63 = arith.maximumf %61, %62 : vector<8x1xf32>
    %64 = arith.mulf %54, %54 : vector<8x512xf32>
    %cst_43 = arith.constant dense<0.000000e+00> : vector<8xf32>
    %65 = vector.multi_reduction <add>, %64, %cst_43 [1] : vector<8x512xf32> to vector<8xf32>
    %66 = vector.shape_cast %65 : vector<8xf32> to vector<8x1xf32>
    %67 = math.sqrt %66 : vector<8x1xf32>
    %cst_44 = arith.constant 9.99999993E-9 : f32
    %68 = vector.broadcast %cst_44 : f32 to vector<8x1xf32>
    %69 = arith.maximumf %67, %68 : vector<8x1xf32>
    %70 = arith.mulf %63, %69 : vector<8x1xf32>
    %71 = tpu.reciprocal %70 {approx = true} : vector<8x1xf32> -> vector<8x1xf32>
    %72 = arith.mulf %57, %71 : vector<8x1xf32>
    %cst_45 = arith.constant 1.000000e+00 : f32
    %73 = vector.broadcast %cst_45 : f32 to vector<8x1xf32>
    %74 = arith.subf %73, %72 : vector<8x1xf32>
    %75 = arith.subf %0, %54 : vector<8x512xf32>
    %76 = arith.mulf %75, %75 : vector<8x512xf32>
    %cst_46 = arith.constant dense<0.000000e+00> : vector<8xf32>
    %77 = vector.multi_reduction <add>, %76, %cst_46 [1] : vector<8x512xf32> to vector<8xf32>
    %78 = vector.shape_cast %77 : vector<8xf32> to vector<8x1xf32>
    %79 = math.sqrt %78 : vector<8x1xf32>
    %80 = arith.truncf %27 : vector<8x16xf32> to vector<8x16xbf16>
    %c0_47 = arith.constant 0 : index
    %c0_48 = arith.constant 0 : index
    %81 = vector.load %arg18[%c0_47, %c0_48] : memref<16x10xbf16, #tpu.memory_space<vmem>>, vector<16x10xbf16>
    %cst_49 = arith.constant dense<0.000000e+00> : vector<8x10xf32>
    %82 = tpu.matmul %80, %81, %cst_49 {dimension_numbers = #tpu.dot_dimension_numbers<[1], [0], [0], [1], [0, 0, 1, 1], [], []>} : vector<8x16xbf16>, vector<16x10xbf16>, vector<8x10xf32> -> vector<8x10xf32>
    %c0_50 = arith.constant 0 : index
    %c0_51 = arith.constant 0 : index
    %83 = vector.load %arg19[%c0_50, %c0_51] : memref<1x10xbf16, #tpu.memory_space<vmem>>, vector<1x10xbf16>
    %84 = arith.extf %83 : vector<1x10xbf16> to vector<1x10xf32>
    %85 = vector.broadcast %79 : vector<8x1xf32> to vector<8x10xf32>
    %86 = vector.broadcast %84 : vector<1x10xf32> to vector<8x10xf32>
    %87 = arith.mulf %85, %86 : vector<8x10xf32>
    %88 = arith.addf %82, %87 : vector<8x10xf32>
    %c0_52 = arith.constant 0 : index
    %c0_53 = arith.constant 0 : index
    %89 = vector.load %arg20[%c0_52, %c0_53] : memref<1x10xbf16, #tpu.memory_space<vmem>>, vector<1x10xbf16>
    %90 = arith.extf %89 : vector<1x10xbf16> to vector<1x10xf32>
    %91 = vector.broadcast %74 : vector<8x1xf32> to vector<8x10xf32>
    %92 = vector.broadcast %90 : vector<1x10xf32> to vector<8x10xf32>
    %93 = arith.mulf %91, %92 : vector<8x10xf32>
    %94 = arith.addf %88, %93 : vector<8x10xf32>
    %c0_54 = arith.constant 0 : index
    %c0_55 = arith.constant 0 : index
    %95 = vector.load %arg21[%c0_54, %c0_55] : memref<1x10xf32, #tpu.memory_space<vmem>>, vector<1x10xf32>
    %96 = vector.broadcast %95 : vector<1x10xf32> to vector<8x10xf32>
    %97 = arith.addf %94, %96 : vector<8x10xf32>
    %98 = math.tanh %97 : vector<8x10xf32>
    %99 = arith.truncf %98 : vector<8x10xf32> to vector<8x10xbf16>
    %c0_56 = arith.constant 0 : index
    %c0_57 = arith.constant 0 : index
    %100 = vector.load %arg22[%c0_56, %c0_57] : memref<10x2xbf16, #tpu.memory_space<vmem>>, vector<10x2xbf16>
    %cst_58 = arith.constant dense<0.000000e+00> : vector<8x2xf32>
    %101 = tpu.matmul %99, %100, %cst_58 {dimension_numbers = #tpu.dot_dimension_numbers<[1], [0], [0], [1], [0, 0, 1, 1], [], []>} : vector<8x10xbf16>, vector<10x2xbf16>, vector<8x2xf32> -> vector<8x2xf32>
    %c0_59 = arith.constant 0 : index
    %c0_60 = arith.constant 0 : index
    %102 = vector.load %arg23[%c0_59, %c0_60] : memref<1x2xf32, #tpu.memory_space<vmem>>, vector<1x2xf32>
    %103 = vector.broadcast %102 : vector<1x2xf32> to vector<8x2xf32>
    %104 = arith.addf %101, %103 : vector<8x2xf32>
    %cst_61 = arith.constant dense<0xFF800000> : vector<8xf32>
    %105 = vector.multi_reduction <maximumf>, %104, %cst_61 [1] : vector<8x2xf32> to vector<8xf32>
    %106 = vector.shape_cast %105 : vector<8xf32> to vector<8x1xf32>
    %107 = vector.broadcast %106 : vector<8x1xf32> to vector<8x2xf32>
    %108 = arith.subf %104, %107 : vector<8x2xf32>
    %109 = math.exp %108 : vector<8x2xf32>
    %cst_62 = arith.constant dense<0.000000e+00> : vector<8xf32>
    %110 = vector.multi_reduction <add>, %109, %cst_62 [1] : vector<8x2xf32> to vector<8xf32>
    %111 = vector.shape_cast %110 : vector<8xf32> to vector<8x1xf32>
    %112 = tpu.reciprocal %111 {approx = true} : vector<8x1xf32> -> vector<8x1xf32>
    %113 = vector.broadcast %112 : vector<8x1xf32> to vector<8x2xf32>
    %114 = arith.mulf %109, %113 : vector<8x2xf32>
    %c0_63 = arith.constant 0 : index
    %c0_64 = arith.constant 0 : index
    %115 = vector.load %arg24[%c0_63, %c0_64] : memref<8x16xf32, #tpu.memory_space<vmem>>, vector<8x16xf32>
    tpu.vector_store %arg24[%c0_63, %c0_64], %27 {strides = array<i32>} : memref<8x16xf32, #tpu.memory_space<vmem>>, vector<8x16xf32>,
    %c0_65 = arith.constant 0 : index
    %c0_66 = arith.constant 0 : index
    %116 = vector.load %arg25[%c0_65, %c0_66] : memref<8x512xf32, #tpu.memory_space<vmem>>, vector<8x512xf32>
    tpu.vector_store %arg25[%c0_65, %c0_66], %54 {strides = array<i32>} : memref<8x512xf32, #tpu.memory_space<vmem>>, vector<8x512xf32>,
    %c0_67 = arith.constant 0 : index
    %c0_68 = arith.constant 0 : index
    %117 = vector.load %arg26[%c0_67, %c0_68] : memref<8x18xf32, #tpu.memory_space<vmem>>, vector<8x16xf32>
    tpu.vector_store %arg26[%c0_67, %c0_68], %27 {strides = array<i32>} : memref<8x18xf32, #tpu.memory_space<vmem>>, vector<8x16xf32>,
    %c0_69 = arith.constant 0 : index
    %c16 = arith.constant 16 : index
    %118 = vector.load %arg26[%c0_69, %c16] : memref<8x18xf32, #tpu.memory_space<vmem>>, vector<8x1xf32>
    tpu.vector_store %arg26[%c0_69, %c16], %79 {strides = array<i32>} : memref<8x18xf32, #tpu.memory_space<vmem>>, vector<8x1xf32>,
    %c0_70 = arith.constant 0 : index
    %c17 = arith.constant 17 : index
    %119 = vector.load %arg26[%c0_70, %c17] : memref<8x18xf32, #tpu.memory_space<vmem>>, vector<8x1xf32>
    tpu.vector_store %arg26[%c0_70, %c17], %74 {strides = array<i32>} : memref<8x18xf32, #tpu.memory_space<vmem>>, vector<8x1xf32>,
    %c0_71 = arith.constant 0 : index
    %c0_72 = arith.constant 0 : index
    %120 = vector.load %arg27[%c0_71, %c0_72] : memref<8x2xf32, #tpu.memory_space<vmem>>, vector<8x2xf32>
    tpu.vector_store %arg27[%c0_71, %c0_72], %114 {strides = array<i32>} : memref<8x2xf32, #tpu.memory_space<vmem>>, vector<8x2xf32>,
    return
  }
  func.func @transform_0(%arg0: i32) -> (i32, i32) {
    %c0_i32 = arith.constant 0 : i32
    %c0_i32_0 = arith.constant 0 : i32
    return %arg0, %c0_i32 : i32, i32
  }
  func.func @transform_1(%arg0: i32) -> (i32, i32) {
    %c0_i32 = arith.constant 0 : i32
    %c0_i32_0 = arith.constant 0 : i32
    %c0_i32_1 = arith.constant 0 : i32
    return %c0_i32, %c0_i32_0 : i32, i32
  }
  func.func @transform_2(%arg0: i32) -> (i32, i32) {
    %c0_i32 = arith.constant 0 : i32
    %c0_i32_0 = arith.constant 0 : i32
    %c0_i32_1 = arith.constant 0 : i32
    return %c0_i32, %c0_i32_0 : i32, i32
  }
  func.func @transform_3(%arg0: i32) -> (i32, i32) {
    %c0_i32 = arith.constant 0 : i32
    %c0_i32_0 = arith.constant 0 : i32
    %c0_i32_1 = arith.constant 0 : i32
    return %c0_i32, %c0_i32_0 : i32, i32
  }
  func.func @transform_4(%arg0: i32) -> (i32, i32) {
    %c0_i32 = arith.constant 0 : i32
    %c0_i32_0 = arith.constant 0 : i32
    %c0_i32_1 = arith.constant 0 : i32
    return %c0_i32, %c0_i32_0 : i32, i32
  }
  func.func @transform_5(%arg0: i32) -> (i32, i32) {
    %c0_i32 = arith.constant 0 : i32
    %c0_i32_0 = arith.constant 0 : i32
    %c0_i32_1 = arith.constant 0 : i32
    return %c0_i32, %c0_i32_0 : i32, i32
  }
  func.func @transform_6(%arg0: i32) -> (i32, i32) {
    %c0_i32 = arith.constant 0 : i32
    %c0_i32_0 = arith.constant 0 : i32
    %c0_i32_1 = arith.constant 0 : i32
    return %c0_i32, %c0_i32_0 : i32, i32
  }
  func.func @transform_7(%arg0: i32) -> (i32, i32) {
    %c0_i32 = arith.constant 0 : i32
    %c0_i32_0 = arith.constant 0 : i32
    %c0_i32_1 = arith.constant 0 : i32
    return %c0_i32, %c0_i32_0 : i32, i32
  }
  func.func @transform_8(%arg0: i32) -> (i32, i32) {
    %c0_i32 = arith.constant 0 : i32
    %c0_i32_0 = arith.constant 0 : i32
    %c0_i32_1 = arith.constant 0 : i32
    return %c0_i32, %c0_i32_0 : i32, i32
  }
  func.func @transform_9(%arg0: i32) -> (i32, i32) {
    %c0_i32 = arith.constant 0 : i32
    %c0_i32_0 = arith.constant 0 : i32
    %c0_i32_1 = arith.constant 0 : i32
    return %c0_i32, %c0_i32_0 : i32, i32
  }
  func.func @transform_10(%arg0: i32) -> (i32, i32) {
    %c0_i32 = arith.constant 0 : i32
    %c0_i32_0 = arith.constant 0 : i32
    %c0_i32_1 = arith.constant 0 : i32
    return %c0_i32, %c0_i32_0 : i32, i32
  }
  func.func @transform_11(%arg0: i32) -> (i32, i32) {
    %c0_i32 = arith.constant 0 : i32
    %c0_i32_0 = arith.constant 0 : i32
    %c0_i32_1 = arith.constant 0 : i32
    return %c0_i32, %c0_i32_0 : i32, i32
  }
  func.func @transform_12(%arg0: i32) -> (i32, i32) {
    %c0_i32 = arith.constant 0 : i32
    %c0_i32_0 = arith.constant 0 : i32
    %c0_i32_1 = arith.constant 0 : i32
    return %c0_i32, %c0_i32_0 : i32, i32
  }
  func.func @transform_13(%arg0: i32) -> (i32, i32) {
    %c0_i32 = arith.constant 0 : i32
    %c0_i32_0 = arith.constant 0 : i32
    %c0_i32_1 = arith.constant 0 : i32
    return %c0_i32, %c0_i32_0 : i32, i32
  }
  func.func @transform_14(%arg0: i32) -> (i32, i32) {
    %c0_i32 = arith.constant 0 : i32
    %c0_i32_0 = arith.constant 0 : i32
    %c0_i32_1 = arith.constant 0 : i32
    return %c0_i32, %c0_i32_0 : i32, i32
  }
  func.func @transform_15(%arg0: i32) -> (i32, i32) {
    %c0_i32 = arith.constant 0 : i32
    %c0_i32_0 = arith.constant 0 : i32
    %c0_i32_1 = arith.constant 0 : i32
    return %c0_i32, %c0_i32_0 : i32, i32
  }
  func.func @transform_16(%arg0: i32) -> (i32, i32) {
    %c0_i32 = arith.constant 0 : i32
    %c0_i32_0 = arith.constant 0 : i32
    %c0_i32_1 = arith.constant 0 : i32
    return %c0_i32, %c0_i32_0 : i32, i32
  }
  func.func @transform_17(%arg0: i32) -> (i32, i32) {
    %c0_i32 = arith.constant 0 : i32
    %c0_i32_0 = arith.constant 0 : i32
    %c0_i32_1 = arith.constant 0 : i32
    return %c0_i32, %c0_i32_0 : i32, i32
  }
  func.func @transform_18(%arg0: i32) -> (i32, i32) {
    %c0_i32 = arith.constant 0 : i32
    %c0_i32_0 = arith.constant 0 : i32
    %c0_i32_1 = arith.constant 0 : i32
    return %c0_i32, %c0_i32_0 : i32, i32
  }
  func.func @transform_19(%arg0: i32) -> (i32, i32) {
    %c0_i32 = arith.constant 0 : i32
    %c0_i32_0 = arith.constant 0 : i32
    %c0_i32_1 = arith.constant 0 : i32
    return %c0_i32, %c0_i32_0 : i32, i32
  }
  func.func @transform_20(%arg0: i32) -> (i32, i32) {
    %c0_i32 = arith.constant 0 : i32
    %c0_i32_0 = arith.constant 0 : i32
    %c0_i32_1 = arith.constant 0 : i32
    return %c0_i32, %c0_i32_0 : i32, i32
  }
  func.func @transform_21(%arg0: i32) -> (i32, i32) {
    %c0_i32 = arith.constant 0 : i32
    %c0_i32_0 = arith.constant 0 : i32
    %c0_i32_1 = arith.constant 0 : i32
    return %c0_i32, %c0_i32_0 : i32, i32
  }
  func.func @transform_22(%arg0: i32) -> (i32, i32) {
    %c0_i32 = arith.constant 0 : i32
    %c0_i32_0 = arith.constant 0 : i32
    %c0_i32_1 = arith.constant 0 : i32
    return %c0_i32, %c0_i32_0 : i32, i32
  }
  func.func @transform_23(%arg0: i32) -> (i32, i32) {
    %c0_i32 = arith.constant 0 : i32
    %c0_i32_0 = arith.constant 0 : i32
    return %arg0, %c0_i32 : i32, i32
  }
  func.func @transform_24(%arg0: i32) -> (i32, i32) {
    %c0_i32 = arith.constant 0 : i32
    %c0_i32_0 = arith.constant 0 : i32
    return %arg0, %c0_i32 : i32, i32
  }
  func.func @transform_25(%arg0: i32) -> (i32, i32) {
    %c0_i32 = arith.constant 0 : i32
    %c0_i32_0 = arith.constant 0 : i32
    return %arg0, %c0_i32 : i32, i32
  }
  func.func @transform_26(%arg0: i32) -> (i32, i32) {
    %c0_i32 = arith.constant 0 : i32
    %c0_i32_0 = arith.constant 0 : i32
    return %arg0, %c0_i32 : i32, i32
  }
}

</mosaic_0001>

<bundles_post_ra>
// kernel: dagmm_forward.1
= control target key start
LH: loop header
LB: loop body
LE: loop exit
PB: predicated region body
PF: predicated region fallthrough
CT: control target
= control target key end

     0   :  { %s10954_s0 = inlined_call_operand.vmem [shape: f32[8,512], index: 0, kind: input, shape index: {}]   ;;  %s10955_s1 = inlined_call_operand.vmem [shape: bf16[512,1024], index: 1, kind: input, shape index: {}]   ;;  %s10956_s2 = inlined_call_operand.vmem [shape: f32[1,1024], index: 2, kind: input, shape index: {}]   ;;  %s10957_s3 = inlined_call_operand.vmem [shape: bf16[1024,256], index: 3, kind: input, shape index: {}]   ;;  %s10958_s4 = inlined_call_operand.vmem [shape: f32[1,256], index: 4, kind: input, shape index: {}]   ;;  %s10959_s5 = inlined_call_operand.vmem [shape: bf16[256,64], index: 5, kind: input, shape index: {}]   ;;  %s10960_s6 = inlined_call_operand.vmem [shape: f32[1,64], index: 6, kind: input, shape index: {}]   ;;  %s10961_s7 = inlined_call_operand.vmem [shape: bf16[64,16], index: 7, kind: input, shape index: {}]   ;;  %s10962_s8 = inlined_call_operand.vmem [shape: f32[1,16], index: 8, kind: input, shape index: {}]   ;;  %s10963_s9 = inlined_call_operand.vmem [shape: bf16[16,64], index: 9, kind: input, shape index: {}]   ;;  %s10964_s10 = inlined_call_operand.vmem [shape: f32[1,64], index: 10, kind: input, shape index: {}]   ;;  %s10965_s11 = inlined_call_operand.vmem [shape: bf16[64,256], index: 11, kind: input, shape index: {}]   ;;  %s10966_s12 = inlined_call_operand.vmem [shape: f32[1,256], index: 12, kind: input, shape index: {}]   ;;  %s10967_s13 = inlined_call_operand.vmem [shape: bf16[256,1024], index: 13, kind: input, shape index: {}]   ;;  %s10968_s14 = inlined_call_operand.vmem [shape: f32[1,1024], index: 14, kind: input, shape index: {}]   ;;  %s10969_s15 = inlined_call_operand.vmem [shape: bf16[1024,512], index: 15, kind: input, shape index: {}]   ;;  %s10970_s16 = inlined_call_operand.vmem [shape: f32[1,512], index: 16, kind: input, shape index: {}]   ;;  %s10971_s17 = inlined_call_operand.vmem [shape: bf16[16,10], index: 17, kind: input, shape index: {}]   ;;  %s10972_s18 = inlined_call_operand.vmem [shape: bf16[1,10], index: 18, kind: input, shape index: {}]   ;;  %s10973_s19 = inlined_call_operand.vmem [shape: bf16[1,10], index: 19, kind: input, shape index: {}]   ;;  %s10974_s20 = inlined_call_operand.vmem [shape: f32[1,10], index: 20, kind: input, shape index: {}]   ;;  %s10975_s21 = inlined_call_operand.vmem [shape: bf16[10,2], index: 21, kind: input, shape index: {}]   ;;  %s10976_s22 = inlined_call_operand.vmem [shape: f32[1,2], index: 22, kind: input, shape index: {}]   ;;  %s10977_s23 = inlined_call_operand.hbm [shape: f32[8,16], index: 23, kind: output, shape index: {0}]   ;;  %s10978_s24 = inlined_call_operand.hbm [shape: f32[8,512], index: 24, kind: output, shape index: {1}]   ;;  %s10979_s25 = inlined_call_operand.hbm [shape: f32[8,18], index: 25, kind: output, shape index: {2}]   ;;  %s10980_s26 = inlined_call_operand.vmem [shape: f32[8,2], index: 26, kind: output, shape index: {3}]  }
   0x1   :  { %10986 = sst [smem:[#allocation9_spill]] %s10954_s0 }
   0x2   :  { %10987 = sst [smem:[#allocation10_spill]] %s10955_s1 }
   0x3   :  { %10988 = sst [smem:[#allocation11_spill]] %s10956_s2 }
   0x4   :  { %10989 = sst [smem:[#allocation12_spill]] %s10957_s3 }
   0x5   :  { %10990 = sst [smem:[#allocation13_spill]] %s10958_s4 }
   0x6   :  { %10991 = sst [smem:[#allocation14_spill]] %s10959_s5 }
   0x7   :  { %10992 = sst [smem:[#allocation15_spill]] %s10960_s6 }
   0x8   :  { %10993 = sst [smem:[#allocation16_spill]] %s10961_s7 }
   0x9   :  { %10994 = sst [smem:[#allocation17_spill]] %s10962_s8 }
   0xa   :  { %10995 = sst [smem:[#allocation18_spill]] %s10963_s9 }
   0xb   :  { %10996 = sst [smem:[#allocation19_spill]] %s10964_s10 }
   0xc   :  { %32 = vsyncpa [#allocation3], 0  ;;  %s10997_s7 = sld [smem:[#allocation10_spill]] }
   0xd   :  { %s10998_s28 = sld [smem:[#allocation9_spill]] }
   0xe   :  { %s10999_s6 = sld [smem:[#allocation12_spill]] }
   0xf   :  { %s11000_s8 = sld [smem:[#allocation11_spill]] }
  0x12   :  { %v145_v0 = vld [vmem:[%s10997_s7 + $0x1c0] sm:$0xff] }
  0x13   :  { %v149_v1 = vld [vmem:[%s10997_s7 + $0x1e0] sm:$0xff]  ;;  %v82_v53 = vld [vmem:[%s10998_s28 + $0x8] sm:$0xff]  ;;  %v84_v54 = vld [vmem:[%s10998_s28 + $0x18] sm:$0xff] }
  0x14   :  { %v273_v2 = vld [vmem:[%s10997_s7 + $0x5c0] sm:$0xff]  ;;  %v6592_v3 = vcombine.high %v145_v0, %v149_v1  ;;  %v6591_v5 = vcombine.low %v145_v0, %v149_v1  ;;  %v8387_v58 = vpack.c.bf16 %v82_v53, %v82_v53  ;;  %v8389_v59 = vpack.c.bf16 %v84_v54, %v84_v54 }
  0x15   :  { %v277_v4 = vld [vmem:[%s10997_s7 + $0x5e0] sm:$0xff] }
  0x16   :  { %v137_v6 = vld [vmem:[%s10997_s7 + $0x180] sm:$0xff]  ;;  %v6720_v8 = vcombine.high %v273_v2, %v277_v4  ;;  %v6719_v9 = vcombine.low %v273_v2, %v277_v4  ;;  %1667 = vmatprep.subr.bf16.mxu0 %v6592_v3  ;;  %1699 = vmatprep.mubr.bf16.mxu0 %v8387_v58 }
  0x17   :  { %v141_v7 = vld [vmem:[%s10997_s7 + $0x1a0] sm:$0xff]  ;;  %1668 = vmatpush1.bf16.msra.mxu0 %v6591_v5  ;;  %1740 = vmatprep.mubr.bf16.mxu1 %v8389_v59 }
  0x18   :  { %v6584_v10 = vcombine.high %v137_v6, %v141_v7  ;;  %v265_v11 = vld [vmem:[%s10997_s7 + $0x580] sm:$0xff]  ;;  %1708 = vmatprep.subr.bf16.mxu1 %v6720_v8  ;;  %v6583_v18 = vcombine.low %v137_v6, %v141_v7 }
  0x19   :  { %v269_v12 = vld [vmem:[%s10997_s7 + $0x5a0] sm:$0xff]  ;;  %1709 = vmatpush1.bf16.msra.mxu1 %v6719_v9 }
  0x1a   :  { %v129_v13 = vld [vmem:[%s10997_s7 + $0x140] sm:$0xff]  ;;  %v6712_v14 = vcombine.high %v265_v11, %v269_v12  ;;  %1669 = vmatprep.subr.bf16.mxu0 %v6584_v10  ;;  %v6711_v19 = vcombine.low %v265_v11, %v269_v12 }
  0x1b   :  { %v133_v15 = vld [vmem:[%s10997_s7 + $0x160] sm:$0xff]  ;;  %1670 = vmatpush1.bf16.msra.mxu0 %v6583_v18 }
  0x1c   :  { %v257_v16 = vld [vmem:[%s10997_s7 + $0x540] sm:$0xff]  ;;  %v6576_v20 = vcombine.high %v129_v13, %v133_v15  ;;  %1710 = vmatprep.subr.bf16.mxu1 %v6712_v14  ;;  %v6575_v26 = vcombine.low %v129_v13, %v133_v15 }
  0x1d   :  { %v261_v17 = vld [vmem:[%s10997_s7 + $0x560] sm:$0xff]  ;;  %1711 = vmatpush1.bf16.msra.mxu1 %v6711_v19 }
  0x1e   :  { %v6704_v21 = vcombine.high %v257_v16, %v261_v17  ;;  %v121_v22 = vld [vmem:[%s10997_s7 + $0x100] sm:$0xff]  ;;  %1671 = vmatprep.subr.bf16.mxu0 %v6576_v20  ;;  %v6703_v27 = vcombine.low %v257_v16, %v261_v17 }
  0x1f   :  { %v125_v23 = vld [vmem:[%s10997_s7 + $0x120] sm:$0xff]  ;;  %1672 = vmatpush1.bf16.msra.mxu0 %v6575_v26 }
  0x20   :  { %v249_v24 = vld [vmem:[%s10997_s7 + $0x500] sm:$0xff]  ;;  %v6568_v28 = vcombine.high %v121_v22, %v125_v23  ;;  %1712 = vmatprep.subr.bf16.mxu1 %v6704_v21  ;;  %v6567_v34 = vcombine.low %v121_v22, %v125_v23 }
  0x21   :  { %v253_v25 = vld [vmem:[%s10997_s7 + $0x520] sm:$0xff]  ;;  %1713 = vmatpush1.bf16.msra.mxu1 %v6703_v27 }
  0x22   :  { %v6696_v29 = vcombine.high %v249_v24, %v253_v25  ;;  %v113_v30 = vld [vmem:[%s10997_s7 + $0xc0] sm:$0xff]  ;;  %1673 = vmatprep.subr.bf16.mxu0 %v6568_v28  ;;  %v6695_v35 = vcombine.low %v249_v24, %v253_v25 }
  0x23   :  { %v117_v31 = vld [vmem:[%s10997_s7 + $0xe0] sm:$0xff]  ;;  %1674 = vmatpush1.bf16.msra.mxu0 %v6567_v34 }
  0x24   :  { %v241_v32 = vld [vmem:[%s10997_s7 + $0x4c0] sm:$0xff]  ;;  %v6560_v36 = vcombine.high %v113_v30, %v117_v31  ;;  %1714 = vmatprep.subr.bf16.mxu1 %v6696_v29  ;;  %v6559_v42 = vcombine.low %v113_v30, %v117_v31 }
  0x25   :  { %v245_v33 = vld [vmem:[%s10997_s7 + $0x4e0] sm:$0xff]  ;;  %1715 = vmatpush1.bf16.msra.mxu1 %v6695_v35 }
  0x26   :  { %v6688_v37 = vcombine.high %v241_v32, %v245_v33  ;;  %v105_v38 = vld [vmem:[%s10997_s7 + $0x80] sm:$0xff]  ;;  %1675 = vmatprep.subr.bf16.mxu0 %v6560_v36  ;;  %v6687_v43 = vcombine.low %v241_v32, %v245_v33 }
  0x27   :  { %v109_v39 = vld [vmem:[%s10997_s7 + $0xa0] sm:$0xff]  ;;  %1676 = vmatpush1.bf16.msra.mxu0 %v6559_v42 }
  0x28   :  { %v233_v40 = vld [vmem:[%s10997_s7 + $0x480] sm:$0xff]  ;;  %v6552_v44 = vcombine.high %v105_v38, %v109_v39  ;;  %1716 = vmatprep.subr.bf16.mxu1 %v6688_v37  ;;  %v6551_v50 = vcombine.low %v105_v38, %v109_v39 }
  0x29   :  { %v237_v41 = vld [vmem:[%s10997_s7 + $0x4a0] sm:$0xff]  ;;  %1717 = vmatpush1.bf16.msra.mxu1 %v6687_v43 }
  0x2a   :  { %v6680_v45 = vcombine.high %v233_v40, %v237_v41  ;;  %v97_v46 = vld [vmem:[%s10997_s7 + $0x40] sm:$0xff]  ;;  %1677 = vmatprep.subr.bf16.mxu0 %v6552_v44  ;;  %v6679_v51 = vcombine.low %v233_v40, %v237_v41 }
  0x2b   :  { %v101_v47 = vld [vmem:[%s10997_s7 + $0x60] sm:$0xff]  ;;  %1678 = vmatpush1.bf16.msra.mxu0 %v6551_v50 }
  0x2c   :  { %v225_v48 = vld [vmem:[%s10997_s7 + $0x440] sm:$0xff]  ;;  %v6544_v52 = vcombine.high %v97_v46, %v101_v47  ;;  %1718 = vmatprep.subr.bf16.mxu1 %v6680_v45  ;;  %v6543_v62 = vcombine.low %v97_v46, %v101_v47 }
  0x2d   :  { %v229_v49 = vld [vmem:[%s10997_s7 + $0x460] sm:$0xff]  ;;  %1719 = vmatpush1.bf16.msra.mxu1 %v6679_v51 }
  0x2e   :  { %v6672_v55 = vcombine.high %v225_v48, %v229_v49  ;;  %v89_v56 = vld [vmem:[%s10997_s7] sm:$0xff]  ;;  %1679 = vmatprep.subr.bf16.mxu0 %v6544_v52  ;;  %v6671_v63 = vcombine.low %v225_v48, %v229_v49 }
  0x2f   :  { %v93_v57 = vld [vmem:[%s10997_s7 + $0x20] sm:$0xff]  ;;  %1680 = vmatpush1.bf16.msra.mxu0 %v6543_v62 }
  0x30   :  { %v217_v60 = vld [vmem:[%s10997_s7 + $0x400] sm:$0xff]  ;;  %v6536_v0 = vcombine.high %v89_v56, %v93_v57  ;;  %1720 = vmatprep.subr.bf16.mxu1 %v6672_v55  ;;  %v6535_v6 = vcombine.low %v89_v56, %v93_v57 }
  0x31   :  { %v221_v61 = vld [vmem:[%s10997_s7 + $0x420] sm:$0xff]  ;;  %1721 = vmatpush1.bf16.msra.mxu1 %v6671_v63 }
  0x32   :  { %v6664_v1 = vcombine.high %v217_v60, %v221_v61  ;;  %v209_v2 = vld [vmem:[%s10997_s7 + $0x3c0] sm:$0xff]  ;;  %1681 = vmatprep.subr.bf16.mxu0 %v6536_v0  ;;  %v6663_v7 = vcombine.low %v217_v60, %v221_v61 }
  0x33   :  { %v213_v3 = vld [vmem:[%s10997_s7 + $0x3e0] sm:$0xff]  ;;  %1682 = vmatpush1.bf16.msra.mxu0 %v6535_v6  ;;  %v274_v6 = vld [vmem:[%s10997_s7 + $0x5c8] sm:$0xff] }
  0x34   :  { %v337_v4 = vld [vmem:[%s10997_s7 + $0x7c0] sm:$0xff]  ;;  %v6656_v8 = vcombine.high %v209_v2, %v213_v3  ;;  %1722 = vmatprep.subr.bf16.mxu1 %v6664_v1  ;;  %v6655_v14 = vcombine.low %v209_v2, %v213_v3 }
  0x35   :  { %v341_v5 = vld [vmem:[%s10997_s7 + $0x7e0] sm:$0xff]  ;;  %1723 = vmatpush1.bf16.msra.mxu1 %v6663_v7  ;;  %v278_v7 = vld [vmem:[%s10997_s7 + $0x5e8] sm:$0xff] }
  0x36   :  { %v6784_v9 = vcombine.high %v337_v4, %v341_v5  ;;  %v201_v10 = vld [vmem:[%s10997_s7 + $0x380] sm:$0xff]  ;;  %1683 = vmatprep.subr.bf16.mxu0 %v6656_v8  ;;  %v6783_v15 = vcombine.low %v337_v4, %v341_v5  ;;  %v146_v4 = vld [vmem:[%s10997_s7 + $0x1c8] sm:$0xff] }
  0x37   :  { %v205_v11 = vld [vmem:[%s10997_s7 + $0x3a0] sm:$0xff]  ;;  %1684 = vmatpush2.bf16.msra.mxu0 %v6655_v14  ;;  %v150_v5 = vld [vmem:[%s10997_s7 + $0x1e8] sm:$0xff] }
  0x38   :  { %v329_v12 = vld [vmem:[%s10997_s7 + $0x780] sm:$0xff]  ;;  %v6648_v16 = vcombine.high %v201_v10, %v205_v11  ;;  %1724 = vmatprep.subr.bf16.mxu1 %v6784_v9  ;;  %v6647_v22 = vcombine.low %v201_v10, %v205_v11  ;;  %v83_v11 = vld [vmem:[%s10998_s28 + $0x10] sm:$0xff]  ;;  %v138_v14 = vld [vmem:[%s10997_s7 + $0x188] sm:$0xff] }
  0x39   :  { %v333_v13 = vld [vmem:[%s10997_s7 + $0x7a0] sm:$0xff]  ;;  %1725 = vmatpush2.bf16.msra.mxu1 %v6783_v15  ;;  %v142_v15 = vld [vmem:[%s10997_s7 + $0x1a8] sm:$0xff] }
  0x3a   :  { %v6776_v17 = vcombine.high %v329_v12, %v333_v13  ;;  %v193_v18 = vld [vmem:[%s10997_s7 + $0x340] sm:$0xff]  ;;  %1685 = vmatprep.subr.bf16.mxu0 %v6648_v16  ;;  %v6775_v23 = vcombine.low %v329_v12, %v333_v13  ;;  %v6594_v12 = vcombine.high %v146_v4, %v150_v5  ;;  %v6722_v13 = vcombine.high %v274_v6, %v278_v7 }
  0x3b   :  { %v197_v19 = vld [vmem:[%s10997_s7 + $0x360] sm:$0xff]  ;;  %1686 = vmatpush2.bf16.msra.mxu0 %v6647_v22  ;;  %v6586_v22 = vcombine.high %v138_v14, %v142_v15 }
  0x3c   :  { %v321_v20 = vld [vmem:[%s10997_s7 + $0x740] sm:$0xff]  ;;  %v6640_v24 = vcombine.high %v193_v18, %v197_v19  ;;  %1726 = vmatprep.subr.bf16.mxu1 %v6776_v17  ;;  %v6639_v30 = vcombine.low %v193_v18, %v197_v19  ;;  %v266_v17 = vld [vmem:[%s10997_s7 + $0x588] sm:$0xff]  ;;  %v8527_v19 = vpack.c.bf16 %v83_v11, %v83_v11 }
  0x3d   :  { %v325_v21 = vld [vmem:[%s10997_s7 + $0x760] sm:$0xff]  ;;  %1727 = vmatpush2.bf16.msra.mxu1 %v6775_v23  ;;  %v270_v18 = vld [vmem:[%s10997_s7 + $0x5a8] sm:$0xff] }
  0x3e   :  { %v6768_v25 = vcombine.high %v321_v20, %v325_v21  ;;  %v185_v26 = vld [vmem:[%s10997_s7 + $0x300] sm:$0xff]  ;;  %1687 = vmatprep.subr.bf16.mxu0 %v6640_v24  ;;  %v6767_v31 = vcombine.low %v321_v20, %v325_v21  ;;  %v6593_v20 = vcombine.low %v146_v4, %v150_v5  ;;  %v6721_v21 = vcombine.low %v274_v6, %v278_v7  ;;  %v130_v23 = vld [vmem:[%s10997_s7 + $0x148] sm:$0xff] }
  0x3f   :  { %v189_v27 = vld [vmem:[%s10997_s7 + $0x320] sm:$0xff]  ;;  %1688 = vmatpush2.bf16.msra.mxu0 %v6639_v30  ;;  %v134_v24 = vld [vmem:[%s10997_s7 + $0x168] sm:$0xff] }
  0x40   :  { %v313_v28 = vld [vmem:[%s10997_s7 + $0x700] sm:$0xff]  ;;  %v6632_v32 = vcombine.high %v185_v26, %v189_v27  ;;  %1728 = vmatprep.subr.bf16.mxu1 %v6768_v25  ;;  %v6631_v38 = vcombine.low %v185_v26, %v189_v27  ;;  %v6714_v25 = vcombine.high %v266_v17, %v270_v18  ;;  %v258_v26 = vld [vmem:[%s10997_s7 + $0x548] sm:$0xff]  ;;  %v6578_v30 = vcombine.high %v130_v23, %v134_v24 }
  0x41   :  { %v317_v29 = vld [vmem:[%s10997_s7 + $0x720] sm:$0xff]  ;;  %1729 = vmatpush2.bf16.msra.mxu1 %v6767_v31  ;;  %v262_v27 = vld [vmem:[%s10997_s7 + $0x568] sm:$0xff] }
  0x42   :  { %v6760_v33 = vcombine.high %v313_v28, %v317_v29  ;;  %v177_v34 = vld [vmem:[%s10997_s7 + $0x2c0] sm:$0xff]  ;;  %1689 = vmatprep.subr.bf16.mxu0 %v6632_v32  ;;  %v6759_v39 = vcombine.low %v313_v28, %v317_v29  ;;  %v6585_v28 = vcombine.low %v138_v14, %v142_v15  ;;  %v6713_v29 = vcombine.low %v266_v17, %v270_v18  ;;  %v122_v31 = vld [vmem:[%s10997_s7 + $0x108] sm:$0xff] }
  0x43   :  { %v181_v35 = vld [vmem:[%s10997_s7 + $0x2e0] sm:$0xff]  ;;  %1690 = vmatpush2.bf16.msra.mxu0 %v6631_v38  ;;  %v126_v32 = vld [vmem:[%s10997_s7 + $0x128] sm:$0xff] }
  0x44   :  { %v305_v36 = vld [vmem:[%s10997_s7 + $0x6c0] sm:$0xff]  ;;  %v6624_v40 = vcombine.high %v177_v34, %v181_v35  ;;  %1730 = vmatprep.subr.bf16.mxu1 %v6760_v33  ;;  %v6623_v46 = vcombine.low %v177_v34, %v181_v35  ;;  %v250_v33 = vld [vmem:[%s10997_s7 + $0x508] sm:$0xff]  ;;  %v6706_v34 = vcombine.high %v258_v26, %v262_v27  ;;  %v6570_v38 = vcombine.high %v122_v31, %v126_v32 }
  0x45   :  { %v309_v37 = vld [vmem:[%s10997_s7 + $0x6e0] sm:$0xff]  ;;  %1731 = vmatpush2.bf16.msra.mxu1 %v6759_v39  ;;  %v254_v35 = vld [vmem:[%s10997_s7 + $0x528] sm:$0xff] }
  0x46   :  { %v6752_v41 = vcombine.high %v305_v36, %v309_v37  ;;  %v169_v42 = vld [vmem:[%s10997_s7 + $0x280] sm:$0xff]  ;;  %1691 = vmatprep.subr.bf16.mxu0 %v6624_v40  ;;  %v6751_v47 = vcombine.low %v305_v36, %v309_v37  ;;  %v6577_v36 = vcombine.low %v130_v23, %v134_v24  ;;  %v6705_v37 = vcombine.low %v258_v26, %v262_v27  ;;  %v114_v39 = vld [vmem:[%s10997_s7 + $0xc8] sm:$0xff] }
  0x47   :  { %v173_v43 = vld [vmem:[%s10997_s7 + $0x2a0] sm:$0xff]  ;;  %1692 = vmatpush2.bf16.msra.mxu0 %v6623_v46  ;;  %v118_v40 = vld [vmem:[%s10997_s7 + $0xe8] sm:$0xff] }
  0x48   :  { %v297_v44 = vld [vmem:[%s10997_s7 + $0x680] sm:$0xff]  ;;  %v6616_v48 = vcombine.high %v169_v42, %v173_v43  ;;  %1732 = vmatprep.subr.bf16.mxu1 %v6752_v41  ;;  %v6615_v54 = vcombine.low %v169_v42, %v173_v43  ;;  %v242_v41 = vld [vmem:[%s10997_s7 + $0x4c8] sm:$0xff]  ;;  %v6698_v42 = vcombine.high %v250_v33, %v254_v35  ;;  %v6562_v46 = vcombine.high %v114_v39, %v118_v40 }
  0x49   :  { %v301_v45 = vld [vmem:[%s10997_s7 + $0x6a0] sm:$0xff]  ;;  %1733 = vmatpush2.bf16.msra.mxu1 %v6751_v47  ;;  %v246_v43 = vld [vmem:[%s10997_s7 + $0x4e8] sm:$0xff] }
  0x4a   :  { %v6744_v49 = vcombine.high %v297_v44, %v301_v45  ;;  %v161_v50 = vld [vmem:[%s10997_s7 + $0x240] sm:$0xff]  ;;  %1693 = vmatprep.subr.bf16.mxu0 %v6616_v48  ;;  %v6743_v55 = vcombine.low %v297_v44, %v301_v45  ;;  %v6569_v44 = vcombine.low %v122_v31, %v126_v32  ;;  %v6697_v45 = vcombine.low %v250_v33, %v254_v35  ;;  %v106_v47 = vld [vmem:[%s10997_s7 + $0x88] sm:$0xff] }
  0x4b   :  { %v165_v51 = vld [vmem:[%s10997_s7 + $0x260] sm:$0xff]  ;;  %1694 = vmatpush2.bf16.msra.mxu0 %v6615_v54  ;;  %v110_v48 = vld [vmem:[%s10997_s7 + $0xa8] sm:$0xff] }
  0x4c   :  { %v289_v52 = vld [vmem:[%s10997_s7 + $0x640] sm:$0xff]  ;;  %v6608_v56 = vcombine.high %v161_v50, %v165_v51  ;;  %1734 = vmatprep.subr.bf16.mxu1 %v6744_v49  ;;  %v6607_v0 = vcombine.low %v161_v50, %v165_v51  ;;  %v234_v49 = vld [vmem:[%s10997_s7 + $0x488] sm:$0xff]  ;;  %v6690_v50 = vcombine.high %v242_v41, %v246_v43  ;;  %v6554_v54 = vcombine.high %v106_v47, %v110_v48 }
  0x4d   :  { %v293_v53 = vld [vmem:[%s10997_s7 + $0x660] sm:$0xff]  ;;  %1735 = vmatpush2.bf16.msra.mxu1 %v6743_v55  ;;  %v238_v51 = vld [vmem:[%s10997_s7 + $0x4a8] sm:$0xff] }
  0x4e   :  { %v6736_v57 = vcombine.high %v289_v52, %v293_v53  ;;  %v153_v60 = vld [vmem:[%s10997_s7 + $0x200] sm:$0xff]  ;;  %1695 = vmatprep.subr.bf16.mxu0 %v6608_v56  ;;  %v6735_v1 = vcombine.low %v289_v52, %v293_v53  ;;  %v6561_v52 = vcombine.low %v114_v39, %v118_v40  ;;  %v6689_v53 = vcombine.low %v242_v41, %v246_v43  ;;  %v98_v55 = vld [vmem:[%s10997_s7 + $0x48] sm:$0xff] }
  0x4f   :  { %v157_v61 = vld [vmem:[%s10997_s7 + $0x220] sm:$0xff]  ;;  %1696 = vmatpush2.bf16.msra.mxu0 %v6607_v0  ;;  %v102_v56 = vld [vmem:[%s10997_s7 + $0x68] sm:$0xff] }
  0x50   :  { %v281_v62 = vld [vmem:[%s10997_s7 + $0x600] sm:$0xff]  ;;  %v6600_v2 = vcombine.high %v153_v60, %v157_v61  ;;  %1736 = vmatprep.subr.bf16.mxu1 %v6736_v57  ;;  %v6599_v8 = vcombine.low %v153_v60, %v157_v61  ;;  %v226_v57 = vld [vmem:[%s10997_s7 + $0x448] sm:$0xff]  ;;  %v6682_v60 = vcombine.high %v234_v49, %v238_v51  ;;  %v6546_v0 = vcombine.high %v98_v55, %v102_v56 }
  0x51   :  { %v285_v63 = vld [vmem:[%s10997_s7 + $0x620] sm:$0xff]  ;;  %1737 = vmatpush2.bf16.msra.mxu1 %v6735_v1  ;;  %v230_v61 = vld [vmem:[%s10997_s7 + $0x468] sm:$0xff]  ;;  %v6545_v6 = vcombine.low %v98_v55, %v102_v56 }
  0x52   :  { %v6728_v3 = vcombine.high %v281_v62, %v285_v63  ;;  %v81_v9 = vld [vmem:[%s10998_s28] sm:$0xff]  ;;  %1697 = vmatprep.subr.bf16.mxu0 %v6600_v2  ;;  %v6727_v10 = vcombine.low %v281_v62, %v285_v63  ;;  %v6553_v62 = vcombine.low %v106_v47, %v110_v48  ;;  %v6681_v63 = vcombine.low %v234_v49, %v238_v51  ;;  %v90_v1 = vld [vmem:[%s10997_s7 + $0x8] sm:$0xff] }
  0x53   :  { %v8519_v16 = vpack.c.bf16 %v81_v9, %v81_v9  ;;  %1698 = vmatpush2.bf16.msra.mxu0 %v6599_v8  ;;  %v94_v2 = vld [vmem:[%s10997_s7 + $0x28] sm:$0xff]  ;;  %v6674_v4 = vcombine.high %v226_v57, %v230_v61  ;;  %v6673_v7 = vcombine.low %v226_v57, %v230_v61 }
  0x54   :  { %1738 = vmatprep.subr.bf16.mxu1 %v6728_v3  ;;  %1749 = vmatprep.subr.bf16.mxu0 %v6594_v12  ;;  %v218_v3 = vld [vmem:[%s10997_s7 + $0x408] sm:$0xff]  ;;  %v6538_v8 = vcombine.high %v90_v1, %v94_v2  ;;  %v6537_v14 = vcombine.low %v90_v1, %v94_v2 }
  0x55   :  { %1739 = vmatpush2.bf16.msra.mxu1 %v6727_v10  ;;  %v222_v5 = vld [vmem:[%s10997_s7 + $0x428] sm:$0xff] }
  0x56   :  { %1790 = vmatprep.subr.bf16.mxu1 %v6722_v13  ;;  %1700 = vmatmul.mubr.bf16.vlgmr.msra.gmra.mxu0 %v8519_v16  ;;  %v210_v9 = vld [vmem:[%s10997_s7 + $0x3c8] sm:$0xff]  ;;  %v6666_v12 = vcombine.high %v218_v3, %v222_v5  ;;  %v6665_v15 = vcombine.low %v218_v3, %v222_v5 }
  0x57   :  { %1750 = vmatpush1.bf16.msra.mxu0 %v6593_v20  ;;  %1781 = vmatprep.mubr.bf16.mxu0 %v8387_v58  ;;  %v214_v10 = vld [vmem:[%s10997_s7 + $0x3e8] sm:$0xff] }
  0x58   :  { %1741 = vmatmul.mubr.bf16.vlgmr.msra.gmra.mxu1 %v8527_v19  ;;  %1751 = vmatprep.subr.bf16.mxu0 %v6586_v22  ;;  %v338_v11 = vld [vmem:[%s10997_s7 + $0x7c8] sm:$0xff]  ;;  %v6658_v17 = vcombine.high %v210_v9, %v214_v10  ;;  %v6657_v24 = vcombine.low %v210_v9, %v214_v10 }
  0x59   :  { %1791 = vmatpush1.bf16.msra.mxu1 %v6721_v21  ;;  %1822 = vmatprep.mubr.bf16.mxu1 %v8389_v59  ;;  %v342_v13 = vld [vmem:[%s10997_s7 + $0x7e8] sm:$0xff] }
  0x5a   :  { %1792 = vmatprep.subr.bf16.mxu1 %v6714_v25  ;;  %v202_v18 = vld [vmem:[%s10997_s7 + $0x388] sm:$0xff]  ;;  %v6786_v22 = vcombine.high %v338_v11, %v342_v13  ;;  %v6785_v25 = vcombine.low %v338_v11, %v342_v13  ;;  %v147_v13 = vld [vmem:[%s10997_s7 + $0x1d0] sm:$0xff] }
  0x5b   :  { %1752 = vmatpush1.bf16.msra.mxu0 %v6585_v28  ;;  %v206_v20 = vld [vmem:[%s10997_s7 + $0x3a8] sm:$0xff] }
  0x5c   :  { %1753 = vmatprep.subr.bf16.mxu0 %v6578_v30  ;;  %v330_v21 = vld [vmem:[%s10997_s7 + $0x788] sm:$0xff]  ;;  %v6650_v26 = vcombine.high %v202_v18, %v206_v20  ;;  %v6649_v32 = vcombine.low %v202_v18, %v206_v20  ;;  %v279_v18 = vld [vmem:[%s10997_s7 + $0x5f0] sm:$0xff] }
  0x5d   :  { %1793 = vmatpush1.bf16.msra.mxu1 %v6713_v29  ;;  %v334_v23 = vld [vmem:[%s10997_s7 + $0x7a8] sm:$0xff] }
  0x5e   :  { %1794 = vmatprep.subr.bf16.mxu1 %v6706_v34  ;;  %v194_v27 = vld [vmem:[%s10997_s7 + $0x348] sm:$0xff]  ;;  %v6778_v30 = vcombine.high %v330_v21, %v334_v23  ;;  %v6777_v33 = vcombine.low %v330_v21, %v334_v23  ;;  %v139_v23 = vld [vmem:[%s10997_s7 + $0x190] sm:$0xff] }
  0x5f   :  { %1754 = vmatpush1.bf16.msra.mxu0 %v6577_v36  ;;  %v198_v28 = vld [vmem:[%s10997_s7 + $0x368] sm:$0xff] }
  0x60   :  { %1755 = vmatprep.subr.bf16.mxu0 %v6570_v38  ;;  %v322_v29 = vld [vmem:[%s10997_s7 + $0x748] sm:$0xff]  ;;  %v6642_v34 = vcombine.high %v194_v27, %v198_v28  ;;  %v6641_v40 = vcombine.low %v194_v27, %v198_v28  ;;  %v271_v27 = vld [vmem:[%s10997_s7 + $0x5b0] sm:$0xff] }
  0x61   :  { %1795 = vmatpush1.bf16.msra.mxu1 %v6705_v37  ;;  %v326_v31 = vld [vmem:[%s10997_s7 + $0x768] sm:$0xff] }
  0x62   :  { %1796 = vmatprep.subr.bf16.mxu1 %v6698_v42  ;;  %v186_v35 = vld [vmem:[%s10997_s7 + $0x308] sm:$0xff]  ;;  %v6770_v38 = vcombine.high %v322_v29, %v326_v31  ;;  %v6769_v41 = vcombine.low %v322_v29, %v326_v31  ;;  %v131_v29 = vld [vmem:[%s10997_s7 + $0x150] sm:$0xff] }
  0x63   :  { %1756 = vmatpush1.bf16.msra.mxu0 %v6569_v44  ;;  %v190_v36 = vld [vmem:[%s10997_s7 + $0x328] sm:$0xff] }
  0x64   :  { %1757 = vmatprep.subr.bf16.mxu0 %v6562_v46  ;;  %v314_v37 = vld [vmem:[%s10997_s7 + $0x708] sm:$0xff]  ;;  %v6634_v42 = vcombine.high %v186_v35, %v190_v36  ;;  %v6633_v48 = vcombine.low %v186_v35, %v190_v36  ;;  %v263_v35 = vld [vmem:[%s10997_s7 + $0x570] sm:$0xff] }
  0x65   :  { %1797 = vmatpush1.bf16.msra.mxu1 %v6697_v45  ;;  %v318_v39 = vld [vmem:[%s10997_s7 + $0x728] sm:$0xff] }
  0x66   :  { %1798 = vmatprep.subr.bf16.mxu1 %v6690_v50  ;;  %v178_v43 = vld [vmem:[%s10997_s7 + $0x2c8] sm:$0xff]  ;;  %v6762_v46 = vcombine.high %v314_v37, %v318_v39  ;;  %v6761_v49 = vcombine.low %v314_v37, %v318_v39  ;;  %v123_v37 = vld [vmem:[%s10997_s7 + $0x110] sm:$0xff] }
  0x67   :  { %1758 = vmatpush1.bf16.msra.mxu0 %v6561_v52  ;;  %v182_v44 = vld [vmem:[%s10997_s7 + $0x2e8] sm:$0xff] }
  0x68   :  { %1759 = vmatprep.subr.bf16.mxu0 %v6554_v54  ;;  %v306_v45 = vld [vmem:[%s10997_s7 + $0x6c8] sm:$0xff]  ;;  %v6626_v50 = vcombine.high %v178_v43, %v182_v44  ;;  %v6625_v56 = vcombine.low %v178_v43, %v182_v44  ;;  %v255_v43 = vld [vmem:[%s10997_s7 + $0x530] sm:$0xff] }
  0x69   :  { %1799 = vmatpush1.bf16.msra.mxu1 %v6689_v53  ;;  %v310_v47 = vld [vmem:[%s10997_s7 + $0x6e8] sm:$0xff] }
  0x6a   :  { %1800 = vmatprep.subr.bf16.mxu1 %v6682_v60  ;;  %v170_v51 = vld [vmem:[%s10997_s7 + $0x288] sm:$0xff]  ;;  %v6754_v54 = vcombine.high %v306_v45, %v310_v47  ;;  %v6753_v57 = vcombine.low %v306_v45, %v310_v47  ;;  %v115_v45 = vld [vmem:[%s10997_s7 + $0xd0] sm:$0xff] }
  0x6b   :  { %1760 = vmatpush1.bf16.msra.mxu0 %v6553_v62  ;;  %v174_v52 = vld [vmem:[%s10997_s7 + $0x2a8] sm:$0xff] }
  0x6c   :  { %1761 = vmatprep.subr.bf16.mxu0 %v6546_v0  ;;  %v298_v53 = vld [vmem:[%s10997_s7 + $0x688] sm:$0xff]  ;;  %v6618_v60 = vcombine.high %v170_v51, %v174_v52  ;;  %v6617_v2 = vcombine.low %v170_v51, %v174_v52  ;;  %v247_v51 = vld [vmem:[%s10997_s7 + $0x4f0] sm:$0xff] }
  0x6d   :  { %1801 = vmatpush1.bf16.msra.mxu1 %v6681_v63  ;;  %v302_v55 = vld [vmem:[%s10997_s7 + $0x6a8] sm:$0xff] }
  0x6e   :  { %1802 = vmatprep.subr.bf16.mxu1 %v6674_v4  ;;  %v162_v61 = vld [vmem:[%s10997_s7 + $0x248] sm:$0xff]  ;;  %v6746_v0 = vcombine.high %v298_v53, %v302_v55  ;;  %v6745_v3 = vcombine.low %v298_v53, %v302_v55  ;;  %v107_v53 = vld [vmem:[%s10997_s7 + $0x90] sm:$0xff] }
  0x6f   :  { %1762 = vmatpush1.bf16.msra.mxu0 %v6545_v6  ;;  %v166_v62 = vld [vmem:[%s10997_s7 + $0x268] sm:$0xff] }
  0x70   :  { %1763 = vmatprep.subr.bf16.mxu0 %v6538_v8  ;;  %v290_v63 = vld [vmem:[%s10997_s7 + $0x648] sm:$0xff]  ;;  %v6610_v4 = vcombine.high %v162_v61, %v166_v62  ;;  %v6609_v10 = vcombine.low %v162_v61, %v166_v62  ;;  %v239_v61 = vld [vmem:[%s10997_s7 + $0x4b0] sm:$0xff] }
  0x71   :  { %1803 = vmatpush1.bf16.msra.mxu1 %v6673_v7  ;;  %v294_v1 = vld [vmem:[%s10997_s7 + $0x668] sm:$0xff] }
  0x72   :  { %1804 = vmatprep.subr.bf16.mxu1 %v6666_v12  ;;  %v154_v5 = vld [vmem:[%s10997_s7 + $0x208] sm:$0xff]  ;;  %v6738_v8 = vcombine.high %v290_v63, %v294_v1  ;;  %v6737_v11 = vcombine.low %v290_v63, %v294_v1  ;;  %v99_v63 = vld [vmem:[%s10997_s7 + $0x50] sm:$0xff] }
  0x73   :  { %1764 = vmatpush1.bf16.msra.mxu0 %v6537_v14  ;;  %v158_v6 = vld [vmem:[%s10997_s7 + $0x228] sm:$0xff]  ;;  %v151_v14 = vld [vmem:[%s10997_s7 + $0x1f0] sm:$0xff] }
  0x74   :  { %1765 = vmatprep.subr.bf16.mxu0 %v6658_v17  ;;  %v282_v7 = vld [vmem:[%s10997_s7 + $0x608] sm:$0xff]  ;;  %v6602_v12 = vcombine.high %v154_v5, %v158_v6  ;;  %v6601_v20 = vcombine.low %v154_v5, %v158_v6  ;;  %v6595_v28 = vcombine.low %v147_v13, %v151_v14  ;;  %v231_v5 = vld [vmem:[%s10997_s7 + $0x470] sm:$0xff] }
  0x75   :  { %1805 = vmatpush1.bf16.msra.mxu1 %v6665_v15  ;;  %v286_v9 = vld [vmem:[%s10997_s7 + $0x628] sm:$0xff]  ;;  %v275_v15 = vld [vmem:[%s10997_s7 + $0x5d0] sm:$0xff] }
  0x76   :  { %1806 = vmatprep.subr.bf16.mxu1 %v6786_v22  ;;  %v6730_v17 = vcombine.high %v282_v7, %v286_v9  ;;  %v6729_v21 = vcombine.low %v282_v7, %v286_v9  ;;  %v6596_v22 = vcombine.high %v147_v13, %v151_v14  ;;  %v91_v7 = vld [vmem:[%s10997_s7 + $0x10] sm:$0xff] }
  0x77   :  { %1766 = vmatpush2.bf16.msra.mxu0 %v6657_v24  ;;  %v143_v24 = vld [vmem:[%s10997_s7 + $0x1b0] sm:$0xff] }
  0x78   :  { %1767 = vmatprep.subr.bf16.mxu0 %v6650_v26  ;;  %v6724_v26 = vcombine.high %v275_v15, %v279_v18  ;;  %v6588_v31 = vcombine.high %v139_v23, %v143_v24  ;;  %v6587_v36 = vcombine.low %v139_v23, %v143_v24  ;;  %v223_v13 = vld [vmem:[%s10997_s7 + $0x430] sm:$0xff] }
  0x79   :  { %1807 = vmatpush2.bf16.msra.mxu1 %v6785_v25  ;;  %v267_v25 = vld [vmem:[%s10997_s7 + $0x590] sm:$0xff] }
  0x7a   :  { %1808 = vmatprep.subr.bf16.mxu1 %v6778_v30  ;;  %v6723_v30 = vcombine.low %v275_v15, %v279_v18  ;;  %v6715_v39 = vcombine.low %v267_v25, %v271_v27  ;;  %v343_v23 = vld [vmem:[%s10997_s7 + $0x7f0] sm:$0xff] }
  0x7b   :  { %1768 = vmatpush2.bf16.msra.mxu0 %v6649_v32  ;;  %v135_v32 = vld [vmem:[%s10997_s7 + $0x170] sm:$0xff] }
  0x7c   :  { %1769 = vmatprep.subr.bf16.mxu0 %v6642_v34  ;;  %v259_v34 = vld [vmem:[%s10997_s7 + $0x550] sm:$0xff]  ;;  %v6579_v44 = vcombine.low %v131_v29, %v135_v32 }
  0x7d   :  { %1809 = vmatpush2.bf16.msra.mxu1 %v6777_v33  ;;  %v6716_v33 = vcombine.high %v267_v25, %v271_v27  ;;  %v6707_v47 = vcombine.low %v259_v34, %v263_v35  ;;  %v203_v25 = vld [vmem:[%s10997_s7 + $0x390] sm:$0xff] }
  0x7e   :  { %1810 = vmatprep.subr.bf16.mxu1 %v6770_v38  ;;  %v127_v38 = vld [vmem:[%s10997_s7 + $0x130] sm:$0xff] }
  0x7f   :  { %1770 = vmatpush2.bf16.msra.mxu0 %v6641_v40  ;;  %v6580_v40 = vcombine.high %v131_v29, %v135_v32  ;;  %v6571_v52 = vcombine.low %v123_v37, %v127_v38  ;;  %v331_v29 = vld [vmem:[%s10997_s7 + $0x790] sm:$0xff] }
  0x80   :  { %1771 = vmatprep.subr.bf16.mxu0 %v6634_v42  ;;  %v251_v42 = vld [vmem:[%s10997_s7 + $0x510] sm:$0xff] }
  0x81   :  { %1811 = vmatpush2.bf16.msra.mxu1 %v6769_v41  ;;  %v6708_v41 = vcombine.high %v259_v34, %v263_v35  ;;  %v6699_v55 = vcombine.low %v251_v42, %v255_v43  ;;  %v199_v34 = vld [vmem:[%s10997_s7 + $0x370] sm:$0xff] }
  0x82   :  { %1812 = vmatprep.subr.bf16.mxu1 %v6762_v46  ;;  %v119_v46 = vld [vmem:[%s10997_s7 + $0xf0] sm:$0xff] }
  0x83   :  { %1772 = vmatpush2.bf16.msra.mxu0 %v6633_v48  ;;  %v6572_v48 = vcombine.high %v123_v37, %v127_v38  ;;  %v6563_v62 = vcombine.low %v115_v45, %v119_v46  ;;  %v323_v37 = vld [vmem:[%s10997_s7 + $0x750] sm:$0xff] }
  0x84   :  { %1773 = vmatprep.subr.bf16.mxu0 %v6626_v50  ;;  %v243_v50 = vld [vmem:[%s10997_s7 + $0x4d0] sm:$0xff] }
  0x85   :  { %1813 = vmatpush2.bf16.msra.mxu1 %v6761_v49  ;;  %v6700_v49 = vcombine.high %v251_v42, %v255_v43  ;;  %v6691_v1 = vcombine.low %v243_v50, %v247_v51  ;;  %v327_v38 = vld [vmem:[%s10997_s7 + $0x770] sm:$0xff] }
  0x86   :  { %1814 = vmatprep.subr.bf16.mxu1 %v6754_v54  ;;  %v111_v54 = vld [vmem:[%s10997_s7 + $0xb0] sm:$0xff] }
  0x87   :  { %1774 = vmatpush2.bf16.msra.mxu0 %v6625_v56  ;;  %v6564_v56 = vcombine.high %v115_v45, %v119_v46  ;;  %v6555_v6 = vcombine.low %v107_v53, %v111_v54  ;;  %v191_v42 = vld [vmem:[%s10997_s7 + $0x330] sm:$0xff] }
  0x88   :  { %1775 = vmatprep.subr.bf16.mxu0 %v6618_v60  ;;  %v235_v60 = vld [vmem:[%s10997_s7 + $0x490] sm:$0xff] }
  0x89   :  { %1815 = vmatpush2.bf16.msra.mxu1 %v6753_v57  ;;  %v6692_v57 = vcombine.high %v243_v50, %v247_v51  ;;  %v6683_v9 = vcombine.low %v235_v60, %v239_v61  ;;  %v315_v45 = vld [vmem:[%s10997_s7 + $0x710] sm:$0xff]  ;;  %v6771_v51 = vcombine.low %v323_v37, %v327_v38 }
  0x8a   :  { %1816 = vmatprep.subr.bf16.mxu1 %v6746_v0  ;;  %v103_v0 = vld [vmem:[%s10997_s7 + $0x70] sm:$0xff] }
  0x8b   :  { %1776 = vmatpush2.bf16.msra.mxu0 %v6617_v2  ;;  %v6556_v2 = vcombine.high %v107_v53, %v111_v54  ;;  %v6547_v14 = vcombine.low %v99_v63, %v103_v0  ;;  %v319_v46 = vld [vmem:[%s10997_s7 + $0x730] sm:$0xff] }
  0x8c   :  { %1777 = vmatprep.subr.bf16.mxu0 %v6610_v4  ;;  %v227_v4 = vld [vmem:[%s10997_s7 + $0x450] sm:$0xff] }
  0x8d   :  { %1817 = vmatpush2.bf16.msra.mxu1 %v6745_v3  ;;  %v6684_v3 = vcombine.high %v235_v60, %v239_v61  ;;  %v6675_v15 = vcombine.low %v227_v4, %v231_v5  ;;  %v183_v50 = vld [vmem:[%s10997_s7 + $0x2f0] sm:$0xff]  ;;  %v6763_v61 = vcombine.low %v315_v45, %v319_v46 }
  0x8e   :  { %1818 = vmatprep.subr.bf16.mxu1 %v6738_v8  ;;  %v95_v8 = vld [vmem:[%s10997_s7 + $0x30] sm:$0xff] }
  0x8f   :  { %1778 = vmatpush2.bf16.msra.mxu0 %v6609_v10  ;;  %v6548_v10 = vcombine.high %v99_v63, %v103_v0  ;;  %v6539_v24 = vcombine.low %v91_v7, %v95_v8  ;;  %v307_v53 = vld [vmem:[%s10997_s7 + $0x6d0] sm:$0xff] }
  0x90   :  { %1779 = vmatprep.subr.bf16.mxu0 %v6602_v12  ;;  %v219_v12 = vld [vmem:[%s10997_s7 + $0x410] sm:$0xff] }
  0x91   :  { %1819 = vmatpush2.bf16.msra.mxu1 %v6737_v11  ;;  %v6676_v11 = vcombine.high %v227_v4, %v231_v5  ;;  %v6668_v18 = vcombine.high %v219_v12, %v223_v13  ;;  %v6667_v27 = vcombine.low %v219_v12, %v223_v13  ;;  %v311_v54 = vld [vmem:[%s10997_s7 + $0x6f0] sm:$0xff] }
  0x92   :  { %1820 = vmatprep.subr.bf16.mxu1 %v6730_v17  ;;  %v6540_v17 = vcombine.high %v91_v7, %v95_v8  ;;  %v175_v60 = vld [vmem:[%s10997_s7 + $0x2b0] sm:$0xff]  ;;  %v6755_v5 = vcombine.low %v307_v53, %v311_v54 }
  0x93   :  { %1780 = vmatpush2.bf16.msra.mxu0 %v6601_v20  ;;  %v211_v20 = vld [vmem:[%s10997_s7 + $0x3d0] sm:$0xff] }
  0x94   :  { %1831 = vmatprep.subr.bf16.mxu0 %v6596_v22  ;;  %v339_v22 = vld [vmem:[%s10997_s7 + $0x7d0] sm:$0xff] }
  0x95   :  { %1821 = vmatpush2.bf16.msra.mxu1 %v6729_v21  ;;  %v215_v21 = vld [vmem:[%s10997_s7 + $0x3f0] sm:$0xff]  ;;  %v6787_v35 = vcombine.low %v339_v22, %v343_v23 }
  0x96   :  { %1872 = vmatprep.subr.bf16.mxu1 %v6724_v26  ;;  %1782 = vmatmul.mubr.bf16.vlgmr.msra.gmra.mxu0 %v8519_v16  ;;  %v207_v26 = vld [vmem:[%s10997_s7 + $0x3b0] sm:$0xff]  ;;  %v6659_v32 = vcombine.low %v211_v20, %v215_v21 }
  0x97   :  { %1832 = vmatpush1.bf16.msra.mxu0 %v6595_v28  ;;  %1863 = vmatprep.mubr.bf16.mxu0 %v8387_v58  ;;  %v6660_v28 = vcombine.high %v211_v20, %v215_v21  ;;  %v299_v63 = vld [vmem:[%s10997_s7 + $0x690] sm:$0xff]  ;;  %v148_v21 = vld [vmem:[%s10997_s7 + $0x1d8] sm:$0xff] }
  0x98   :  { %1823 = vmatmul.mubr.bf16.vlgmr.msra.gmra.mxu1 %v8527_v19  ;;  %1833 = vmatprep.subr.bf16.mxu0 %v6588_v31  ;;  %v6788_v31 = vcombine.high %v339_v22, %v343_v23  ;;  %v303_v0 = vld [vmem:[%s10997_s7 + $0x6b0] sm:$0xff]  ;;  %v152_v22 = vld [vmem:[%s10997_s7 + $0x1f8] sm:$0xff] }
  0x99   :  { %1873 = vmatpush1.bf16.msra.mxu1 %v6723_v30  ;;  %1904 = vmatprep.mubr.bf16.mxu1 %v8389_v59  ;;  %v335_v30 = vld [vmem:[%s10997_s7 + $0x7b0] sm:$0xff]  ;;  %v6747_v13 = vcombine.low %v299_v63, %v303_v0 }
  0x9a   :  { %1874 = vmatprep.subr.bf16.mxu1 %v6716_v33  ;;  %v195_v33 = vld [vmem:[%s10997_s7 + $0x350] sm:$0xff]  ;;  %v6779_v43 = vcombine.low %v331_v29, %v335_v30 }
  0x9b   :  { %1834 = vmatpush1.bf16.msra.mxu0 %v6587_v36  ;;  %v6652_v36 = vcombine.high %v203_v25, %v207_v26  ;;  %v167_v4 = vld [vmem:[%s10997_s7 + $0x270] sm:$0xff] }
  0x9c   :  { %1835 = vmatprep.subr.bf16.mxu0 %v6580_v40  ;;  %v6651_v40 = vcombine.low %v203_v25, %v207_v26  ;;  %v291_v7 = vld [vmem:[%s10997_s7 + $0x650] sm:$0xff]  ;;  %v276_v25 = vld [vmem:[%s10997_s7 + $0x5d8] sm:$0xff] }
  0x9d   :  { %1875 = vmatpush1.bf16.msra.mxu1 %v6715_v39  ;;  %v6780_v39 = vcombine.high %v331_v29, %v335_v30  ;;  %v295_v8 = vld [vmem:[%s10997_s7 + $0x670] sm:$0xff]  ;;  %v280_v26 = vld [vmem:[%s10997_s7 + $0x5f8] sm:$0xff] }
  0x9e   :  { %1876 = vmatprep.subr.bf16.mxu1 %v6708_v41  ;;  %v187_v41 = vld [vmem:[%s10997_s7 + $0x310] sm:$0xff]  ;;  %v6739_v23 = vcombine.low %v291_v7, %v295_v8  ;;  %v140_v29 = vld [vmem:[%s10997_s7 + $0x198] sm:$0xff] }
  0x9f   :  { %1836 = vmatpush1.bf16.msra.mxu0 %v6579_v44  ;;  %v6644_v44 = vcombine.high %v195_v33, %v199_v34  ;;  %v159_v12 = vld [vmem:[%s10997_s7 + $0x230] sm:$0xff]  ;;  %v144_v30 = vld [vmem:[%s10997_s7 + $0x1b8] sm:$0xff] }
  0xa0   :  { %1837 = vmatprep.subr.bf16.mxu0 %v6572_v48  ;;  %v6643_v48 = vcombine.low %v195_v33, %v199_v34  ;;  %v268_v33 = vld [vmem:[%s10997_s7 + $0x598] sm:$0xff] }
  0xa1   :  { %1877 = vmatpush1.bf16.msra.mxu1 %v6707_v47  ;;  %v6772_v47 = vcombine.high %v323_v37, %v327_v38  ;;  %v272_v34 = vld [vmem:[%s10997_s7 + $0x5b8] sm:$0xff] }
  0xa2   :  { %1878 = vmatprep.subr.bf16.mxu1 %v6700_v49  ;;  %v179_v49 = vld [vmem:[%s10997_s7 + $0x2d0] sm:$0xff]  ;;  %v132_v37 = vld [vmem:[%s10997_s7 + $0x158] sm:$0xff] }
  0xa3   :  { %1838 = vmatpush1.bf16.msra.mxu0 %v6571_v52  ;;  %v6636_v52 = vcombine.high %v187_v41, %v191_v42  ;;  %v136_v38 = vld [vmem:[%s10997_s7 + $0x178] sm:$0xff] }
  0xa4   :  { %1839 = vmatprep.subr.bf16.mxu0 %v6564_v56  ;;  %v6635_v56 = vcombine.low %v187_v41, %v191_v42  ;;  %v6718_v41 = vcombine.high %v268_v33, %v272_v34  ;;  %v260_v42 = vld [vmem:[%s10997_s7 + $0x558] sm:$0xff] }
  0xa5   :  { %1879 = vmatpush1.bf16.msra.mxu1 %v6699_v55  ;;  %v6764_v55 = vcombine.high %v315_v45, %v319_v46  ;;  %v124_v45 = vld [vmem:[%s10997_s7 + $0x118] sm:$0xff] }
  0xa6   :  { %1880 = vmatprep.subr.bf16.mxu1 %v6692_v57  ;;  %v171_v57 = vld [vmem:[%s10997_s7 + $0x290] sm:$0xff]  ;;  %v128_v46 = vld [vmem:[%s10997_s7 + $0x138] sm:$0xff] }
  0xa7   :  { %1840 = vmatpush1.bf16.msra.mxu0 %v6563_v62  ;;  %v6628_v62 = vcombine.high %v179_v49, %v183_v50 }
  0xa8   :  { %1841 = vmatprep.subr.bf16.mxu0 %v6556_v2  ;;  %v6627_v2 = vcombine.low %v179_v49, %v183_v50  ;;  %v252_v50 = vld [vmem:[%s10997_s7 + $0x518] sm:$0xff] }
  0xa9   :  { %1881 = vmatpush1.bf16.msra.mxu1 %v6691_v1  ;;  %v6756_v1 = vcombine.high %v307_v53, %v311_v54  ;;  %v116_v53 = vld [vmem:[%s10997_s7 + $0xd8] sm:$0xff] }
  0xaa   :  { %1882 = vmatprep.subr.bf16.mxu1 %v6684_v3  ;;  %v163_v3 = vld [vmem:[%s10997_s7 + $0x250] sm:$0xff]  ;;  %v120_v54 = vld [vmem:[%s10997_s7 + $0xf8] sm:$0xff] }
  0xab   :  { %1842 = vmatpush1.bf16.msra.mxu0 %v6555_v6  ;;  %v6620_v6 = vcombine.high %v171_v57, %v175_v60  ;;  %v6611_v20 = vcombine.low %v163_v3, %v167_v4 }
  0xac   :  { %1843 = vmatprep.subr.bf16.mxu0 %v6548_v10  ;;  %v6619_v10 = vcombine.low %v171_v57, %v175_v60  ;;  %v248_v57 = vld [vmem:[%s10997_s7 + $0x4f8] sm:$0xff]  ;;  %v6573_v60 = vcombine.low %v124_v45, %v128_v46 }
  0xad   :  { %1883 = vmatpush1.bf16.msra.mxu1 %v6683_v9  ;;  %v6748_v9 = vcombine.high %v299_v63, %v303_v0  ;;  %v6566_v0 = vcombine.high %v116_v53, %v120_v54 }
  0xae   :  { %1884 = vmatprep.subr.bf16.mxu1 %v6676_v11  ;;  %v155_v11 = vld [vmem:[%s10997_s7 + $0x210] sm:$0xff] }
  0xaf   :  { %1844 = vmatpush1.bf16.msra.mxu0 %v6547_v14  ;;  %v6612_v14 = vcombine.high %v163_v3, %v167_v4  ;;  %v240_v3 = vld [vmem:[%s10997_s7 + $0x4b8] sm:$0xff]  ;;  %v6565_v4 = vcombine.low %v116_v53, %v120_v54 }
  0xb0   :  { %1845 = vmatprep.subr.bf16.mxu0 %v6540_v17  ;;  %v287_v17 = vld [vmem:[%s10997_s7 + $0x630] sm:$0xff] }
  0xb1   :  { %1885 = vmatpush1.bf16.msra.mxu1 %v6675_v15  ;;  %v283_v15 = vld [vmem:[%s10997_s7 + $0x610] sm:$0xff] }
  0xb2   :  { %1886 = vmatprep.subr.bf16.mxu1 %v6668_v18  ;;  %v6740_v18 = vcombine.high %v291_v7, %v295_v8 }
  0xb3   :  { %1846 = vmatpush1.bf16.msra.mxu0 %v6539_v24  ;;  %v6604_v24 = vcombine.high %v155_v11, %v159_v12 }
  0xb4   :  { %1847 = vmatprep.subr.bf16.mxu0 %v6660_v28  ;;  %v6603_v28 = vcombine.low %v155_v11, %v159_v12  ;;  %v232_v11 = vld [vmem:[%s10997_s7 + $0x478] sm:$0xff] }
  0xb5   :  { %1887 = vmatpush1.bf16.msra.mxu1 %v6667_v27  ;;  %v6732_v27 = vcombine.high %v283_v15, %v287_v17 }
  0xb6   :  { %1888 = vmatprep.subr.bf16.mxu1 %v6788_v31  ;;  %v6731_v31 = vcombine.low %v283_v15, %v287_v17 }
  0xb7   :  { %1848 = vmatpush2.bf16.msra.mxu0 %v6659_v32  ;;  %v6598_v32 = vcombine.high %v148_v21, %v152_v22 }
  0xb8   :  { %1849 = vmatprep.subr.bf16.mxu0 %v6652_v36  ;;  %v6597_v36 = vcombine.low %v148_v21, %v152_v22  ;;  %v224_v21 = vld [vmem:[%s10997_s7 + $0x438] sm:$0xff] }
  0xb9   :  { %1889 = vmatpush2.bf16.msra.mxu1 %v6787_v35  ;;  %v6726_v35 = vcombine.high %v276_v25, %v280_v26 }
  0xba   :  { %1890 = vmatprep.subr.bf16.mxu1 %v6780_v39  ;;  %v6725_v39 = vcombine.low %v276_v25, %v280_v26 }
  0xbb   :  { %1850 = vmatpush2.bf16.msra.mxu0 %v6651_v40  ;;  %v6590_v40 = vcombine.high %v140_v29, %v144_v30 }
  0xbc   :  { %1851 = vmatprep.subr.bf16.mxu0 %v6644_v44  ;;  %v6589_v44 = vcombine.low %v140_v29, %v144_v30  ;;  %v344_v29 = vld [vmem:[%s10997_s7 + $0x7f8] sm:$0xff] }
  0xbd   :  { %1891 = vmatpush2.bf16.msra.mxu1 %v6779_v43  ;;  %v264_v43 = vld [vmem:[%s10997_s7 + $0x578] sm:$0xff] }
  0xbe   :  { %1892 = vmatprep.subr.bf16.mxu1 %v6772_v47  ;;  %v6717_v47 = vcombine.low %v268_v33, %v272_v34  ;;  %v6710_v49 = vcombine.high %v260_v42, %v264_v43  ;;  %v204_v34 = vld [vmem:[%s10997_s7 + $0x398] sm:$0xff] }
  0xbf   :  { %1852 = vmatpush2.bf16.msra.mxu0 %v6643_v48  ;;  %v6582_v48 = vcombine.high %v132_v37, %v136_v38 }
  0xc0   :  { %1853 = vmatprep.subr.bf16.mxu0 %v6636_v52  ;;  %v6581_v52 = vcombine.low %v132_v37, %v136_v38  ;;  %v336_v37 = vld [vmem:[%s10997_s7 + $0x7b8] sm:$0xff] }
  0xc1   :  { %1893 = vmatpush2.bf16.msra.mxu1 %v6771_v51  ;;  %v256_v51 = vld [vmem:[%s10997_s7 + $0x538] sm:$0xff] }
  0xc2   :  { %1894 = vmatprep.subr.bf16.mxu1 %v6764_v55  ;;  %v6709_v55 = vcombine.low %v260_v42, %v264_v43  ;;  %v6701_v63 = vcombine.low %v252_v50, %v256_v51  ;;  %v324_v43 = vld [vmem:[%s10997_s7 + $0x758] sm:$0xff] }
  0xc3   :  { %1854 = vmatpush2.bf16.msra.mxu0 %v6635_v56  ;;  %v6702_v56 = vcombine.high %v252_v50, %v256_v51  ;;  %v316_v51 = vld [vmem:[%s10997_s7 + $0x718] sm:$0xff] }
  0xc4   :  { %1855 = vmatprep.subr.bf16.mxu0 %v6628_v62  ;;  %v112_v62 = vld [vmem:[%s10997_s7 + $0xb8] sm:$0xff] }
  0xc5   :  { %1895 = vmatpush2.bf16.msra.mxu1 %v6763_v61  ;;  %v108_v61 = vld [vmem:[%s10997_s7 + $0x98] sm:$0xff] }
  0xc6   :  { %1896 = vmatprep.subr.bf16.mxu1 %v6756_v1  ;;  %v6558_v8 = vcombine.high %v108_v61, %v112_v62  ;;  %v6557_v12 = vcombine.low %v108_v61, %v112_v62 }
  0xc7   :  { %1856 = vmatpush2.bf16.msra.mxu0 %v6627_v2  ;;  %v236_v2 = vld [vmem:[%s10997_s7 + $0x498] sm:$0xff] }
  0xc8   :  { %1857 = vmatprep.subr.bf16.mxu0 %v6620_v6  ;;  %v104_v6 = vld [vmem:[%s10997_s7 + $0x78] sm:$0xff]  ;;  %v6685_v15 = vcombine.low %v236_v2, %v240_v3 }
  0xc9   :  { %1897 = vmatpush2.bf16.msra.mxu1 %v6755_v5  ;;  %v100_v5 = vld [vmem:[%s10997_s7 + $0x58] sm:$0xff] }
  0xca   :  { %1898 = vmatprep.subr.bf16.mxu1 %v6748_v9  ;;  %v6686_v9 = vcombine.high %v236_v2, %v240_v3  ;;  %v6550_v17 = vcombine.high %v100_v5, %v104_v6  ;;  %v6549_v22 = vcombine.low %v100_v5, %v104_v6  ;;  %v300_v3 = vld [vmem:[%s10997_s7 + $0x698] sm:$0xff] }
  0xcb   :  { %1858 = vmatpush2.bf16.msra.mxu0 %v6619_v10  ;;  %v228_v10 = vld [vmem:[%s10997_s7 + $0x458] sm:$0xff] }
  0xcc   :  { %1859 = vmatprep.subr.bf16.mxu0 %v6612_v14  ;;  %v96_v14 = vld [vmem:[%s10997_s7 + $0x38] sm:$0xff] }
  0xcd   :  { %1899 = vmatpush2.bf16.msra.mxu1 %v6747_v13  ;;  %v92_v13 = vld [vmem:[%s10997_s7 + $0x18] sm:$0xff] }
  0xce   :  { %1900 = vmatprep.subr.bf16.mxu1 %v6740_v18  ;;  %v6678_v18 = vcombine.high %v228_v10, %v232_v11  ;;  %v6542_v25 = vcombine.high %v92_v13, %v96_v14  ;;  %v6541_v30 = vcombine.low %v92_v13, %v96_v14 }
  0xcf   :  { %1860 = vmatpush2.bf16.msra.mxu0 %v6611_v20  ;;  %v220_v20 = vld [vmem:[%s10997_s7 + $0x418] sm:$0xff] }
  0xd0   :  { %1861 = vmatprep.subr.bf16.mxu0 %v6604_v24  ;;  %v6677_v24 = vcombine.low %v228_v10, %v232_v11  ;;  %v6670_v26 = vcombine.high %v220_v20, %v224_v21  ;;  %v292_v11 = vld [vmem:[%s10997_s7 + $0x658] sm:$0xff] }
  0xd1   :  { %1901 = vmatpush2.bf16.msra.mxu1 %v6739_v23  ;;  %v212_v23 = vld [vmem:[%s10997_s7 + $0x3d8] sm:$0xff] }
  0xd2   :  { %1902 = vmatprep.subr.bf16.mxu1 %v6732_v27  ;;  %v216_v27 = vld [vmem:[%s10997_s7 + $0x3f8] sm:$0xff] }
  0xd3   :  { %1862 = vmatpush2.bf16.msra.mxu0 %v6603_v28  ;;  %v340_v28 = vld [vmem:[%s10997_s7 + $0x7d8] sm:$0xff]  ;;  %v6661_v38 = vcombine.low %v212_v23, %v216_v27 }
  0xd4   :  { %1913 = vmatprep.subr.bf16.mxu0 %v6598_v32  ;;  %v6662_v32 = vcombine.high %v212_v23, %v216_v27  ;;  %v6790_v33 = vcombine.high %v340_v28, %v344_v29 }
  0xd5   :  { %1903 = vmatpush2.bf16.msra.mxu1 %v6731_v31  ;;  %v6669_v31 = vcombine.low %v220_v20, %v224_v21  ;;  %v284_v21 = vld [vmem:[%s10997_s7 + $0x618] sm:$0xff] }
  0xd6   :  { %1954 = vmatprep.subr.bf16.mxu1 %v6726_v35  ;;  %1864 = vmatmul.mubr.bf16.vlgmr.msra.gmra.mxu0 %v8519_v16  ;;  %v208_v35 = vld [vmem:[%s10997_s7 + $0x3b8] sm:$0xff] }
  0xd7   :  { %1914 = vmatpush1.bf16.msra.mxu0 %v6597_v36  ;;  %1945 = vmatprep.mubr.bf16.mxu0 %v8387_v58  ;;  %v6574_v58 = vcombine.high %v124_v45, %v128_v46  ;;  %v332_v36 = vld [vmem:[%s10997_s7 + $0x798] sm:$0xff]  ;;  %v6654_v42 = vcombine.high %v204_v34, %v208_v35  ;;  %v6653_v46 = vcombine.low %v204_v34, %v208_v35  ;;  %v9104_v34 = vld [vmem:[%s11000_s8] sm:$0xff] }
  0xd8   :  { %1905 = vmatmul.mubr.bf16.vlgmr.msra.gmra.mxu1 %v8527_v19  ;;  %1915 = vmatprep.subr.bf16.mxu0 %v6590_v40  ;;  %v200_v40 = vld [vmem:[%s10997_s7 + $0x378] sm:$0xff]  ;;  %v6782_v45 = vcombine.high %v332_v36, %v336_v37 }
  0xd9   :  { %1955 = vmatpush1.bf16.msra.mxu1 %v6725_v39  ;;  %1986 = vmatprep.mubr.bf16.mxu1 %v8389_v59  ;;  %v244_v59 = vld [vmem:[%s10997_s7 + $0x4d8] sm:$0xff] }
  0xda   :  { %1956 = vmatprep.subr.bf16.mxu1 %v6718_v41  ;;  %v6694_v1 = vcombine.high %v244_v59, %v248_v57  ;;  %v6693_v7 = vcombine.low %v244_v59, %v248_v57  ;;  %v196_v39 = vld [vmem:[%s10997_s7 + $0x358] sm:$0xff]  ;;  %v6789_v41 = vcombine.low %v340_v28, %v344_v29 }
  0xdb   :  { %1916 = vmatpush1.bf16.msra.mxu0 %v6589_v44  ;;  %v328_v44 = vld [vmem:[%s10997_s7 + $0x778] sm:$0xff]  ;;  %v6646_v50 = vcombine.high %v196_v39, %v200_v40  ;;  %v6645_v54 = vcombine.low %v196_v39, %v200_v40  ;;  %v7416_v40 = vld [vmem:[%s10999_s6 + $0x60] ss:$8 sps:$4 sm:$0xff]  }
  0xdc   :  { %1917 = vmatprep.subr.bf16.mxu0 %v6582_v48  ;;  %v192_v48 = vld [vmem:[%s10997_s7 + $0x338] sm:$0xff]  ;;  %v6774_v53 = vcombine.high %v324_v43, %v328_v44 }
  0xdd   :  { %1957 = vmatpush1.bf16.msra.mxu1 %v6717_v47  ;;  %v188_v47 = vld [vmem:[%s10997_s7 + $0x318] sm:$0xff] }
  0xde   :  { %1958 = vmatprep.subr.bf16.mxu1 %v6710_v49  ;;  %v6781_v49 = vcombine.low %v332_v36, %v336_v37  ;;  %v6638_v59 = vcombine.high %v188_v47, %v192_v48  ;;  %v308_v57 = vld [vmem:[%s10997_s7 + $0x6d8] sm:$0xff]  ;;  %v6637_v62 = vcombine.low %v188_v47, %v192_v48  ;;  %v7418_v37 = vld [vmem:[%s10999_s6 + $0x64] ss:$8 sps:$4 sm:$0xff]  }
  0xdf   :  { %1918 = vmatpush1.bf16.msra.mxu0 %v6581_v52  ;;  %v320_v52 = vld [vmem:[%s10997_s7 + $0x738] sm:$0xff] }
  0xe0   :  { %1919 = vmatprep.subr.bf16.mxu0 %v6574_v58  ;;  %v184_v58 = vld [vmem:[%s10997_s7 + $0x2f8] sm:$0xff]  ;;  %v6766_v61 = vcombine.high %v316_v51, %v320_v52 }
  0xe1   :  { %1959 = vmatpush1.bf16.msra.mxu1 %v6709_v55  ;;  %v180_v55 = vld [vmem:[%s10997_s7 + $0x2d8] sm:$0xff] }
  0xe2   :  { %1960 = vmatprep.subr.bf16.mxu1 %v6702_v56  ;;  %v6773_v56 = vcombine.low %v324_v43, %v328_v44  ;;  %v6630_v2 = vcombine.high %v180_v55, %v184_v58  ;;  %v6629_v6 = vcombine.low %v180_v55, %v184_v58  ;;  %v7413_v35 = vld [vmem:[%s10999_s6 + $0x70] ss:$8 sps:$4 sm:$0xff]   ;;  %v7421_v43 = vld [vmem:[%s10999_s6 + $0x54] ss:$8 sps:$4 sm:$0xff]   ;;  %v7440_v44 = vld [vmem:[%s10999_s6 + $0x160] ss:$8 sps:$4 sm:$0xff]  }
  0xe3   :  { %1920 = vmatpush1.bf16.msra.mxu0 %v6573_v60  ;;  %v312_v60 = vld [vmem:[%s10997_s7 + $0x6f8] sm:$0xff] }
  0xe4   :  { %1921 = vmatprep.subr.bf16.mxu0 %v6566_v0  ;;  %v176_v0 = vld [vmem:[%s10997_s7 + $0x2b8] sm:$0xff]  ;;  %v6758_v5 = vcombine.high %v308_v57, %v312_v60 }
  0xe5   :  { %1961 = vmatpush1.bf16.msra.mxu1 %v6701_v63  ;;  %v172_v63 = vld [vmem:[%s10997_s7 + $0x298] sm:$0xff] }
  0xe6   :  { %1962 = vmatprep.subr.bf16.mxu1 %v6694_v1  ;;  %v6765_v1 = vcombine.low %v316_v51, %v320_v52  ;;  %v6622_v10 = vcombine.high %v172_v63, %v176_v0  ;;  %v6621_v14 = vcombine.low %v172_v63, %v176_v0 }
  0xe7   :  { %1922 = vmatpush1.bf16.msra.mxu0 %v6565_v4  ;;  %v304_v4 = vld [vmem:[%s10997_s7 + $0x6b8] sm:$0xff] }
  0xe8   :  { %1923 = vmatprep.subr.bf16.mxu0 %v6558_v8  ;;  %v168_v8 = vld [vmem:[%s10997_s7 + $0x278] sm:$0xff]  ;;  %v6750_v13 = vcombine.high %v300_v3, %v304_v4 }
  0xe9   :  { %1963 = vmatpush1.bf16.msra.mxu1 %v6693_v7  ;;  %v164_v7 = vld [vmem:[%s10997_s7 + $0x258] sm:$0xff] }
  0xea   :  { %1964 = vmatprep.subr.bf16.mxu1 %v6686_v9  ;;  %v6757_v9 = vcombine.low %v308_v57, %v312_v60  ;;  %v6614_v20 = vcombine.high %v164_v7, %v168_v8 }
  0xeb   :  { %1924 = vmatpush1.bf16.msra.mxu0 %v6557_v12  ;;  %v296_v12 = vld [vmem:[%s10997_s7 + $0x678] sm:$0xff] }
  0xec   :  { %1925 = vmatprep.subr.bf16.mxu0 %v6550_v17  ;;  %v160_v17 = vld [vmem:[%s10997_s7 + $0x238] sm:$0xff]  ;;  %v6742_v23 = vcombine.high %v292_v11, %v296_v12 }
  0xed   :  { %1965 = vmatpush1.bf16.msra.mxu1 %v6685_v15  ;;  %v156_v15 = vld [vmem:[%s10997_s7 + $0x218] sm:$0xff] }
  0xee   :  { %1966 = vmatprep.subr.bf16.mxu1 %v6678_v18  ;;  %v6749_v18 = vcombine.low %v300_v3, %v304_v4  ;;  %v6606_v27 = vcombine.high %v156_v15, %v160_v17 }
  0xef   :  { %1926 = vmatpush1.bf16.msra.mxu0 %v6549_v22  ;;  %v288_v22 = vld [vmem:[%s10997_s7 + $0x638] sm:$0xff] }
  0xf0   :  { %1927 = vmatprep.subr.bf16.mxu0 %v6542_v25  ;;  %v6613_v25 = vcombine.low %v164_v7, %v168_v8  ;;  %v6734_v28 = vcombine.high %v284_v21, %v288_v22 }
  0xf1   :  { %1967 = vmatpush1.bf16.msra.mxu1 %v6677_v24  ;;  %v347_v24 = vlaneseq }
  0xf2   :  { %1968 = vmatprep.subr.bf16.mxu1 %v6670_v26  ;;  %v6741_v26 = vcombine.low %v292_v11, %v296_v12 }
  0xf3   :  { %1928 = vmatpush1.bf16.msra.mxu0 %v6541_v30  ;;  %v9093_v29 = vshrl.u32 %v347_v24, 7  ;;  %v7415_v30 = vld [vmem:[%s10999_s6 + $0x74] ss:$8 sps:$4 sm:$0xff]  }
  0xf4   :  { %1929 = vmatprep.subr.bf16.mxu0 %v6662_v32  ;;  %v7436_v32 = vld [vmem:[%s10999_s6 + $0x174] ss:$8 sps:$4 sm:$0xff]  }
  0xf5   :  { %1969 = vmatpush1.bf16.msra.mxu1 %v6669_v31  ;;  %v6605_v31 = vcombine.low %v156_v15, %v160_v17  ;;  %v9110_v36 = vsub.s32 1, %v9093_v29 }
  0xf6   :  { %1970 = vmatprep.subr.bf16.mxu1 %v6790_v33  ;;  %v6733_v33 = vcombine.low %v284_v21, %v288_v22 }
  0xf7   :  { %1930 = vmatpush2.bf16.msra.mxu0 %v6661_v38  ;;  %v7434_v38 = vld [vmem:[%s10999_s6 + $0x170] ss:$8 sps:$4 sm:$0xff]   ;;  %v354_v39 = vrot.slane %v9104_v34, %v9110_v36 }
  0xf8   :  { %1931 = vmatprep.subr.bf16.mxu0 %v6654_v42 }
  0xf9   :  { %1971 = vmatpush2.bf16.msra.mxu1 %v6789_v41  ;;  %v7442_v41 = vld [vmem:[%s10999_s6 + $0x164] ss:$8 sps:$4 sm:$0xff]  }
  0xfa   :  { %1972 = vmatprep.subr.bf16.mxu1 %v6782_v45 }
  0xfb   :  { %1932 = vmatpush2.bf16.msra.mxu0 %v6653_v46 }
  0xfc   :  { %1933 = vmatprep.subr.bf16.mxu0 %v6646_v50 }
  0xfd   :  { %1973 = vmatpush2.bf16.msra.mxu1 %v6781_v49 }
  0xfe   :  { %1974 = vmatprep.subr.bf16.mxu1 %v6774_v53 }
  0xff   :  { %1934 = vmatpush2.bf16.msra.mxu0 %v6645_v54 }
 0x100   :  { %1935 = vmatprep.subr.bf16.mxu0 %v6638_v59 }
 0x101   :  { %1975 = vmatpush2.bf16.msra.mxu1 %v6773_v56 }
 0x102   :  { %1976 = vmatprep.subr.bf16.mxu1 %v6766_v61 }
 0x103   :  { %1936 = vmatpush2.bf16.msra.mxu0 %v6637_v62 }
 0x104   :  { %1937 = vmatprep.subr.bf16.mxu0 %v6630_v2 }
 0x105   :  { %1977 = vmatpush2.bf16.msra.mxu1 %v6765_v1 }
 0x106   :  { %1978 = vmatprep.subr.bf16.mxu1 %v6758_v5 }
 0x107   :  { %1938 = vmatpush2.bf16.msra.mxu0 %v6629_v6 }
 0x108   :  { %1939 = vmatprep.subr.bf16.mxu0 %v6622_v10 }
 0x109   :  { %1979 = vmatpush2.bf16.msra.mxu1 %v6757_v9 }
 0x10a   :  { %1980 = vmatprep.subr.bf16.mxu1 %v6750_v13 }
 0x10b   :  { %1940 = vmatpush2.bf16.msra.mxu0 %v6621_v14 }
 0x10c   :  { %1941 = vmatprep.subr.bf16.mxu0 %v6614_v20 }
 0x10d   :  { %1981 = vmatpush2.bf16.msra.mxu1 %v6749_v18 }
 0x10e   :  { %1982 = vmatprep.subr.bf16.mxu1 %v6742_v23 }
 0x10f   :  { %1942 = vmatpush2.bf16.msra.mxu0 %v6613_v25 }
 0x110   :  { %1943 = vmatprep.subr.bf16.mxu0 %v6606_v27 }
 0x111   :  { %1983 = vmatpush2.bf16.msra.mxu1 %v6741_v26 }
 0x112   :  { %1984 = vmatprep.subr.bf16.mxu1 %v6734_v28 }
 0x113   :  { %1944 = vmatpush2.bf16.msra.mxu0 %v6605_v31 }
 0x114   :  { %2791 = vmatprep.subr.bf16.mxu0 %v7415_v30 }
 0x115   :  { %1985 = vmatpush2.bf16.msra.mxu1 %v6733_v33 }
 0x116   :  { %2832 = vmatprep.subr.bf16.mxu1 %v7436_v32  ;;  %v9126_v42 = vpop.f32.mrf.mxu0  ;;  %1946 = vmatmul.mubr.bf16.vlgmr.msra.gmra.mxu0 %v8519_v16 }
 0x117   :  { %2792 = vmatpush1.bf16.msra.mxu0 %v7413_v35 }
 0x118   :  { %v9135_v45 = vpop.f32.mrf.mxu1  ;;  %1987 = vmatmul.mubr.bf16.vlgmr.msra.gmra.mxu1 %v8527_v19  ;;  %v1703_v46 = vpop.f32.mrf.mxu0  ;;  %2793 = vmatprep.subr.bf16.mxu0 %v7418_v37 }
 0x119   :  { %2833 = vmatpush1.bf16.msra.mxu1 %v7434_v38 }
 0x11a   :  { %33 = vsyncpa [#allocation5], 0  ;;  %v1704_v47 = vadd.f32 %v1703_v46, %v354_v39  ;;  %v1744_v48 = vpop.f32.mrf.mxu1  ;;  %2834 = vmatprep.subr.bf16.mxu1 %v7442_v41  ;;  %v7448_v16 = vld [vmem:[%s10999_s6 + $0x154] ss:$8 sps:$4 sm:$0xff]   ;;  %v1705_v49 = vpop.f32.mrf.mxu0  ;;  %v7419_v19 = vld [vmem:[%s10999_s6 + $0x50] ss:$8 sps:$4 sm:$0xff]  }
 0x11b   :  { %2794 = vmatpush1.bf16.msra.mxu0 %v7416_v40  ;;  %v7424_v53 = vld [vmem:[%s10999_s6 + $0x44] ss:$8 sps:$4 sm:$0xff]   ;;  %v7446_v54 = vld [vmem:[%s10999_s6 + $0x150] ss:$8 sps:$4 sm:$0xff]   ;;  %v7422_v56 = vld [vmem:[%s10999_s6 + $0x40] ss:$8 sps:$4 sm:$0xff]  }
 0x11c   :  { %v1745_v50 = vadd.f32 %v1744_v48, %v1704_v47  ;;  %v1746_v51 = vpop.f32.mrf.mxu1  ;;  %v1706_v52 = vpop.f32.mrf.mxu0  ;;  %2795 = vmatprep.subr.bf16.mxu0 %v7421_v43  ;;  %v7454_v58 = vld [vmem:[%s10999_s6 + $0x144] ss:$8 sps:$4 sm:$0xff]   ;;  %v7427_v59 = vld [vmem:[%s10999_s6 + $0x34] ss:$8 sps:$4 sm:$0xff]   ;;  %v7452_v57 = vld [vmem:[%s10999_s6 + $0x140] ss:$8 sps:$4 sm:$0xff]  }
 0x11d   :  { %2835 = vmatpush1.bf16.msra.mxu1 %v7440_v44  ;;  %v7460_v60 = vld [vmem:[%s10999_s6 + $0x134] ss:$8 sps:$4 sm:$0xff]   ;;  %v7425_v61 = vld [vmem:[%s10999_s6 + $0x30] ss:$8 sps:$4 sm:$0xff]   ;;  %v7430_v62 = vld [vmem:[%s10999_s6 + $0x24] ss:$8 sps:$4 sm:$0xff]  }
 0x11e   :  { %8024 = vtanh.f32 %v1745_v50  ;;  %v1747_v55 = vpop.f32.mrf.mxu1  ;;  %2836 = vmatprep.subr.bf16.mxu1 %v7448_v16  ;;  %v7458_v63 = vld [vmem:[%s10999_s6 + $0x130] ss:$8 sps:$4 sm:$0xff]   ;;  %v7466_v0 = vld [vmem:[%s10999_s6 + $0x124] ss:$8 sps:$4 sm:$0xff]   ;;  %v7428_v1 = vld [vmem:[%s10999_s6 + $0x20] ss:$8 sps:$4 sm:$0xff]  }
 0x11f   :  { %2796 = vmatpush1.bf16.msra.mxu0 %v7419_v19  ;;  %v7433_v2 = vld [vmem:[%s10999_s6 + $0x14] ss:$8 sps:$4 sm:$0xff]   ;;  %v7464_v3 = vld [vmem:[%s10999_s6 + $0x120] ss:$8 sps:$4 sm:$0xff]   ;;  %v7431_v7 = vld [vmem:[%s10999_s6 + $0x10] ss:$8 sps:$4 sm:$0xff]  }
 0x120   :  { %2797 = vmatprep.subr.bf16.mxu0 %v7424_v53  ;;  %v7472_v4 = vld [vmem:[%s10999_s6 + $0x114] ss:$8 sps:$4 sm:$0xff]   ;;  %v7439_v8 = vld [vmem:[%s10999_s6 + $0x4] ss:$8 sps:$4 sm:$0xff]   ;;  %v7470_v9 = vld [vmem:[%s10999_s6 + $0x110] ss:$8 sps:$4 sm:$0xff]  }
 0x121   :  { %2837 = vmatpush1.bf16.msra.mxu1 %v7446_v54  ;;  %v7478_v10 = vld [vmem:[%s10999_s6 + $0x104] ss:$8 sps:$4 sm:$0xff]   ;;  %v7437_v11 = vld [vmem:[%s10999_s6] ss:$8 sps:$4 sm:$0xff]   ;;  %v7445_v12 = vld [vmem:[%s10999_s6 + $0xf4] ss:$8 sps:$4 sm:$0xff]  }
 0x122   :  { %2838 = vmatprep.subr.bf16.mxu1 %v7454_v58  ;;  %v7476_v13 = vld [vmem:[%s10999_s6 + $0x100] ss:$8 sps:$4 sm:$0xff]   ;;  %v7484_v14 = vld [vmem:[%s10999_s6 + $0x1f4] ss:$8 sps:$4 sm:$0xff]   ;;  %v7443_v15 = vld [vmem:[%s10999_s6 + $0xf0] ss:$8 sps:$4 sm:$0xff]  }
 0x123   :  { %2798 = vmatpush1.bf16.msra.mxu0 %v7422_v56  ;;  %v9217_v17 = vsub.s32 0, %v9093_v29  ;;  %v7451_v18 = vld [vmem:[%s10999_s6 + $0xe4] ss:$8 sps:$4 sm:$0xff]   ;;  %v7482_v20 = vld [vmem:[%s10999_s6 + $0x1f0] ss:$8 sps:$4 sm:$0xff]   ;;  %v9308_v19 = vsub.s32 2, %v9093_v29 }
 0x124   :  { %2799 = vmatprep.subr.bf16.mxu0 %v7427_v59  ;;  %v7490_v21 = vld [vmem:[%s10999_s6 + $0x1e4] ss:$8 sps:$4 sm:$0xff]   ;;  %v7449_v22 = vld [vmem:[%s10999_s6 + $0xe0] ss:$8 sps:$4 sm:$0xff]   ;;  %v7457_v24 = vld [vmem:[%s10999_s6 + $0xd4] ss:$8 sps:$4 sm:$0xff]  }
 0x125   :  { %2839 = vmatpush1.bf16.msra.mxu1 %v7452_v57  ;;  %v350_v23 = vrot.slane %v9104_v34, %v9217_v17  ;;  %v7488_v25 = vld [vmem:[%s10999_s6 + $0x1e0] ss:$8 sps:$4 sm:$0xff]   ;;  %v7493_v26 = vld [vmem:[%s10999_s6 + $0x1d4] ss:$8 sps:$4 sm:$0xff]   ;;  %v7455_v27 = vld [vmem:[%s10999_s6 + $0xd0] ss:$8 sps:$4 sm:$0xff]   ;;  %v358_v56 = vrot.slane %v9104_v34, %v9308_v19 }
 0x126   :  { %2840 = vmatprep.subr.bf16.mxu1 %v7460_v60  ;;  %v7463_v30 = vld [vmem:[%s10999_s6 + $0xc4] ss:$8 sps:$4 sm:$0xff]   ;;  %v7491_v31 = vld [vmem:[%s10999_s6 + $0x1d0] ss:$8 sps:$4 sm:$0xff]   ;;  %v7461_v33 = vld [vmem:[%s10999_s6 + $0xc0] ss:$8 sps:$4 sm:$0xff]  }
 0x127   :  { %2800 = vmatpush1.bf16.msra.mxu0 %v7425_v61  ;;  %v1702_v28 = vadd.f32 %v9126_v42, %v350_v23  ;;  %v7496_v32 = vld [vmem:[%s10999_s6 + $0x1c4] ss:$8 sps:$4 sm:$0xff]   ;;  %v7469_v37 = vld [vmem:[%s10999_s6 + $0xb4] ss:$8 sps:$4 sm:$0xff]   ;;  %v7494_v38 = vld [vmem:[%s10999_s6 + $0x1c0] ss:$8 sps:$4 sm:$0xff]  }
 0x128   :  { %2801 = vmatprep.subr.bf16.mxu0 %v7430_v62  ;;  %v7499_v39 = vld [vmem:[%s10999_s6 + $0x1b4] ss:$8 sps:$4 sm:$0xff]   ;;  %v7467_v40 = vld [vmem:[%s10999_s6 + $0xb0] ss:$8 sps:$4 sm:$0xff]   ;;  %v7475_v41 = vld [vmem:[%s10999_s6 + $0xa4] ss:$8 sps:$4 sm:$0xff]  }
 0x129   :  { %2841 = vmatpush1.bf16.msra.mxu1 %v7458_v63  ;;  %v1743_v35 = vadd.f32 %v9135_v45, %v1702_v28  ;;  %v7497_v42 = vld [vmem:[%s10999_s6 + $0x1b0] ss:$8 sps:$4 sm:$0xff]   ;;  %v7502_v43 = vld [vmem:[%s10999_s6 + $0x1a4] ss:$8 sps:$4 sm:$0xff]   ;;  %v7473_v44 = vld [vmem:[%s10999_s6 + $0xa0] ss:$8 sps:$4 sm:$0xff]  }
 0x12a   :  { %2842 = vmatprep.subr.bf16.mxu1 %v7466_v0  ;;  %v7481_v45 = vld [vmem:[%s10999_s6 + $0x94] ss:$8 sps:$4 sm:$0xff]   ;;  %v7500_v46 = vld [vmem:[%s10999_s6 + $0x1a0] ss:$8 sps:$4 sm:$0xff]   ;;  %v7479_v48 = vld [vmem:[%s10999_s6 + $0x90] ss:$8 sps:$4 sm:$0xff]  }
 0x12b   :  { %v8025_v5 = vpop.eup %8024  ;;  %2802 = vmatpush1.bf16.msra.mxu0 %v7428_v1  ;;  %8026 = vtanh.f32 %v1743_v35  ;;  %v7505_v47 = vld [vmem:[%s10999_s6 + $0x194] ss:$8 sps:$4 sm:$0xff]   ;;  %v7487_v16 = vld [vmem:[%s10999_s6 + $0x84] ss:$8 sps:$4 sm:$0xff]   ;;  %v7503_v49 = vld [vmem:[%s10999_s6 + $0x190] ss:$8 sps:$4 sm:$0xff]  }
 0x12c   :  { %v2004_v6 = vpack.c.bf16 %v8025_v5, %v8025_v5  ;;  %2803 = vmatprep.subr.bf16.mxu0 %v7433_v2  ;;  %v7508_v50 = vld [vmem:[%s10999_s6 + $0x184] ss:$8 sps:$4 sm:$0xff]   ;;  %v7485_v51 = vld [vmem:[%s10999_s6 + $0x80] ss:$8 sps:$4 sm:$0xff]   ;;  %v7511_v53 = vld [vmem:[%s10999_s6 + $0x274] ss:$8 sps:$4 sm:$0xff]  }
 0x12d   :  { %2843 = vmatpush1.bf16.msra.mxu1 %v7464_v3  ;;  %v7506_v52 = vld [vmem:[%s10999_s6 + $0x180] ss:$8 sps:$4 sm:$0xff]   ;;  %v9317_v55 = vsub.s32 3, %v9093_v29  ;;  %v7559_v58 = vld [vmem:[%s10999_s6 + $0x374] ss:$8 sps:$4 sm:$0xff]   ;;  %s11001_s5 = sld [smem:[#allocation14_spill]] }
 0x12e   :  { %2823 = vmatprep.mubr.bf16.mxu0 %v2004_v6  ;;  %2844 = vmatprep.subr.bf16.mxu1 %v7472_v4  ;;  %v7509_v59 = vld [vmem:[%s10999_s6 + $0x270] ss:$8 sps:$4 sm:$0xff]   ;;  %v7514_v60 = vld [vmem:[%s10999_s6 + $0x264] ss:$8 sps:$4 sm:$0xff]   ;;  %v7512_v1 = vld [vmem:[%s10999_s6 + $0x260] ss:$8 sps:$4 sm:$0xff]  }
 0x12f   :  { %2804 = vmatpush1.bf16.msra.mxu0 %v7431_v7  ;;  %v362_v61 = vrot.slane %v9104_v34, %v9317_v55  ;;  %v7517_v3 = vld [vmem:[%s10999_s6 + $0x254] ss:$8 sps:$4 sm:$0xff]   ;;  %s11002_s2 = sld [smem:[#allocation13_spill]]  ;;  %vm8151_vm0 = vmmov 0   ;;  %vm3175_vm1 = vcmask 523264   ;;  %vm3235_vm2 = vcmask 130048  }
 0x130   :  { %2805 = vmatprep.subr.bf16.mxu0 %v7439_v8  ;;  %v7535_v35 = vld [vmem:[%s10999_s6 + $0x2f4] ss:$8 sps:$4 sm:$0xff]   ;;  %s11003_s0 = sld [smem:[#allocation16_spill]]  ;;  %vm6423_vm3 = vcmask 1044480   ;;  %vm6485_vm9 = vcmask 138368   ;;  %vm6487_vm11 = vcmask 146568  }
 0x131   :  { %2845 = vmatpush1.bf16.msra.mxu1 %v7470_v9  ;;  %s11004_s3 = sld [smem:[#allocation15_spill]]  ;;  %vm6419_vm12 = vcmask 80896   ;;  %vm6467_vm13 = vcmask 15360  }
 0x132   :  { %2846 = vmatprep.subr.bf16.mxu1 %v7478_v10  ;;  %v7515_v10 = vld [vmem:[%s10999_s6 + $0x250] ss:$8 sps:$4 sm:$0xff]   ;;  %s11006_s9 = sld [smem:[#allocation17_spill]] }
 0x133   :  { %2806 = vmatpush1.bf16.msra.mxu0 %v7437_v11 }
 0x134   :  { %2807 = vmatprep.subr.bf16.mxu0 %v7445_v12  ;;  %v7520_v12 = vld [vmem:[%s10999_s6 + $0x244] ss:$8 sps:$4 sm:$0xff]  }
 0x135   :  { %2847 = vmatpush1.bf16.msra.mxu1 %v7476_v13 }
 0x136   :  { %2848 = vmatprep.subr.bf16.mxu1 %v7484_v14  ;;  %v7518_v14 = vld [vmem:[%s10999_s6 + $0x240] ss:$8 sps:$4 sm:$0xff]  }
 0x137   :  { %2808 = vmatpush2.bf16.msra.mxu0 %v7443_v15  ;;  %v7523_v15 = vld [vmem:[%s10999_s6 + $0x234] ss:$8 sps:$4 sm:$0xff]  }
 0x138   :  { %2809 = vmatprep.subr.bf16.mxu0 %v7451_v18  ;;  %v8027_v54 = vpop.eup %8026  ;;  %v7521_v18 = vld [vmem:[%s10999_s6 + $0x230] ss:$8 sps:$4 sm:$0xff]  }
 0x139   :  { %2849 = vmatpush2.bf16.msra.mxu1 %v7482_v20  ;;  %v2003_v57 = vpack.c.bf16 %v8027_v54, %v8027_v54  ;;  %v7526_v20 = vld [vmem:[%s10999_s6 + $0x224] ss:$8 sps:$4 sm:$0xff]   ;;  %v7575_v54 = vld [vmem:[%s10999_s6 + $0x310] ss:$8 sps:$4 sm:$0xff]  }
 0x13a   :  { %2850 = vmatprep.subr.bf16.mxu1 %v7490_v21  ;;  %v7524_v21 = vld [vmem:[%s10999_s6 + $0x220] ss:$8 sps:$4 sm:$0xff]  }
 0x13b   :  { %2810 = vmatpush2.bf16.msra.mxu0 %v7449_v22  ;;  %v7529_v22 = vld [vmem:[%s10999_s6 + $0x214] ss:$8 sps:$4 sm:$0xff]  }
 0x13c   :  { %2811 = vmatprep.subr.bf16.mxu0 %v7457_v24 }
 0x13d   :  { %2851 = vmatpush2.bf16.msra.mxu1 %v7488_v25 }
 0x13e   :  { %2852 = vmatprep.subr.bf16.mxu1 %v7493_v26  ;;  %v7527_v26 = vld [vmem:[%s10999_s6 + $0x210] ss:$8 sps:$4 sm:$0xff]  }
 0x13f   :  { %2812 = vmatpush2.bf16.msra.mxu0 %v7455_v27  ;;  %v7557_v27 = vld [vmem:[%s10999_s6 + $0x370] ss:$8 sps:$4 sm:$0xff]  }
 0x140   :  { %2813 = vmatprep.subr.bf16.mxu0 %v7463_v30  ;;  %v7532_v30 = vld [vmem:[%s10999_s6 + $0x204] ss:$8 sps:$4 sm:$0xff]  }
 0x141   :  { %2853 = vmatpush2.bf16.msra.mxu1 %v7491_v31  ;;  %v7562_v31 = vld [vmem:[%s10999_s6 + $0x364] ss:$8 sps:$4 sm:$0xff]  }
 0x142   :  { %2854 = vmatprep.subr.bf16.mxu1 %v7496_v32  ;;  %v7530_v32 = vld [vmem:[%s10999_s6 + $0x200] ss:$8 sps:$4 sm:$0xff]  }
 0x143   :  { %2814 = vmatpush2.bf16.msra.mxu0 %v7461_v33  ;;  %v7560_v33 = vld [vmem:[%s10999_s6 + $0x360] ss:$8 sps:$4 sm:$0xff]  }
 0x144   :  { %2815 = vmatprep.subr.bf16.mxu0 %v7469_v37  ;;  %v7565_v37 = vld [vmem:[%s10999_s6 + $0x354] ss:$8 sps:$4 sm:$0xff]  }
 0x145   :  { %2855 = vmatpush2.bf16.msra.mxu1 %v7494_v38  ;;  %v7533_v38 = vld [vmem:[%s10999_s6 + $0x2f0] ss:$8 sps:$4 sm:$0xff]  }
 0x146   :  { %2856 = vmatprep.subr.bf16.mxu1 %v7499_v39  ;;  %v7563_v39 = vld [vmem:[%s10999_s6 + $0x350] ss:$8 sps:$4 sm:$0xff]  }
 0x147   :  { %2816 = vmatpush2.bf16.msra.mxu0 %v7467_v40  ;;  %v7538_v40 = vld [vmem:[%s10999_s6 + $0x2e4] ss:$8 sps:$4 sm:$0xff]  }
 0x148   :  { %2817 = vmatprep.subr.bf16.mxu0 %v7475_v41  ;;  %v7568_v41 = vld [vmem:[%s10999_s6 + $0x344] ss:$8 sps:$4 sm:$0xff]  }
 0x149   :  { %2857 = vmatpush2.bf16.msra.mxu1 %v7497_v42  ;;  %v7536_v42 = vld [vmem:[%s10999_s6 + $0x2e0] ss:$8 sps:$4 sm:$0xff]  }
 0x14a   :  { %2858 = vmatprep.subr.bf16.mxu1 %v7502_v43  ;;  %v7566_v43 = vld [vmem:[%s10999_s6 + $0x340] ss:$8 sps:$4 sm:$0xff]  }
 0x14b   :  { %2818 = vmatpush2.bf16.msra.mxu0 %v7473_v44  ;;  %v7541_v44 = vld [vmem:[%s10999_s6 + $0x2d4] ss:$8 sps:$4 sm:$0xff]  }
 0x14c   :  { %2819 = vmatprep.subr.bf16.mxu0 %v7481_v45  ;;  %v7571_v45 = vld [vmem:[%s10999_s6 + $0x334] ss:$8 sps:$4 sm:$0xff]  }
 0x14d   :  { %2859 = vmatpush2.bf16.msra.mxu1 %v7500_v46  ;;  %v7539_v46 = vld [vmem:[%s10999_s6 + $0x2d0] ss:$8 sps:$4 sm:$0xff]  }
 0x14e   :  { %2860 = vmatprep.subr.bf16.mxu1 %v7505_v47  ;;  %v7569_v47 = vld [vmem:[%s10999_s6 + $0x330] ss:$8 sps:$4 sm:$0xff]  }
 0x14f   :  { %2820 = vmatpush2.bf16.msra.mxu0 %v7479_v48  ;;  %v7544_v48 = vld [vmem:[%s10999_s6 + $0x2c4] ss:$8 sps:$4 sm:$0xff]  }
 0x150   :  { %2821 = vmatprep.subr.bf16.mxu0 %v7487_v16  ;;  %v7574_v16 = vld [vmem:[%s10999_s6 + $0x324] ss:$8 sps:$4 sm:$0xff]  }
 0x151   :  { %2861 = vmatpush2.bf16.msra.mxu1 %v7503_v49  ;;  %v7542_v49 = vld [vmem:[%s10999_s6 + $0x2c0] ss:$8 sps:$4 sm:$0xff]  }
 0x152   :  { %2862 = vmatprep.subr.bf16.mxu1 %v7508_v50  ;;  %v7572_v50 = vld [vmem:[%s10999_s6 + $0x320] ss:$8 sps:$4 sm:$0xff]  }
 0x153   :  { %2822 = vmatpush2.bf16.msra.mxu0 %v7485_v51  ;;  %v7547_v51 = vld [vmem:[%s10999_s6 + $0x2b4] ss:$8 sps:$4 sm:$0xff]  }
 0x154   :  { %2873 = vmatprep.subr.bf16.mxu0 %v7511_v53  ;;  %v7545_v53 = vld [vmem:[%s10999_s6 + $0x2b0] ss:$8 sps:$4 sm:$0xff]  }
 0x155   :  { %2863 = vmatpush2.bf16.msra.mxu1 %v7506_v52  ;;  %v7577_v52 = vld [vmem:[%s10999_s6 + $0x314] ss:$8 sps:$4 sm:$0xff]  }
 0x156   :  { %2914 = vmatprep.subr.bf16.mxu1 %v7559_v58  ;;  %v1783_v62 = vpop.f32.mrf.mxu0  ;;  %2824 = vmatmul.mubr.bf16.vlgmr.msra.gmra.mxu0 %v2003_v57  ;;  %v7550_v58 = vld [vmem:[%s10999_s6 + $0x2a4] ss:$8 sps:$4 sm:$0xff]   ;;  %v7578_v57 = vld [vmem:[%s10999_s6 + $0x300] ss:$8 sps:$4 sm:$0xff]  }
 0x157   :  { %v1784_v63 = vadd.f32 %v1783_v62, %v358_v56  ;;  %2874 = vmatpush1.bf16.msra.mxu0 %v7509_v59  ;;  %v7580_v56 = vld [vmem:[%s10999_s6 + $0x304] ss:$8 sps:$4 sm:$0xff]   ;;  %v7548_v59 = vld [vmem:[%s10999_s6 + $0x2a0] ss:$8 sps:$4 sm:$0xff]   ;;  %v7551_v62 = vld [vmem:[%s10999_s6 + $0x290] ss:$8 sps:$4 sm:$0xff]  }
 0x158   :  { %v1824_v0 = vpop.f32.mrf.mxu1  ;;  %v1785_v2 = vpop.f32.mrf.mxu0  ;;  %2875 = vmatprep.subr.bf16.mxu0 %v7514_v60  ;;  %v7553_v60 = vld [vmem:[%s10999_s6 + $0x294] ss:$8 sps:$4 sm:$0xff]  }
 0x159   :  { %v1825_v4 = vadd.f32 %v1824_v0, %v1784_v63  ;;  %v1786_v5 = vadd.f32 %v1785_v2, %v362_v61  ;;  %v7583_v61 = vld [vmem:[%s10999_s6 + $0x3f4] ss:$8 sps:$4 sm:$0xff]   ;;  %v7581_v63 = vld [vmem:[%s10999_s6 + $0x3f0] ss:$8 sps:$4 sm:$0xff]   ;;  %v7556_v0 = vld [vmem:[%s10999_s6 + $0x284] ss:$8 sps:$4 sm:$0xff]  }
 0x15a   :  { %v1826_v6 = vpop.f32.mrf.mxu1  ;;  %v1787_v7 = vpop.f32.mrf.mxu0  ;;  %v365_v2 = vsub.s32 4, %v9093_v29 }
 0x15b   :  { %v1827_v8 = vadd.f32 %v1826_v6, %v1786_v5  ;;  %2876 = vmatpush1.bf16.msra.mxu0 %v7512_v1  ;;  %8028 = vtanh.f32 %v1825_v4  ;;  %v7586_v1 = vld [vmem:[%s10999_s6 + $0x3e4] ss:$8 sps:$4 sm:$0xff]   ;;  %v7584_v4 = vld [vmem:[%s10999_s6 + $0x3e0] ss:$8 sps:$4 sm:$0xff]   ;;  %v7589_v5 = vld [vmem:[%s10999_s6 + $0x3d4] ss:$8 sps:$4 sm:$0xff]  }
 0x15c   :  { %v1828_v9 = vpop.f32.mrf.mxu1  ;;  %v1788_v11 = vpop.f32.mrf.mxu0  ;;  %2877 = vmatprep.subr.bf16.mxu0 %v7517_v3  ;;  %v7554_v3 = vld [vmem:[%s10999_s6 + $0x280] ss:$8 sps:$4 sm:$0xff]   ;;  %v369_v6 = vsub.s32 5, %v9093_v29  ;;  %v366_v7 = vrot.slane %v9104_v34, %v365_v2 }
 0x15d   :  { %8030 = vtanh.f32 %v1827_v8  ;;  %v7587_v8 = vld [vmem:[%s10999_s6 + $0x3d0] ss:$8 sps:$4 sm:$0xff]   ;;  %v7592_v9 = vld [vmem:[%s10999_s6 + $0x3c4] ss:$8 sps:$4 sm:$0xff]  }
 0x15e   :  { %v1829_v13 = vpop.f32.mrf.mxu1 }
 0x15f   :  { %2878 = vmatpush1.bf16.msra.mxu0 %v7515_v10  ;;  %v370_v10 = vrot.slane %v9104_v34, %v369_v6 }
 0x160   :  { %2879 = vmatprep.subr.bf16.mxu0 %v7520_v12 }
 0x163   :  { %2880 = vmatpush1.bf16.msra.mxu0 %v7518_v14  ;;  %v7590_v14 = vld [vmem:[%s10999_s6 + $0x3c0] ss:$8 sps:$4 sm:$0xff]  }
 0x164   :  { %2881 = vmatprep.subr.bf16.mxu0 %v7523_v15 }
 0x167   :  { %2882 = vmatpush1.bf16.msra.mxu0 %v7521_v18  ;;  %v7595_v18 = vld [vmem:[%s10999_s6 + $0x3b4] ss:$8 sps:$4 sm:$0xff]  }
 0x168   :  { %2883 = vmatprep.subr.bf16.mxu0 %v7526_v20  ;;  %v8029_v23 = vpop.eup %8028 }
 0x169   :  { %v2005_v28 = vpack.c.bf16 %v8029_v23, %v8029_v23 }
 0x16a   :  { %v8031_v24 = vpop.eup %8030 }
 0x16b   :  { %v2006_v25 = vpack.c.bf16 %v8031_v24, %v8031_v24  ;;  %2884 = vmatpush1.bf16.msra.mxu0 %v7524_v21 }
 0x16c   :  { %2885 = vmatprep.subr.bf16.mxu0 %v7529_v22 }
 0x16d   :  { %2864 = vmatprep.mubr.bf16.mxu1 %v2006_v25 }
 0x16e   :  { %2865 = vmatmul.mubr.bf16.vlgmr.msra.gmra.mxu1 %v2005_v28  ;;  %v7598_v28 = vld [vmem:[%s10999_s6 + $0x3a4] ss:$8 sps:$4 sm:$0xff]  }
 0x16f   :  { %2886 = vmatpush1.bf16.msra.mxu0 %v7527_v26  ;;  %2915 = vmatpush1.bf16.msra.mxu1 %v7557_v27  ;;  %v7593_v26 = vld [vmem:[%s10999_s6 + $0x3b0] ss:$8 sps:$4 sm:$0xff]  }
 0x170   :  { %2887 = vmatprep.subr.bf16.mxu0 %v7532_v30  ;;  %2916 = vmatprep.subr.bf16.mxu1 %v7562_v31  ;;  %v7596_v31 = vld [vmem:[%s10999_s6 + $0x3a0] ss:$8 sps:$4 sm:$0xff]  }
 0x173   :  { %2888 = vmatpush1.bf16.msra.mxu0 %v7530_v32  ;;  %2917 = vmatpush1.bf16.msra.mxu1 %v7560_v33  ;;  %v7601_v32 = vld [vmem:[%s10999_s6 + $0x394] ss:$8 sps:$4 sm:$0xff]   ;;  %v7599_v33 = vld [vmem:[%s10999_s6 + $0x390] ss:$8 sps:$4 sm:$0xff]  }
 0x174   :  { %2889 = vmatprep.subr.bf16.mxu0 %v7535_v35  ;;  %2918 = vmatprep.subr.bf16.mxu1 %v7565_v37  ;;  %v7604_v35 = vld [vmem:[%s10999_s6 + $0x384] ss:$8 sps:$4 sm:$0xff]   ;;  %v7602_v37 = vld [vmem:[%s10999_s6 + $0x380] ss:$8 sps:$4 sm:$0xff]  }
 0x177   :  { %2890 = vmatpush2.bf16.msra.mxu0 %v7533_v38  ;;  %2919 = vmatpush1.bf16.msra.mxu1 %v7563_v39 }
 0x178   :  { %2891 = vmatprep.subr.bf16.mxu0 %v7538_v40  ;;  %2920 = vmatprep.subr.bf16.mxu1 %v7568_v41 }
 0x17b   :  { %2892 = vmatpush2.bf16.msra.mxu0 %v7536_v42  ;;  %2921 = vmatpush1.bf16.msra.mxu1 %v7566_v43  ;;  %v373_v42 = vsub.s32 6, %v9093_v29  ;;  %v377_v43 = vsub.s32 7, %v9093_v29 }
 0x17c   :  { %2893 = vmatprep.subr.bf16.mxu0 %v7541_v44  ;;  %2922 = vmatprep.subr.bf16.mxu1 %v7571_v45 }
 0x17d   :  { %v374_v44 = vrot.slane %v9104_v34, %v373_v42  ;;  %v378_v45 = vrot.slane %v9104_v34, %v377_v43  ;;  %v7605_v34 = vld [vmem:[%s11001_s5 + $0x78] sm:$0xff]  }
 0x17f   :  { %2894 = vmatpush2.bf16.msra.mxu0 %v7539_v46  ;;  %2923 = vmatpush1.bf16.msra.mxu1 %v7569_v47 }
 0x180   :  { %2895 = vmatprep.subr.bf16.mxu0 %v7544_v48  ;;  %2924 = vmatprep.subr.bf16.mxu1 %v7574_v16 }
 0x183   :  { %2896 = vmatpush2.bf16.msra.mxu0 %v7542_v49  ;;  %2925 = vmatpush1.bf16.msra.mxu1 %v7572_v50 }
 0x184   :  { %2897 = vmatprep.subr.bf16.mxu0 %v7547_v51  ;;  %2926 = vmatprep.subr.bf16.mxu1 %v7577_v52 }
 0x187   :  { %2898 = vmatpush2.bf16.msra.mxu0 %v7545_v53  ;;  %2927 = vmatpush1.bf16.msra.mxu1 %v7575_v54 }
 0x188   :  { %2899 = vmatprep.subr.bf16.mxu0 %v7550_v58  ;;  %2928 = vmatprep.subr.bf16.mxu1 %v7580_v56 }
 0x18b   :  { %2900 = vmatpush2.bf16.msra.mxu0 %v7548_v59  ;;  %2929 = vmatpush1.bf16.msra.mxu1 %v7578_v57 }
 0x18c   :  { %2901 = vmatprep.subr.bf16.mxu0 %v7553_v60  ;;  %2930 = vmatprep.subr.bf16.mxu1 %v7583_v61 }
 0x18f   :  { %2902 = vmatpush2.bf16.msra.mxu0 %v7551_v62  ;;  %2931 = vmatpush2.bf16.msra.mxu1 %v7581_v63  ;;  %v7606_v62 = vld [vmem:[%s11001_s5 + $0x38] sm:$0xff]   ;;  %v7607_v63 = vld [vmem:[%s11001_s5 + $0x70] sm:$0xff]  }
 0x190   :  { %2903 = vmatprep.subr.bf16.mxu0 %v7556_v0  ;;  %2932 = vmatprep.subr.bf16.mxu1 %v7586_v1  ;;  %v7608_v0 = vld [vmem:[%s11001_s5 + $0x30] sm:$0xff]   ;;  %v7609_v1 = vld [vmem:[%s11001_s5 + $0x68] sm:$0xff]  }
 0x193   :  { %2904 = vmatpush2.bf16.msra.mxu0 %v7554_v3  ;;  %2933 = vmatpush2.bf16.msra.mxu1 %v7584_v4  ;;  %v7610_v3 = vld [vmem:[%s11001_s5 + $0x28] sm:$0xff]  }
 0x194   :  { %2934 = vmatprep.subr.bf16.mxu1 %v7589_v5  ;;  %7344 = vmatprep.subr.bf16.mxu0 %v7605_v34 }
 0x196   :  { %v1865_v11 = vpop.f32.mrf.mxu0 }
 0x197   :  { %v1866_v12 = vadd.f32 %v1865_v11, %v366_v7  ;;  %2935 = vmatpush2.bf16.msra.mxu1 %v7587_v8 }
 0x198   :  { %v1906_v13 = vpop.f32.mrf.mxu1  ;;  %v1867_v15 = vpop.f32.mrf.mxu0  ;;  %2936 = vmatprep.subr.bf16.mxu1 %v7592_v9  ;;  %v2139_v9 = vld [vmem:[%s11002_s2] sm:$0x3] }
 0x199   :  { %v1907_v20 = vadd.f32 %v1906_v13, %v1866_v12  ;;  %v1868_v21 = vadd.f32 %v1867_v15, %v370_v10  ;;  %v2144_v10 = vrot.slane %v2139_v9, %v9217_v17  ;;  %v2148_v11 = vrot.slane %v2139_v9, %v9110_v36 }
 0x19a   :  { %v1908_v22 = vpop.f32.mrf.mxu1  ;;  %v1869_v23 = vpop.f32.mrf.mxu0 }
 0x19b   :  { %v1909_v24 = vadd.f32 %v1908_v22, %v1868_v21  ;;  %2937 = vmatpush2.bf16.msra.mxu1 %v7590_v14  ;;  %8032 = vtanh.f32 %v1907_v20  ;;  %v7612_v21 = vld [vmem:[%s11001_s5 + $0x20] sm:$0xff]  }
 0x19c   :  { %v1910_v25 = vpop.f32.mrf.mxu1  ;;  %v1870_v27 = vpop.f32.mrf.mxu0  ;;  %2938 = vmatprep.subr.bf16.mxu1 %v7595_v18  ;;  %v7611_v18 = vld [vmem:[%s11001_s5 + $0x60] sm:$0xff]  }
 0x19d   :  { %8034 = vtanh.f32 %v1909_v24  ;;  %v7613_v24 = vld [vmem:[%s11001_s5 + $0x58] sm:$0xff]   ;;  %v7615_v27 = vld [vmem:[%s11001_s5 + $0x50] sm:$0xff]  }
 0x19e   :  { %v1911_v30 = vpop.f32.mrf.mxu1 }
 0x19f   :  { %2939 = vmatpush2.bf16.msra.mxu1 %v7593_v26  ;;  %v7614_v26 = vld [vmem:[%s11001_s5 + $0x18] sm:$0xff]   ;;  %v7617_v30 = vld [vmem:[%s11001_s5 + $0x48] sm:$0xff]  }
 0x1a0   :  { %2940 = vmatprep.subr.bf16.mxu1 %v7598_v28  ;;  %v7616_v28 = vld [vmem:[%s11001_s5 + $0x10] sm:$0xff]  }
 0x1a3   :  { %2941 = vmatpush2.bf16.msra.mxu1 %v7596_v31  ;;  %v7618_v31 = vld [vmem:[%s11001_s5 + $0x8] sm:$0xff]  }
 0x1a4   :  { %2942 = vmatprep.subr.bf16.mxu1 %v7601_v32  ;;  %v7619_v32 = vld [vmem:[%s11001_s5 + $0x40] sm:$0xff]  }
 0x1a7   :  { %2943 = vmatpush2.bf16.msra.mxu1 %v7599_v33  ;;  %v7620_v33 = vld [vmem:[%s11001_s5] sm:$0xff]   ;;  %s11005_s5 = sld [smem:[#allocation18_spill]] }
 0x1a8   :  { %2944 = vmatprep.subr.bf16.mxu1 %v7604_v35  ;;  %v8033_v38 = vpop.eup %8032 }
 0x1a9   :  { %v2007_v41 = vpack.c.bf16 %v8033_v38, %v8033_v38 }
 0x1aa   :  { %v8035_v39 = vpop.eup %8034 }
 0x1ab   :  { %v2008_v40 = vpack.c.bf16 %v8035_v39, %v8035_v39  ;;  %2945 = vmatpush2.bf16.msra.mxu1 %v7602_v37 }
 0x1ad   :  { %2905 = vmatprep.mubr.bf16.mxu0 %v2008_v40 }
 0x1ae   :  { %2906 = vmatmul.mubr.bf16.vlgmr.msra.gmra.mxu0 %v2007_v41 }
 0x1af   :  { %7345 = vmatpush3.bf16.msra.mxu0 %v7606_v62 }
 0x1b0   :  { %7346 = vmatprep.subr.bf16.mxu0 %v7607_v63 }
 0x1b3   :  { %7347 = vmatpush3.bf16.msra.mxu0 %v7608_v0 }
 0x1b4   :  { %7348 = vmatprep.subr.bf16.mxu0 %v7609_v1 }
 0x1b7   :  { %7349 = vmatpush3.bf16.msra.mxu0 %v7610_v3  ;;  %v7625_v3 = vld [vmem:[%s11005_s5] sm:$0xff]  }
 0x1b8   :  { %7350 = vmatprep.subr.bf16.mxu0 %v7611_v18  ;;  %v7629_v18 = vld [vmem:[%s10965_s11 + $0x20] ss:$8 sps:$4 sm:$0xff]  }
 0x1bb   :  { %7351 = vmatpush3.bf16.msra.mxu0 %v7612_v21  ;;  %v7632_v21 = vld [vmem:[%s10965_s11 + $0x10] ss:$8 sps:$4 sm:$0xff]  }
 0x1bc   :  { %7352 = vmatprep.subr.bf16.mxu0 %v7613_v24  ;;  %v8152_v24 = vmov 0  }
 0x1bf   :  { %7353 = vmatpush3.bf16.msra.mxu0 %v7614_v26  ;;  %v3449_v26 = vld [vmem:[%s10967_s13 + $0x1e0] sm:$0xff] }
 0x1c0   :  { %7354 = vmatprep.subr.bf16.mxu0 %v7615_v27  ;;  %v9651_v27 = vld [vmem:[%s10967_s13 + $0x1c8] sm:$0xff] }
 0x1c3   :  { %7355 = vmatpush3.bf16.msra.mxu0 %v7616_v28 }
 0x1c4   :  { %7356 = vmatprep.subr.bf16.mxu0 %v7617_v30 }
 0x1c7   :  { %7357 = vmatpush3.bf16.msra.mxu0 %v7618_v31  ;;  %v9656_v31 = vld [vmem:[%s10967_s13 + $0x1e8] sm:$0xff] }
 0x1c8   :  { %7358 = vmatprep.subr.bf16.mxu0 %v7619_v32  ;;  %v3437_v32 = vld [vmem:[%s10967_s13 + $0x180] sm:$0xff] }
 0x1cb   :  { %7359 = vmatpush3.bf16.msra.mxu0 %v7620_v33  ;;  %v3441_v33 = vld [vmem:[%s10967_s13 + $0x1a0] sm:$0xff] }
 0x1d6   :  { %v1947_v46 = vpop.f32.mrf.mxu0 }
 0x1d7   :  { %v1948_v47 = vadd.f32 %v1947_v46, %v374_v44 }
 0x1d8   :  { %v1988_v48 = vpop.f32.mrf.mxu1  ;;  %v1949_v16 = vpop.f32.mrf.mxu0 }
 0x1d9   :  { %v1989_v49 = vadd.f32 %v1988_v48, %v1948_v47  ;;  %v1950_v50 = vadd.f32 %v1949_v16, %v378_v45 }
 0x1da   :  { %v1990_v51 = vpop.f32.mrf.mxu1  ;;  %v1951_v52 = vpop.f32.mrf.mxu0 }
 0x1db   :  { %v1991_v53 = vadd.f32 %v1990_v51, %v1950_v50  ;;  %8036 = vtanh.f32 %v1989_v49 }
 0x1dc   :  { %v1992_v54 = vpop.f32.mrf.mxu1  ;;  %v1952_v58 = vpop.f32.mrf.mxu0 }
 0x1dd   :  { %8038 = vtanh.f32 %v1991_v53  ;;  %v7621_v53 = vld [vmem:[%s11003_s0 + $0x18] sm:$0xff]   ;;  %v8150_v54 = vmov 0.0   ;;  %v7622_v58 = vld [vmem:[%s11003_s0 + $0x10] sm:$0xff]  }
 0x1de   :  { %v1993_v56 = vpop.f32.mrf.mxu1  ;;  %7377 = vmatprep.subr.bf16.mxu1 %v8150_v54 }
 0x1df   :  { %v7623_v56 = vld [vmem:[%s11003_s0 + $0x8] sm:$0xff]  }
 0x1e8   :  { %v8037_v59 = vpop.eup %8036 }
 0x1e9   :  { %v2009_v61 = vpack.c.bf16 %v8037_v59, %v8037_v59  ;;  %v7624_v59 = vld [vmem:[%s11003_s0] sm:$0xff]  }
 0x1ea   :  { %v8039_v57 = vpop.eup %8038 }
 0x1eb   :  { %v2010_v60 = vpack.c.bf16 %v8039_v57, %v8039_v57 }
 0x1ed   :  { %2946 = vmatprep.mubr.bf16.mxu1 %v2010_v60  ;;  %v6919_v60 = vld [vmem:[%s11004_s3] ss:$0 sm:$0xff]  ;;  %s11007_s3 = sld [smem:[#allocation19_spill]] }
 0x1ee   :  { %2947 = vmatmul.mubr.bf16.vlgmr.msra.gmra.mxu1 %v2009_v61 }
 0x1ef   :  { %7378 = vmatpush3.bf16.msra.mxu1 %v7621_v53  ;;  %7385 = vmatprep.mubr.msk.bf16.mxu1 %vm8151_vm0, %v8150_v54  ;;  %v3405_v53 = vld [vmem:[%s10967_s13 + $0x80] sm:$0xff] }
 0x1f0   :  { %7379 = vmatprep.subr.bf16.mxu1 %v8150_v54 }
 0x1f3   :  { %7380 = vmatpush3.bf16.msra.mxu1 %v7622_v58  ;;  %v3409_v58 = vld [vmem:[%s10967_s13 + $0xa0] sm:$0xff] }
 0x1f4   :  { %7381 = vmatprep.subr.bf16.mxu1 %v8150_v54 }
 0x1f7   :  { %7382 = vmatpush3.bf16.msra.mxu1 %v7623_v56  ;;  %v6971_v56 = vcombine.high %v3405_v53, %v3409_v58 }
 0x1f8   :  { %7383 = vmatprep.subr.bf16.mxu1 %v8150_v54 }
 0x1fb   :  { %7384 = vmatpush3.bf16.msra.mxu1 %v7624_v59  ;;  %v6970_v59 = vcombine.low %v3405_v53, %v3409_v58 }
 0x1fc   :  { %7389 = vmatprep.subr.bf16.mxu1 %v8150_v54 }
 0x216   :  { %v2825_v4 = vpop.f32.mrf.mxu0 }
 0x217   :  { %v2826_v12 = vadd.f32 %v2825_v4, %v2144_v10 }
 0x218   :  { %v2827_v5 = vpop.f32.mrf.mxu0 }
 0x219   :  { %v2828_v14 = vadd.f32 %v2827_v5, %v2148_v11  ;;  %v6936_v5 = vld [vmem:[%s11006_s9] ss:$0 sm:$0xff] }
 0x21a   :  { %v2829_v7 = vpop.f32.mrf.mxu0 }
 0x21c   :  { %v2830_v8 = vpop.f32.mrf.mxu0 }
 0x22e   :  { %v2866_v13 = vpop.f32.mrf.mxu1 }
 0x22f   :  { %v2867_v15 = vadd.f32 %v2866_v13, %v2826_v12  ;;  %v7628_v13 = vld [vmem:[%s10965_s11 + $0x34] ss:$8 sps:$4 sm:$0xff]  }
 0x230   :  { %v2868_v20 = vpop.f32.mrf.mxu1 }
 0x231   :  { %v2869_v22 = vadd.f32 %v2868_v20, %v2828_v14  ;;  %v7626_v14 = vld [vmem:[%s10965_s11 + $0x30] ss:$8 sps:$4 sm:$0xff]   ;;  %v7634_v20 = vld [vmem:[%s10965_s11 + $0x14] ss:$8 sps:$4 sm:$0xff]  }
 0x232   :  { %v2870_v23 = vpop.f32.mrf.mxu1 }
 0x233   :  { %v7635_v23 = vld [vmem:[%s10965_s11] ss:$8 sps:$4 sm:$0xff]  }
 0x234   :  { %v2871_v25 = vpop.f32.mrf.mxu1 }
 0x235   :  { %v3445_v25 = vld [vmem:[%s10967_s13 + $0x1c0] sm:$0xff] }
 0x236   :  { %v7010_v28 = vcombine.low %v3445_v25, %v3449_v26  ;;  %v7011_v30 = vcombine.high %v3445_v25, %v3449_v26  ;;  %v3438_v26 = vld [vmem:[%s10967_s13 + $0x188] sm:$0xff] }
 0x238   :  { %4199 = vmatprep.subr.bf16.mxu0 %v7011_v30 }
 0x26e   :  { %v2907_v35 = vpop.f32.mrf.mxu0 }
 0x26f   :  { %v2908_v37 = vadd.f32 %v2907_v35, %v2867_v15  ;;  %v7631_v15 = vld [vmem:[%s10965_s11 + $0x24] ss:$8 sps:$4 sm:$0xff]   ;;  %v7012_v35 = vcombine.low %v9651_v27, %v9656_v31 }
 0x270   :  { %v2909_v38 = vpop.f32.mrf.mxu0 }
 0x271   :  { %v2910_v44 = vadd.f32 %v2909_v38, %v2869_v22  ;;  %v7637_v22 = vld [vmem:[%s10965_s11 + $0x4] ss:$8 sps:$4 sm:$0xff]   ;;  %v7003_v38 = vcombine.high %v3437_v32, %v3441_v33 }
 0x272   :  { %v2911_v39 = vpop.f32.mrf.mxu0 }
 0x273   :  { %v7002_v39 = vcombine.low %v3437_v32, %v3441_v33 }
 0x274   :  { %v2912_v40 = vpop.f32.mrf.mxu0 }
 0x275   :  { %v3429_v40 = vld [vmem:[%s10967_s13 + $0x140] sm:$0xff] }
 0x2ae   :  { %v2948_v41 = vpop.f32.mrf.mxu1 }
 0x2af   :  { %v2949_v45 = vadd.f32 %v2948_v41, %v2908_v37  ;;  %v7013_v37 = vcombine.high %v9651_v27, %v9656_v31  ;;  %v3433_v41 = vld [vmem:[%s10967_s13 + $0x160] sm:$0xff]  ;;  %v3414_v27 = vld [vmem:[%s10967_s13 + $0xc8] sm:$0xff] }
 0x2b0   :  { %v2950_v46 = vpop.f32.mrf.mxu1  ;;  %v3418_v31 = vld [vmem:[%s10967_s13 + $0xe8] sm:$0xff] }
 0x2b1   :  { %v2951_v47 = vadd.f32 %v2950_v46, %v2910_v44  ;;  %8040 = vtanh.f32 %v2949_v45  ;;  %v6995_v44 = vcombine.high %v3429_v40, %v3433_v41  ;;  %v6994_v45 = vcombine.low %v3429_v40, %v3433_v41  ;;  %v3421_v46 = vld [vmem:[%s10967_s13 + $0x100] sm:$0xff]  ;;  %v3422_v41 = vld [vmem:[%s10967_s13 + $0x108] sm:$0xff] }
 0x2b2   :  { %v2952_v48 = vpop.f32.mrf.mxu1 }
 0x2b3   :  { %8042 = vtanh.f32 %v2951_v47  ;;  %v3425_v47 = vld [vmem:[%s10967_s13 + $0x120] sm:$0xff] }
 0x2b4   :  { %v2953_v16 = vpop.f32.mrf.mxu1  ;;  %v6987_v48 = vcombine.high %v3421_v46, %v3425_v47 }
 0x2b5   :  { %v6986_v16 = vcombine.low %v3421_v46, %v3425_v47  ;;  %v6981_v47 = vcombine.high %v3414_v27, %v3418_v31 }
 0x2be   :  { %v8041_v49 = vpop.eup %8040 }
 0x2bf   :  { %v2957_v52 = vpack.c.bf16 %v8041_v49, %v8041_v49  ;;  %v3413_v49 = vld [vmem:[%s10967_s13 + $0xc0] sm:$0xff] }
 0x2c0   :  { %v8043_v50 = vpop.eup %8042 }
 0x2c1   :  { %v2958_v51 = vpack.c.bf16 %v8043_v50, %v8043_v50  ;;  %v3417_v50 = vld [vmem:[%s10967_s13 + $0xe0] sm:$0xff] }
 0x2c3   :  { %3126 = vmatprep.mubr.bf16.mxu0 %v2958_v51  ;;  %v6979_v51 = vcombine.high %v3413_v49, %v3417_v50 }
 0x2c4   :  { %3127 = vmatmul.mubr.bf16.vlgmr.msra.gmra.mxu0 %v2957_v52  ;;  %v6978_v52 = vcombine.low %v3413_v49, %v3417_v50  ;;  %v6980_v49 = vcombine.low %v3414_v27, %v3418_v31  ;;  %v3461_v27 = vld [vmem:[%s10967_s13 + $0x240] sm:$0xff] }
 0x2c5   :  { %4200 = vmatpush1.bf16.msra.mxu0 %v7010_v28  ;;  %v3442_v28 = vld [vmem:[%s10967_s13 + $0x1a8] sm:$0xff]  ;;  %v3465_v31 = vld [vmem:[%s10967_s13 + $0x260] sm:$0xff] }
 0x2c6   :  { %4201 = vmatprep.subr.bf16.mxu0 %v7003_v38  ;;  %v7005_v33 = vcombine.high %v3438_v26, %v3442_v28  ;;  %v3434_v38 = vld [vmem:[%s10967_s13 + $0x168] sm:$0xff] }
 0x2c9   :  { %4202 = vmatpush1.bf16.msra.mxu0 %v7002_v39  ;;  %v7004_v39 = vcombine.low %v3438_v26, %v3442_v28  ;;  %v3482_v28 = vld [vmem:[%s10967_s13 + $0x2e8] sm:$0xff] }
 0x2ca   :  { %4203 = vmatprep.subr.bf16.mxu0 %v6995_v44  ;;  %v3426_v44 = vld [vmem:[%s10967_s13 + $0x128] sm:$0xff] }
 0x2cb   :  { %v6989_v46 = vcombine.high %v3422_v41, %v3426_v44 }
 0x2cd   :  { %4204 = vmatpush1.bf16.msra.mxu0 %v6994_v45 }
 0x2ce   :  { %4205 = vmatprep.subr.bf16.mxu0 %v6987_v48  ;;  %v3406_v48 = vld [vmem:[%s10967_s13 + $0x88] sm:$0xff] }
 0x2d1   :  { %4206 = vmatpush1.bf16.msra.mxu0 %v6986_v16  ;;  %v3410_v16 = vld [vmem:[%s10967_s13 + $0xa8] sm:$0xff] }
 0x2d2   :  { %4207 = vmatprep.subr.bf16.mxu0 %v6979_v51  ;;  %v6973_v50 = vcombine.high %v3406_v48, %v3410_v16  ;;  %v3398_v51 = vld [vmem:[%s10967_s13 + $0x48] sm:$0xff]  ;;  %v6972_v53 = vcombine.low %v3406_v48, %v3410_v16  ;;  %v7026_v16 = vcombine.low %v3461_v27, %v3465_v31 }
 0x2d3   :  { %v3466_v48 = vld [vmem:[%s10967_s13 + $0x268] sm:$0xff] }
 0x2d5   :  { %4208 = vmatpush1.bf16.msra.mxu0 %v6978_v52  ;;  %v3402_v52 = vld [vmem:[%s10967_s13 + $0x68] sm:$0xff] }
 0x2d6   :  { %4209 = vmatprep.subr.bf16.mxu0 %v6971_v56  ;;  %v6965_v58 = vcombine.high %v3398_v51, %v3402_v52  ;;  %v3390_v56 = vld [vmem:[%s10967_s13 + $0x8] sm:$0xff] }
 0x2d9   :  { %4210 = vmatpush1.bf16.msra.mxu0 %v6970_v59  ;;  %v3394_v59 = vld [vmem:[%s10967_s13 + $0x28] sm:$0xff] }
 0x384   :  { %v7360_v57 = vpop.f32.mrf.mxu0 }
 0x386   :  { %v7361_v61 = vpop.f32.mrf.mxu0 }
 0x387   :  { %v7362_v34 = vadd.f32 %v7361_v61, %v7360_v57  ;;  %v3397_v57 = vld [vmem:[%s10967_s13 + $0x40] sm:$0xff] }
 0x388   :  { %v7363_v62 = vpop.f32.mrf.mxu0 }
 0x389   :  { %v3129_v63 = vadd.f32 %v7362_v34, %v6919_v60  ;;  %v3401_v60 = vld [vmem:[%s10967_s13 + $0x60] sm:$0xff] }
 0x38a   :  { %v7364_v0 = vpop.f32.mrf.mxu0  ;;  %v6963_v61 = vcombine.high %v3397_v57, %v3401_v60  ;;  %v6962_v34 = vcombine.low %v3397_v57, %v3401_v60  ;;  %v3389_v62 = vld [vmem:[%s10967_s13] sm:$0xff]  ;;  %v6964_v57 = vcombine.low %v3398_v51, %v3402_v52  ;;  %v6957_v60 = vcombine.high %v3390_v56, %v3394_v59 }
 0x38b   :  { %8044 = vtanh.f32 %v3129_v63  ;;  %v3393_v63 = vld [vmem:[%s10967_s13 + $0x20] sm:$0xff] }
 0x38c   :  { %4211 = vmatprep.subr.bf16.mxu0 %v6963_v61  ;;  %v6955_v0 = vcombine.high %v3389_v62, %v3393_v63  ;;  %v3510_v61 = vld [vmem:[%s10967_s13 + $0x3c8] sm:$0xff]  ;;  %v3453_v51 = vld [vmem:[%s10967_s13 + $0x200] sm:$0xff] }
 0x38d   :  { %4212 = vmatpush1.bf16.msra.mxu0 %v6962_v34  ;;  %v3514_v34 = vld [vmem:[%s10967_s13 + $0x3e8] sm:$0xff]  ;;  %v3457_v52 = vld [vmem:[%s10967_s13 + $0x220] sm:$0xff] }
 0x38e   :  { %4213 = vmatprep.subr.bf16.mxu0 %v6955_v0  ;;  %v3502_v0 = vld [vmem:[%s10967_s13 + $0x388] sm:$0xff] }
 0x398   :  { %v8045_v1 = vpop.eup %8044 }
 0x399   :  { %v3135_v4 = vpack.c.bf16 %v8045_v1, %v8045_v1  ;;  %v6954_v1 = vcombine.low %v3389_v62, %v3393_v63  ;;  %v6956_v62 = vcombine.low %v3390_v56, %v3394_v59  ;;  %v7077_v63 = vcombine.high %v3510_v61, %v3514_v34  ;;  %v3458_v56 = vld [vmem:[%s10967_s13 + $0x228] sm:$0xff] }
 0x39a   :  { %v7018_v59 = vcombine.low %v3453_v51, %v3457_v52 }
 0x39b   :  { %7386 = vmatmul.mubr.msk.bf16.vlgmr.msra.gmra.mxu1 %vm3175_vm1, %v3135_v4  ;;  %v3513_v4 = vld [vmem:[%s10967_s13 + $0x3e0] sm:$0xff]  ;;  %4214 = vmatpush1.bf16.msra.mxu0 %v6954_v1  ;;  %v3506_v1 = vld [vmem:[%s10967_s13 + $0x3a8] sm:$0xff] }
 0x39c   :  { %7390 = vmatpush3.bf16.msra.mxu1 %v7625_v3  ;;  %7391 = vmatprep.mubr.msk.bf16.mxu1 %vm8151_vm0, %v8150_v54  ;;  %v3509_v3 = vld [vmem:[%s10967_s13 + $0x3c0] sm:$0xff] }
 0x39d   :  { %3352 = vmatprep.subr.bf16.mxu1 %v7628_v13  ;;  %v3493_v13 = vld [vmem:[%s10967_s13 + $0x340] sm:$0xff] }
 0x45b   :  { %v3213_v7 = vpop.f32.mrf.mxu1 }
 0x45c   :  { %v3214_v8 = vadd.f32 %v6936_v5, %v3213_v7  ;;  %v7075_v5 = vcombine.high %v3509_v3, %v3513_v4  ;;  %v7074_v7 = vcombine.low %v3509_v3, %v3513_v4  ;;  %v7076_v3 = vcombine.low %v3510_v61, %v3514_v34  ;;  %v3447_v61 = vld [vmem:[%s10967_s13 + $0x1d0] sm:$0xff] }
 0x45d   :  { %v7387_v9 = vpop.f32.mrf.mxu1  ;;  %v7069_v4 = vcombine.high %v3502_v0, %v3506_v1  ;;  %v3451_v34 = vld [vmem:[%s10967_s13 + $0x1f0] sm:$0xff] }
 0x45e   :  { %v9612_v10 = vpack.c.bf16 %v3214_v8, %v3214_v8  ;;  %6484 = vst.msk [vmem:[#allocation6] sm:$0xff] %vm3235_vm2, %v3214_v8  ;;  %6479 = vst.msk [vmem:[#allocation2] sm:$0xff] %vm3235_vm2, %v3214_v8  ;;  %4215 = vmatprep.subr.bf16.mxu0 %v7075_v5  ;;  %v3501_v8 = vld [vmem:[%s10967_s13 + $0x380] sm:$0xff]  ;;  %v3494_v5 = vld [vmem:[%s10967_s13 + $0x348] sm:$0xff] }
 0x45f   :  { %v3216_v11 = vpop.f32.mrf.mxu1  ;;  %v3505_v9 = vld [vmem:[%s10967_s13 + $0x3a0] sm:$0xff]  ;;  %4216 = vmatpush2.bf16.msra.mxu0 %v7074_v7  ;;  %v3498_v7 = vld [vmem:[%s10967_s13 + $0x368] sm:$0xff] }
 0x460   :  { %7392 = vmatmul.mubr.msk.bf16.vlgmr.msra.gmra.mxu1 %vm3235_vm2, %v9612_v10  ;;  %v7067_v11 = vcombine.high %v3501_v8, %v3505_v9 }
 0x461   :  { %v7388_v12 = vpop.f32.mrf.mxu1  ;;  %3353 = vmatpush1.bf16.msra.mxu1 %v7626_v14  ;;  %3376 = vmatprep.mubr.bf16.mxu1 %v8152_v24  ;;  %v3497_v14 = vld [vmem:[%s10967_s13 + $0x360] sm:$0xff] }
 0x462   :  { %3354 = vmatprep.subr.bf16.mxu1 %v7631_v15  ;;  %v7066_v12 = vcombine.low %v3501_v8, %v3505_v9  ;;  %4217 = vmatprep.subr.bf16.mxu0 %v7067_v11  ;;  %v7059_v15 = vcombine.high %v3493_v13, %v3497_v14  ;;  %v7068_v8 = vcombine.low %v3502_v0, %v3506_v1  ;;  %v3452_v0 = vld [vmem:[%s10967_s13 + $0x1f8] sm:$0xff] }
 0x463   :  { %v7061_v9 = vcombine.high %v3494_v5, %v3498_v7  ;;  %v7060_v11 = vcombine.low %v3494_v5, %v3498_v7  ;;  %v7014_v1 = vcombine.low %v3447_v61, %v3451_v34  ;;  %v3289_v5 = vld [vmem:[%s10966_s12] sm:$0x3] }
 0x464   :  { %4218 = vmatpush2.bf16.msra.mxu0 %v7066_v12  ;;  %v3485_v12 = vld [vmem:[%s10967_s13 + $0x300] sm:$0xff]  ;;  %v3294_v7 = vrot.slane %v3289_v5, %v9217_v17 }
 0x465   :  { %3355 = vmatpush1.bf16.msra.mxu1 %v7629_v18  ;;  %v7058_v18 = vcombine.low %v3493_v13, %v3497_v14  ;;  %4219 = vmatprep.subr.bf16.mxu0 %v7059_v15  ;;  %v3489_v13 = vld [vmem:[%s10967_s13 + $0x320] sm:$0xff]  ;;  %v3486_v14 = vld [vmem:[%s10967_s13 + $0x308] sm:$0xff] }
 0x466   :  { %3356 = vmatprep.subr.bf16.mxu1 %v7634_v20  ;;  %v6942_v20 = vld [vmem:[%s11007_s3] ss:$0 sm:$0xff]  ;;  %v7051_v15 = vcombine.high %v3485_v12, %v3489_v13 }
 0x468   :  { %4220 = vmatpush2.bf16.msra.mxu0 %v7058_v18  ;;  %v3490_v18 = vld [vmem:[%s10967_s13 + $0x328] sm:$0xff] }
 0x469   :  { %3357 = vmatpush1.bf16.msra.mxu1 %v7632_v21  ;;  %4221 = vmatprep.subr.bf16.mxu0 %v7051_v15 }
 0x46a   :  { %3358 = vmatprep.subr.bf16.mxu1 %v7637_v22 }
 0x46d   :  { %3359 = vmatpush1.bf16.msra.mxu1 %v7635_v23 }
 0x46e   :  { %4240 = vmatprep.subr.bf16.mxu1 %v7013_v37  ;;  %v3430_v37 = vld [vmem:[%s10967_s13 + $0x148] sm:$0xff] }
 0x46f   :  { %v6997_v40 = vcombine.high %v3430_v37, %v3434_v38  ;;  %v6996_v45 = vcombine.low %v3430_v37, %v3434_v38  ;;  %v3469_v37 = vld [vmem:[%s10967_s13 + $0x280] sm:$0xff] }
 0x470   :  { %v3473_v38 = vld [vmem:[%s10967_s13 + $0x2a0] sm:$0xff] }
 0x520   :  { %v3273_v21 = vpop.f32.mrf.mxu1 }
 0x521   :  { %v3274_v22 = vadd.f32 %v6942_v20, %v3273_v21  ;;  %v7050_v20 = vcombine.low %v3485_v12, %v3489_v13  ;;  %v7052_v21 = vcombine.low %v3486_v14, %v3490_v18 }
 0x522   :  { %v7393_v23 = vpop.f32.mrf.mxu1 }
 0x523   :  { %8046 = vtanh.f32 %v3274_v22  ;;  %v7053_v22 = vcombine.high %v3486_v14, %v3490_v18  ;;  %4222 = vmatpush2.bf16.msra.mxu0 %v7050_v20  ;;  %v3477_v23 = vld [vmem:[%s10967_s13 + $0x2c0] sm:$0xff]  ;;  %v3439_v20 = vld [vmem:[%s10967_s13 + $0x190] sm:$0xff] }
 0x524   :  { %v3276_v24 = vpop.f32.mrf.mxu1 }
 0x525   :  { %v3481_v24 = vld [vmem:[%s10967_s13 + $0x2e0] sm:$0xff] }
 0x526   :  { %v7394_v25 = vpop.f32.mrf.mxu1  ;;  %v7043_v26 = vcombine.high %v3477_v23, %v3481_v24 }
 0x527   :  { %v3478_v25 = vld [vmem:[%s10967_s13 + $0x2c8] sm:$0xff] }
 0x528   :  { %4223 = vmatprep.subr.bf16.mxu0 %v7043_v26 }
 0x530   :  { %v8047_v30 = vpop.eup %8046 }
 0x531   :  { %v3280_v32 = vpack.c.bf16 %v8047_v30, %v8047_v30  ;;  %v7042_v30 = vcombine.low %v3477_v23, %v3481_v24  ;;  %v3440_v23 = vld [vmem:[%s10967_s13 + $0x198] sm:$0xff] }
 0x532   :  { %v3444_v24 = vld [vmem:[%s10967_s13 + $0x1b8] sm:$0xff] }
 0x533   :  { %6953 = vmatmul.mubr.msk.bf16.vlgmr.msra.gmra.mxu1 %vm3175_vm1, %v3280_v32  ;;  %v7044_v32 = vcombine.low %v3478_v25, %v3482_v28  ;;  %4224 = vmatpush2.bf16.msra.mxu0 %v7042_v30 }
 0x534   :  { %4241 = vmatpush1.bf16.msra.mxu1 %v7012_v35  ;;  %v6988_v35 = vcombine.low %v3422_v41, %v3426_v44  ;;  %v3474_v41 = vld [vmem:[%s10967_s13 + $0x2a8] sm:$0xff]  ;;  %v7034_v44 = vcombine.low %v3469_v37, %v3473_v38 }
 0x535   :  { %4242 = vmatprep.subr.bf16.mxu1 %v7005_v33  ;;  %v7045_v33 = vcombine.high %v3478_v25, %v3482_v28  ;;  %v3431_v28 = vld [vmem:[%s10967_s13 + $0x150] sm:$0xff] }
 0x538   :  { %4243 = vmatpush1.bf16.msra.mxu1 %v7004_v39  ;;  %v3470_v39 = vld [vmem:[%s10967_s13 + $0x288] sm:$0xff] }
 0x539   :  { %4244 = vmatprep.subr.bf16.mxu1 %v6997_v40  ;;  %v7035_v40 = vcombine.high %v3469_v37, %v3473_v38  ;;  %v3432_v37 = vld [vmem:[%s10967_s13 + $0x158] sm:$0xff] }
 0x53a   :  { %v3436_v38 = vld [vmem:[%s10967_s13 + $0x178] sm:$0xff] }
 0x53b   :  { %4225 = vmatprep.subr.bf16.mxu0 %v7035_v40  ;;  %v7008_v40 = vcombine.low %v3440_v23, %v3444_v24 }
 0x53c   :  { %4245 = vmatpush1.bf16.msra.mxu1 %v6996_v45  ;;  %v7036_v45 = vcombine.low %v3470_v39, %v3474_v41  ;;  %4226 = vmatpush2.bf16.msra.mxu0 %v7034_v44  ;;  %v7001_v44 = vcombine.high %v3432_v37, %v3436_v38 }
 0x53d   :  { %4246 = vmatprep.subr.bf16.mxu1 %v6989_v46  ;;  %v7037_v46 = vcombine.high %v3470_v39, %v3474_v41 }
 0x540   :  { %4247 = vmatpush1.bf16.msra.mxu1 %v6988_v35  ;;  %v3462_v35 = vld [vmem:[%s10967_s13 + $0x248] sm:$0xff] }
 0x541   :  { %4248 = vmatprep.subr.bf16.mxu1 %v6981_v47  ;;  %v7027_v47 = vcombine.high %v3461_v27, %v3465_v31  ;;  %v3424_v27 = vld [vmem:[%s10967_s13 + $0x118] sm:$0xff] }
 0x542   :  { %v3428_v31 = vld [vmem:[%s10967_s13 + $0x138] sm:$0xff] }
 0x543   :  { %4227 = vmatprep.subr.bf16.mxu0 %v7027_v47  ;;  %v7000_v47 = vcombine.low %v3432_v37, %v3436_v38 }
 0x544   :  { %4249 = vmatpush1.bf16.msra.mxu1 %v6980_v49  ;;  %v7028_v49 = vcombine.low %v3462_v35, %v3466_v48  ;;  %4228 = vmatpush2.bf16.msra.mxu0 %v7026_v16  ;;  %v6993_v16 = vcombine.high %v3424_v27, %v3428_v31 }
 0x545   :  { %4250 = vmatprep.subr.bf16.mxu1 %v6973_v50  ;;  %v7029_v50 = vcombine.high %v3462_v35, %v3466_v48 }
 0x548   :  { %4251 = vmatpush1.bf16.msra.mxu1 %v6972_v53  ;;  %v3454_v53 = vld [vmem:[%s10967_s13 + $0x208] sm:$0xff] }
 0x549   :  { %4252 = vmatprep.subr.bf16.mxu1 %v6965_v58  ;;  %v7019_v58 = vcombine.high %v3453_v51, %v3457_v52  ;;  %v3416_v51 = vld [vmem:[%s10967_s13 + $0xd8] sm:$0xff] }
 0x54a   :  { %v3420_v52 = vld [vmem:[%s10967_s13 + $0xf8] sm:$0xff] }
 0x54b   :  { %4229 = vmatprep.subr.bf16.mxu0 %v7019_v58  ;;  %v6992_v58 = vcombine.low %v3424_v27, %v3428_v31 }
 0x54c   :  { %4253 = vmatpush1.bf16.msra.mxu1 %v6964_v57  ;;  %v7020_v57 = vcombine.low %v3454_v53, %v3458_v56  ;;  %4230 = vmatpush2.bf16.msra.mxu0 %v7018_v59  ;;  %v6985_v59 = vcombine.high %v3416_v51, %v3420_v52 }
 0x54d   :  { %4254 = vmatprep.subr.bf16.mxu1 %v6957_v60  ;;  %v7021_v60 = vcombine.high %v3454_v53, %v3458_v56 }
 0x550   :  { %4255 = vmatpush1.bf16.msra.mxu1 %v6956_v62  ;;  %v3448_v62 = vld [vmem:[%s10967_s13 + $0x1d8] sm:$0xff] }
 0x551   :  { %4256 = vmatprep.subr.bf16.mxu1 %v7077_v63  ;;  %v7015_v63 = vcombine.high %v3447_v61, %v3451_v34  ;;  %v3408_v61 = vld [vmem:[%s10967_s13 + $0x98] sm:$0xff] }
 0x552   :  { %v3412_v34 = vld [vmem:[%s10967_s13 + $0xb8] sm:$0xff] }
 0x553   :  { %4281 = vmatprep.subr.bf16.mxu0 %v7015_v63  ;;  %v6984_v63 = vcombine.low %v3416_v51, %v3420_v52 }
 0x554   :  { %4257 = vmatpush2.bf16.msra.mxu1 %v7076_v3  ;;  %v7016_v3 = vcombine.low %v3448_v62, %v3452_v0 }
 0x555   :  { %4258 = vmatprep.subr.bf16.mxu1 %v7069_v4  ;;  %v7017_v4 = vcombine.high %v3448_v62, %v3452_v0 }
 0x558   :  { %4259 = vmatpush2.bf16.msra.mxu1 %v7068_v8  ;;  %v3298_v8 = vrot.slane %v3289_v5, %v9110_v36  ;;  %v3400_v5 = vld [vmem:[%s10967_s13 + $0x58] sm:$0xff] }
 0x559   :  { %4260 = vmatprep.subr.bf16.mxu1 %v7061_v9 }
 0x55c   :  { %4261 = vmatpush2.bf16.msra.mxu1 %v7060_v11 }
 0x55d   :  { %4262 = vmatprep.subr.bf16.mxu1 %v7053_v22  ;;  %v3443_v22 = vld [vmem:[%s10967_s13 + $0x1b0] sm:$0xff] }
 0x55e   :  { %v7007_v30 = vcombine.high %v3439_v20, %v3443_v22  ;;  %v7006_v39 = vcombine.low %v3439_v20, %v3443_v22 }
 0x560   :  { %4263 = vmatpush2.bf16.msra.mxu1 %v7052_v21 }
 0x561   :  { %4264 = vmatprep.subr.bf16.mxu1 %v7045_v33  ;;  %v3435_v33 = vld [vmem:[%s10967_s13 + $0x170] sm:$0xff] }
 0x562   :  { %v6999_v41 = vcombine.high %v3431_v28, %v3435_v33  ;;  %v6998_v35 = vcombine.low %v3431_v28, %v3435_v33  ;;  %v3512_v28 = vld [vmem:[%s10967_s13 + $0x3d8] sm:$0xff] }
 0x564   :  { %4265 = vmatpush2.bf16.msra.mxu1 %v7044_v32  ;;  %v7009_v32 = vcombine.high %v3440_v23, %v3444_v24  ;;  %v3511_v24 = vld [vmem:[%s10967_s13 + $0x3d0] sm:$0xff] }
 0x565   :  { %4266 = vmatprep.subr.bf16.mxu1 %v7037_v46  ;;  %v3427_v46 = vld [vmem:[%s10967_s13 + $0x130] sm:$0xff] }
 0x568   :  { %4267 = vmatpush2.bf16.msra.mxu1 %v7036_v45  ;;  %v3423_v45 = vld [vmem:[%s10967_s13 + $0x110] sm:$0xff] }
 0x569   :  { %4268 = vmatprep.subr.bf16.mxu1 %v7029_v50  ;;  %v6991_v48 = vcombine.high %v3423_v45, %v3427_v46  ;;  %v3419_v50 = vld [vmem:[%s10967_s13 + $0xf0] sm:$0xff]  ;;  %v6990_v53 = vcombine.low %v3423_v45, %v3427_v46 }
 0x56c   :  { %4269 = vmatpush2.bf16.msra.mxu1 %v7028_v49  ;;  %v3415_v49 = vld [vmem:[%s10967_s13 + $0xd0] sm:$0xff] }
 0x56d   :  { %4270 = vmatprep.subr.bf16.mxu1 %v7021_v60  ;;  %v6983_v56 = vcombine.high %v3415_v49, %v3419_v50  ;;  %v3411_v60 = vld [vmem:[%s10967_s13 + $0xb0] sm:$0xff]  ;;  %v6982_v62 = vcombine.low %v3415_v49, %v3419_v50 }
 0x570   :  { %4271 = vmatpush2.bf16.msra.mxu1 %v7020_v57  ;;  %v3407_v57 = vld [vmem:[%s10967_s13 + $0x90] sm:$0xff] }
 0x571   :  { %4322 = vmatprep.subr.bf16.mxu1 %v7017_v4  ;;  %v6975_v0 = vcombine.high %v3407_v57, %v3411_v60  ;;  %v3403_v4 = vld [vmem:[%s10967_s13 + $0x70] sm:$0xff] }
 0x5f3   :  { %v3378_v9 = vpop.f32.mrf.mxu1 }
 0x5f4   :  { %v3379_v11 = vadd.f32 %v3378_v9, %v3294_v7  ;;  %v3404_v7 = vld [vmem:[%s10967_s13 + $0x78] sm:$0xff]  ;;  %v6976_v9 = vcombine.low %v3408_v61, %v3412_v34 }
 0x5f5   :  { %v3380_v12 = vpop.f32.mrf.mxu1 }
 0x5f6   :  { %v3381_v13 = vadd.f32 %v3380_v12, %v3298_v8  ;;  %8048 = vtanh.f32 %v3379_v11  ;;  %v6974_v8 = vcombine.low %v3407_v57, %v3411_v60  ;;  %v6969_v12 = vcombine.high %v3400_v5, %v3404_v7 }
 0x5f7   :  { %v3382_v14 = vpop.f32.mrf.mxu1 }
 0x5f8   :  { %8050 = vtanh.f32 %v3381_v13  ;;  %v3391_v13 = vld [vmem:[%s10967_s13 + $0x10] sm:$0xff] }
 0x5f9   :  { %v3383_v15 = vpop.f32.mrf.mxu1  ;;  %v3395_v14 = vld [vmem:[%s10967_s13 + $0x30] sm:$0xff] }
 0x5fa   :  { %v3392_v15 = vld [vmem:[%s10967_s13 + $0x18] sm:$0xff]  ;;  %v6959_v22 = vcombine.high %v3391_v13, %v3395_v14 }
 0x603   :  { %v8049_v18 = vpop.eup %8048 }
 0x604   :  { %v9878_v26 = vpack.c.bf16 %v8049_v18, %v8049_v18  ;;  %v3396_v18 = vld [vmem:[%s10967_s13 + $0x38] sm:$0xff] }
 0x605   :  { %v8051_v21 = vpop.eup %8050  ;;  %v6961_v23 = vcombine.high %v3392_v15, %v3396_v18  ;;  %v6960_v33 = vcombine.low %v3392_v15, %v3396_v18 }
 0x606   :  { %v3388_v25 = vpack.c.bf16 %v8051_v21, %v8051_v21  ;;  %v6968_v21 = vcombine.low %v3400_v5, %v3404_v7 }
 0x608   :  { %4231 = vmatprep.mubr.bf16.mxu0 %v3388_v25  ;;  %4272 = vmatprep.mubr.bf16.mxu1 %v3388_v25 }
 0x609   :  { %4232 = vmatmul.mubr.bf16.vlgmr.msra.gmra.mxu0 %v9878_v26  ;;  %4273 = vmatmul.mubr.bf16.vlgmr.msra.gmra.mxu1 %v9878_v26 }
 0x60a   :  { %4282 = vmatpush1.bf16.msra.mxu0 %v7014_v1  ;;  %4323 = vmatpush1.bf16.msra.mxu1 %v7016_v3  ;;  %v6977_v1 = vcombine.high %v3408_v61, %v3412_v34  ;;  %v3399_v3 = vld [vmem:[%s10967_s13 + $0x50] sm:$0xff] }
 0x60b   :  { %4313 = vmatprep.mubr.bf16.mxu0 %v3388_v25  ;;  %4354 = vmatprep.mubr.bf16.mxu1 %v3388_v25  ;;  %v6967_v11 = vcombine.high %v3399_v3, %v3403_v4  ;;  %v6966_v20 = vcombine.low %v3399_v3, %v3403_v4  ;;  %v3515_v25 = vld [vmem:[%s10967_s13 + $0x3f0] sm:$0xff] }
 0x60c   :  { %4283 = vmatprep.subr.bf16.mxu0 %v7007_v30  ;;  %4324 = vmatprep.subr.bf16.mxu1 %v7009_v32  ;;  %v3516_v30 = vld [vmem:[%s10967_s13 + $0x3f8] sm:$0xff]  ;;  %v6958_v32 = vcombine.low %v3391_v13, %v3395_v14  ;;  %v7079_v37 = vcombine.high %v3511_v24, %v3515_v25  ;;  %v7078_v45 = vcombine.low %v3511_v24, %v3515_v25 }
 0x60d   :  { %v7081_v38 = vcombine.high %v3512_v28, %v3516_v30  ;;  %v7080_v46 = vcombine.low %v3512_v28, %v3516_v30 }
 0x60e   :  { %4284 = vmatpush1.bf16.msra.mxu0 %v7006_v39  ;;  %4325 = vmatpush1.bf16.msra.mxu1 %v7008_v40  ;;  %v3503_v39 = vld [vmem:[%s10967_s13 + $0x390] sm:$0xff] }
 0x60f   :  { %4285 = vmatprep.subr.bf16.mxu0 %v6999_v41  ;;  %4326 = vmatprep.subr.bf16.mxu1 %v7001_v44  ;;  %v3507_v40 = vld [vmem:[%s10967_s13 + $0x3b0] sm:$0xff]  ;;  %v3504_v41 = vld [vmem:[%s10967_s13 + $0x398] sm:$0xff] }
 0x610   :  { %v3508_v44 = vld [vmem:[%s10967_s13 + $0x3b8] sm:$0xff]  ;;  %v7071_v27 = vcombine.high %v3503_v39, %v3507_v40  ;;  %v7070_v49 = vcombine.low %v3503_v39, %v3507_v40 }
 0x611   :  { %v7073_v31 = vcombine.high %v3504_v41, %v3508_v44  ;;  %v7072_v50 = vcombine.low %v3504_v41, %v3508_v44 }
 0x612   :  { %4286 = vmatpush1.bf16.msra.mxu0 %v6998_v35  ;;  %4327 = vmatpush1.bf16.msra.mxu1 %v7000_v47  ;;  %v3495_v35 = vld [vmem:[%s10967_s13 + $0x350] sm:$0xff] }
 0x613   :  { %4287 = vmatprep.subr.bf16.mxu0 %v6991_v48  ;;  %4328 = vmatprep.subr.bf16.mxu1 %v6993_v16  ;;  %v3499_v47 = vld [vmem:[%s10967_s13 + $0x370] sm:$0xff]  ;;  %v3496_v48 = vld [vmem:[%s10967_s13 + $0x358] sm:$0xff] }
 0x614   :  { %v3500_v16 = vld [vmem:[%s10967_s13 + $0x378] sm:$0xff]  ;;  %v7063_v51 = vcombine.high %v3495_v35, %v3499_v47  ;;  %v7062_v57 = vcombine.low %v3495_v35, %v3499_v47  ;;  %v7638_v35 = vld [vmem:[%s10969_s15 + $0xe0] ss:$16 sps:$4 sm:$0xff]  }
 0x615   :  { %v7065_v52 = vcombine.high %v3496_v48, %v3500_v16  ;;  %v7064_v60 = vcombine.low %v3496_v48, %v3500_v16  ;;  %v7641_v47 = vld [vmem:[%s10969_s15 + $0x2e0] ss:$16 sps:$4 sm:$0xff]   ;;  %v7646_v48 = vld [vmem:[%s10969_s15 + $0xc4] ss:$16 sps:$4 sm:$0xff]  }
 0x616   :  { %4288 = vmatpush1.bf16.msra.mxu0 %v6990_v53  ;;  %4329 = vmatpush1.bf16.msra.mxu1 %v6992_v58  ;;  %v3487_v53 = vld [vmem:[%s10967_s13 + $0x310] sm:$0xff] }
 0x617   :  { %4289 = vmatprep.subr.bf16.mxu0 %v6983_v56  ;;  %4330 = vmatprep.subr.bf16.mxu1 %v6985_v59  ;;  %v3491_v58 = vld [vmem:[%s10967_s13 + $0x330] sm:$0xff]  ;;  %v3488_v56 = vld [vmem:[%s10967_s13 + $0x318] sm:$0xff] }
 0x618   :  { %v3492_v59 = vld [vmem:[%s10967_s13 + $0x338] sm:$0xff]  ;;  %v7055_v61 = vcombine.high %v3487_v53, %v3491_v58  ;;  %v7054_v3 = vcombine.low %v3487_v53, %v3491_v58  ;;  %v7649_v16 = vld [vmem:[%s10969_s15 + $0x2c4] ss:$16 sps:$4 sm:$0xff]   ;;  %v7653_v53 = vld [vmem:[%s10969_s15 + $0x2a0] ss:$16 sps:$4 sm:$0xff]  }
 0x619   :  { %v7057_v34 = vcombine.high %v3488_v56, %v3492_v59  ;;  %v7056_v4 = vcombine.low %v3488_v56, %v3492_v59  ;;  %v7658_v58 = vld [vmem:[%s10969_s15 + $0x84] ss:$16 sps:$4 sm:$0xff]   ;;  %v7656_v59 = vld [vmem:[%s10969_s15 + $0x80] ss:$16 sps:$4 sm:$0xff]  }
 0x61a   :  { %4290 = vmatpush1.bf16.msra.mxu0 %v6982_v62  ;;  %4331 = vmatpush1.bf16.msra.mxu1 %v6984_v63  ;;  %v3479_v62 = vld [vmem:[%s10967_s13 + $0x2d0] sm:$0xff] }
 0x61b   :  { %4291 = vmatprep.subr.bf16.mxu0 %v6975_v0  ;;  %4332 = vmatprep.subr.bf16.mxu1 %v6977_v1  ;;  %v3483_v63 = vld [vmem:[%s10967_s13 + $0x2f0] sm:$0xff]  ;;  %v3480_v0 = vld [vmem:[%s10967_s13 + $0x2d8] sm:$0xff] }
 0x61c   :  { %v3484_v1 = vld [vmem:[%s10967_s13 + $0x2f8] sm:$0xff]  ;;  %v7047_v5 = vcombine.high %v3479_v62, %v3483_v63  ;;  %v7046_v13 = vcombine.low %v3479_v62, %v3483_v63  ;;  %v7661_v56 = vld [vmem:[%s10969_s15 + $0x284] ss:$16 sps:$4 sm:$0xff]   ;;  %v7665_v62 = vld [vmem:[%s10969_s15 + $0x260] ss:$16 sps:$4 sm:$0xff]  }
 0x61d   :  { %v7049_v7 = vcombine.high %v3480_v0, %v3484_v1  ;;  %v7048_v14 = vcombine.low %v3480_v0, %v3484_v1  ;;  %v7670_v63 = vld [vmem:[%s10969_s15 + $0x44] ss:$16 sps:$4 sm:$0xff]   ;;  %v7668_v1 = vld [vmem:[%s10969_s15 + $0x40] ss:$16 sps:$4 sm:$0xff]  }
 0x61e   :  { %4292 = vmatpush1.bf16.msra.mxu0 %v6974_v8  ;;  %4333 = vmatpush1.bf16.msra.mxu1 %v6976_v9  ;;  %v3471_v8 = vld [vmem:[%s10967_s13 + $0x290] sm:$0xff] }
 0x61f   :  { %4293 = vmatprep.subr.bf16.mxu0 %v6967_v11  ;;  %4334 = vmatprep.subr.bf16.mxu1 %v6969_v12  ;;  %v3475_v9 = vld [vmem:[%s10967_s13 + $0x2b0] sm:$0xff]  ;;  %v3472_v11 = vld [vmem:[%s10967_s13 + $0x298] sm:$0xff] }
 0x620   :  { %v3476_v12 = vld [vmem:[%s10967_s13 + $0x2b8] sm:$0xff]  ;;  %v7039_v15 = vcombine.high %v3471_v8, %v3475_v9  ;;  %v7038_v24 = vcombine.low %v3471_v8, %v3475_v9  ;;  %v7673_v0 = vld [vmem:[%s10969_s15 + $0x244] ss:$16 sps:$4 sm:$0xff]   ;;  %v7677_v8 = vld [vmem:[%s10969_s15 + $0x220] ss:$16 sps:$4 sm:$0xff]  }
 0x621   :  { %v7041_v18 = vcombine.high %v3472_v11, %v3476_v12  ;;  %v7040_v25 = vcombine.low %v3472_v11, %v3476_v12  ;;  %v7682_v9 = vld [vmem:[%s10969_s15 + $0x4] ss:$16 sps:$4 sm:$0xff]   ;;  %v7680_v12 = vld [vmem:[%s10969_s15] ss:$16 sps:$4 sm:$0xff]  }
 0x622   :  { %4294 = vmatpush1.bf16.msra.mxu0 %v6966_v20  ;;  %4335 = vmatpush1.bf16.msra.mxu1 %v6968_v21  ;;  %v3463_v20 = vld [vmem:[%s10967_s13 + $0x250] sm:$0xff] }
 0x623   :  { %4295 = vmatprep.subr.bf16.mxu0 %v6959_v22  ;;  %4336 = vmatprep.subr.bf16.mxu1 %v6961_v23  ;;  %v3467_v21 = vld [vmem:[%s10967_s13 + $0x270] sm:$0xff]  ;;  %v3464_v22 = vld [vmem:[%s10967_s13 + $0x258] sm:$0xff] }
 0x624   :  { %v3468_v23 = vld [vmem:[%s10967_s13 + $0x278] sm:$0xff]  ;;  %v7031_v28 = vcombine.high %v3463_v20, %v3467_v21  ;;  %v7030_v39 = vcombine.low %v3463_v20, %v3467_v21  ;;  %v7685_v11 = vld [vmem:[%s10969_s15 + $0x204] ss:$16 sps:$4 sm:$0xff]   ;;  %v7689_v20 = vld [vmem:[%s10969_s15 + $0x3e0] ss:$16 sps:$4 sm:$0xff]  }
 0x625   :  { %v7033_v30 = vcombine.high %v3464_v22, %v3468_v23  ;;  %v7032_v40 = vcombine.low %v3464_v22, %v3468_v23  ;;  %v7694_v21 = vld [vmem:[%s10969_s15 + $0x1c4] ss:$16 sps:$4 sm:$0xff]   ;;  %v7692_v23 = vld [vmem:[%s10969_s15 + $0x1c0] ss:$16 sps:$4 sm:$0xff]  }
 0x626   :  { %4296 = vmatpush1.bf16.msra.mxu0 %v6958_v32  ;;  %4337 = vmatpush1.bf16.msra.mxu1 %v6960_v33  ;;  %v3455_v32 = vld [vmem:[%s10967_s13 + $0x210] sm:$0xff] }
 0x627   :  { %4297 = vmatprep.subr.bf16.mxu0 %v7079_v37  ;;  %4338 = vmatprep.subr.bf16.mxu1 %v7081_v38  ;;  %v3459_v33 = vld [vmem:[%s10967_s13 + $0x230] sm:$0xff]  ;;  %v3456_v37 = vld [vmem:[%s10967_s13 + $0x218] sm:$0xff] }
 0x628   :  { %v3460_v38 = vld [vmem:[%s10967_s13 + $0x238] sm:$0xff]  ;;  %v7023_v41 = vcombine.high %v3455_v32, %v3459_v33  ;;  %v7697_v22 = vld [vmem:[%s10969_s15 + $0x3c4] ss:$16 sps:$4 sm:$0xff]  }
 0x629   :  { %v7025_v44 = vcombine.high %v3456_v37, %v3460_v38 }
 0x62a   :  { %4298 = vmatpush2.bf16.msra.mxu0 %v7078_v45  ;;  %4339 = vmatpush2.bf16.msra.mxu1 %v7080_v46  ;;  %v7022_v45 = vcombine.low %v3455_v32, %v3459_v33  ;;  %v7024_v46 = vcombine.low %v3456_v37, %v3460_v38  ;;  %v7701_v32 = vld [vmem:[%s10969_s15 + $0x3a0] ss:$16 sps:$4 sm:$0xff]   ;;  %v7706_v33 = vld [vmem:[%s10969_s15 + $0x184] ss:$16 sps:$4 sm:$0xff]  }
 0x62b   :  { %4299 = vmatprep.subr.bf16.mxu0 %v7071_v27  ;;  %4340 = vmatprep.subr.bf16.mxu1 %v7073_v31  ;;  %v7640_v27 = vld [vmem:[%s10969_s15 + $0xe4] ss:$16 sps:$4 sm:$0xff]   ;;  %v7704_v38 = vld [vmem:[%s10969_s15 + $0x180] ss:$16 sps:$4 sm:$0xff]  }
 0x62c   :  { %v7643_v31 = vld [vmem:[%s10969_s15 + $0x2e4] ss:$16 sps:$4 sm:$0xff]  }
 0x62d   :  { %v7709_v37 = vld [vmem:[%s10969_s15 + $0x384] ss:$16 sps:$4 sm:$0xff]  }
 0x62e   :  { %4300 = vmatpush2.bf16.msra.mxu0 %v7070_v49  ;;  %4341 = vmatpush2.bf16.msra.mxu1 %v7072_v50  ;;  %v7644_v49 = vld [vmem:[%s10969_s15 + $0xc0] ss:$16 sps:$4 sm:$0xff]  }
 0x62f   :  { %4301 = vmatprep.subr.bf16.mxu0 %v7063_v51  ;;  %4342 = vmatprep.subr.bf16.mxu1 %v7065_v52  ;;  %v7647_v50 = vld [vmem:[%s10969_s15 + $0x2c0] ss:$16 sps:$4 sm:$0xff]   ;;  %v7652_v51 = vld [vmem:[%s10969_s15 + $0xa4] ss:$16 sps:$4 sm:$0xff]  }
 0x630   :  { %v7650_v52 = vld [vmem:[%s10969_s15 + $0xa0] ss:$16 sps:$4 sm:$0xff]  }
 0x632   :  { %4302 = vmatpush2.bf16.msra.mxu0 %v7062_v57  ;;  %4343 = vmatpush2.bf16.msra.mxu1 %v7064_v60  ;;  %v7659_v57 = vld [vmem:[%s10969_s15 + $0x280] ss:$16 sps:$4 sm:$0xff]   ;;  %v7664_v60 = vld [vmem:[%s10969_s15 + $0x64] ss:$16 sps:$4 sm:$0xff]  }
 0x633   :  { %4303 = vmatprep.subr.bf16.mxu0 %v7055_v61  ;;  %4344 = vmatprep.subr.bf16.mxu1 %v7057_v34  ;;  %v7667_v61 = vld [vmem:[%s10969_s15 + $0x264] ss:$16 sps:$4 sm:$0xff]   ;;  %v7662_v34 = vld [vmem:[%s10969_s15 + $0x60] ss:$16 sps:$4 sm:$0xff]  }
 0x636   :  { %4304 = vmatpush2.bf16.msra.mxu0 %v7054_v3  ;;  %4345 = vmatpush2.bf16.msra.mxu1 %v7056_v4  ;;  %v7671_v3 = vld [vmem:[%s10969_s15 + $0x240] ss:$16 sps:$4 sm:$0xff]   ;;  %v7676_v4 = vld [vmem:[%s10969_s15 + $0x24] ss:$16 sps:$4 sm:$0xff]  }
 0x637   :  { %4305 = vmatprep.subr.bf16.mxu0 %v7047_v5  ;;  %4346 = vmatprep.subr.bf16.mxu1 %v7049_v7  ;;  %v7679_v5 = vld [vmem:[%s10969_s15 + $0x224] ss:$16 sps:$4 sm:$0xff]   ;;  %v7674_v7 = vld [vmem:[%s10969_s15 + $0x20] ss:$16 sps:$4 sm:$0xff]  }
 0x63a   :  { %4306 = vmatpush2.bf16.msra.mxu0 %v7046_v13  ;;  %4347 = vmatpush2.bf16.msra.mxu1 %v7048_v14  ;;  %v7683_v13 = vld [vmem:[%s10969_s15 + $0x200] ss:$16 sps:$4 sm:$0xff]   ;;  %v7688_v14 = vld [vmem:[%s10969_s15 + $0x1e4] ss:$16 sps:$4 sm:$0xff]  }
 0x63b   :  { %4307 = vmatprep.subr.bf16.mxu0 %v7039_v15  ;;  %4348 = vmatprep.subr.bf16.mxu1 %v7041_v18  ;;  %v7691_v15 = vld [vmem:[%s10969_s15 + $0x3e4] ss:$16 sps:$4 sm:$0xff]   ;;  %v7686_v18 = vld [vmem:[%s10969_s15 + $0x1e0] ss:$16 sps:$4 sm:$0xff]  }
 0x63e   :  { %4308 = vmatpush2.bf16.msra.mxu0 %v7038_v24  ;;  %4349 = vmatpush2.bf16.msra.mxu1 %v7040_v25  ;;  %v7695_v24 = vld [vmem:[%s10969_s15 + $0x3c0] ss:$16 sps:$4 sm:$0xff]   ;;  %v7700_v25 = vld [vmem:[%s10969_s15 + $0x1a4] ss:$16 sps:$4 sm:$0xff]  }
 0x63f   :  { %4309 = vmatprep.subr.bf16.mxu0 %v7031_v28  ;;  %4350 = vmatprep.subr.bf16.mxu1 %v7033_v30  ;;  %v7703_v28 = vld [vmem:[%s10969_s15 + $0x3a4] ss:$16 sps:$4 sm:$0xff]   ;;  %v7698_v30 = vld [vmem:[%s10969_s15 + $0x1a0] ss:$16 sps:$4 sm:$0xff]  }
 0x642   :  { %4310 = vmatpush2.bf16.msra.mxu0 %v7030_v39  ;;  %4351 = vmatpush2.bf16.msra.mxu1 %v7032_v40  ;;  %v7707_v39 = vld [vmem:[%s10969_s15 + $0x380] ss:$16 sps:$4 sm:$0xff]   ;;  %v7712_v40 = vld [vmem:[%s10969_s15 + $0x164] ss:$16 sps:$4 sm:$0xff]  }
 0x643   :  { %4311 = vmatprep.subr.bf16.mxu0 %v7023_v41  ;;  %4352 = vmatprep.subr.bf16.mxu1 %v7025_v44  ;;  %v7715_v41 = vld [vmem:[%s10969_s15 + $0x364] ss:$16 sps:$4 sm:$0xff]   ;;  %v7710_v44 = vld [vmem:[%s10969_s15 + $0x160] ss:$16 sps:$4 sm:$0xff]  }
 0x646   :  { %4312 = vmatpush2.bf16.msra.mxu0 %v7022_v45  ;;  %4353 = vmatpush2.bf16.msra.mxu1 %v7024_v46  ;;  %v7713_v45 = vld [vmem:[%s10969_s15 + $0x360] ss:$16 sps:$4 sm:$0xff]   ;;  %v7718_v46 = vld [vmem:[%s10969_s15 + $0x144] ss:$16 sps:$4 sm:$0xff]  }
 0x647   :  { %5937 = vmatprep.subr.bf16.mxu0 %v7640_v27  ;;  %5978 = vmatprep.subr.bf16.mxu1 %v7643_v31  ;;  %v7721_v27 = vld [vmem:[%s10969_s15 + $0x344] ss:$16 sps:$4 sm:$0xff]   ;;  %v7716_v31 = vld [vmem:[%s10969_s15 + $0x140] ss:$16 sps:$4 sm:$0xff]  }
 0x649   :  { %4314 = vmatmul.mubr.bf16.vlgmr.msra.gmra.mxu0 %v9878_v26  ;;  %4355 = vmatmul.mubr.bf16.vlgmr.msra.gmra.mxu1 %v9878_v26  ;;  %v7655_v26 = vld [vmem:[%s10969_s15 + $0x2a4] ss:$16 sps:$4 sm:$0xff]  }
 0x64a   :  { %5938 = vmatpush1.bf16.msra.mxu0 %v7638_v35  ;;  %5979 = vmatpush1.bf16.msra.mxu1 %v7641_v47  ;;  %v7719_v35 = vld [vmem:[%s10969_s15 + $0x340] ss:$16 sps:$4 sm:$0xff]   ;;  %v7724_v47 = vld [vmem:[%s10969_s15 + $0x124] ss:$16 sps:$4 sm:$0xff]  }
 0x64b   :  { %5939 = vmatprep.subr.bf16.mxu0 %v7646_v48  ;;  %5980 = vmatprep.subr.bf16.mxu1 %v7649_v16  ;;  %v7727_v48 = vld [vmem:[%s10969_s15 + $0x324] ss:$16 sps:$4 sm:$0xff]   ;;  %v7722_v16 = vld [vmem:[%s10969_s15 + $0x120] ss:$16 sps:$4 sm:$0xff]  }
 0x64e   :  { %5940 = vmatpush1.bf16.msra.mxu0 %v7644_v49  ;;  %5981 = vmatpush1.bf16.msra.mxu1 %v7647_v50  ;;  %v7725_v49 = vld [vmem:[%s10969_s15 + $0x320] ss:$16 sps:$4 sm:$0xff]   ;;  %v7730_v50 = vld [vmem:[%s10969_s15 + $0x104] ss:$16 sps:$4 sm:$0xff]  }
 0x64f   :  { %5941 = vmatprep.subr.bf16.mxu0 %v7652_v51  ;;  %5982 = vmatprep.subr.bf16.mxu1 %v7655_v26  ;;  %v7733_v51 = vld [vmem:[%s10969_s15 + $0x304] ss:$16 sps:$4 sm:$0xff]   ;;  %v7728_v26 = vld [vmem:[%s10969_s15 + $0x100] ss:$16 sps:$4 sm:$0xff]  }
 0x652   :  { %5942 = vmatpush1.bf16.msra.mxu0 %v7650_v52  ;;  %5983 = vmatpush1.bf16.msra.mxu1 %v7653_v53  ;;  %v7731_v52 = vld [vmem:[%s10969_s15 + $0x300] ss:$16 sps:$4 sm:$0xff]   ;;  %v7736_v53 = vld [vmem:[%s10969_s15 + $0x4e4] ss:$16 sps:$4 sm:$0xff]  }
 0x653   :  { %5943 = vmatprep.subr.bf16.mxu0 %v7658_v58  ;;  %5984 = vmatprep.subr.bf16.mxu1 %v7661_v56  ;;  %v7739_v58 = vld [vmem:[%s10969_s15 + $0x6e4] ss:$16 sps:$4 sm:$0xff]  }
 0x654   :  { %v10253_v56 = vld [vmem:[%s10968_s14] sm:$0xff] }
 0x656   :  { %5944 = vmatpush1.bf16.msra.mxu0 %v7656_v59  ;;  %5985 = vmatpush1.bf16.msra.mxu1 %v7659_v57  ;;  %v3522_v59 = vrot.slane %v10253_v56, %v9217_v17  ;;  %v3530_v57 = vrot.slane %v10253_v56, %v9308_v19 }
 0x657   :  { %5945 = vmatprep.subr.bf16.mxu0 %v7664_v60  ;;  %5986 = vmatprep.subr.bf16.mxu1 %v7667_v61  ;;  %v3526_v60 = vrot.slane %v10253_v56, %v9110_v36  ;;  %v3534_v61 = vrot.slane %v10253_v56, %v9317_v55 }
 0x65a   :  { %5946 = vmatpush1.bf16.msra.mxu0 %v7662_v34  ;;  %5987 = vmatpush1.bf16.msra.mxu1 %v7665_v62 }
 0x65b   :  { %5947 = vmatprep.subr.bf16.mxu0 %v7670_v63  ;;  %5988 = vmatprep.subr.bf16.mxu1 %v7673_v0 }
 0x65e   :  { %5948 = vmatpush1.bf16.msra.mxu0 %v7668_v1  ;;  %5989 = vmatpush1.bf16.msra.mxu1 %v7671_v3 }
 0x65f   :  { %5949 = vmatprep.subr.bf16.mxu0 %v7676_v4  ;;  %5990 = vmatprep.subr.bf16.mxu1 %v7679_v5 }
 0x662   :  { %5950 = vmatpush1.bf16.msra.mxu0 %v7674_v7  ;;  %5991 = vmatpush1.bf16.msra.mxu1 %v7677_v8 }
 0x663   :  { %5951 = vmatprep.subr.bf16.mxu0 %v7682_v9  ;;  %5992 = vmatprep.subr.bf16.mxu1 %v7685_v11 }
 0x666   :  { %5952 = vmatpush1.bf16.msra.mxu0 %v7680_v12  ;;  %5993 = vmatpush1.bf16.msra.mxu1 %v7683_v13 }
 0x667   :  { %5953 = vmatprep.subr.bf16.mxu0 %v7688_v14  ;;  %5994 = vmatprep.subr.bf16.mxu1 %v7691_v15 }
 0x66a   :  { %5954 = vmatpush2.bf16.msra.mxu0 %v7686_v18  ;;  %5995 = vmatpush2.bf16.msra.mxu1 %v7689_v20  ;;  %v7734_v20 = vld [vmem:[%s10969_s15 + $0x4e0] ss:$16 sps:$4 sm:$0xff]  }
 0x66b   :  { %5955 = vmatprep.subr.bf16.mxu0 %v7694_v21  ;;  %5996 = vmatprep.subr.bf16.mxu1 %v7697_v22 }
 0x66e   :  { %5956 = vmatpush2.bf16.msra.mxu0 %v7692_v23  ;;  %5997 = vmatpush2.bf16.msra.mxu1 %v7695_v24  ;;  %v7737_v23 = vld [vmem:[%s10969_s15 + $0x6e0] ss:$16 sps:$4 sm:$0xff]   ;;  %v7742_v24 = vld [vmem:[%s10969_s15 + $0x4c4] ss:$16 sps:$4 sm:$0xff]  }
 0x66f   :  { %5957 = vmatprep.subr.bf16.mxu0 %v7700_v25  ;;  %5998 = vmatprep.subr.bf16.mxu1 %v7703_v28  ;;  %v7745_v28 = vld [vmem:[%s10969_s15 + $0x6c4] ss:$16 sps:$4 sm:$0xff]  }
 0x672   :  { %5958 = vmatpush2.bf16.msra.mxu0 %v7698_v30  ;;  %5999 = vmatpush2.bf16.msra.mxu1 %v7701_v32  ;;  %v7740_v30 = vld [vmem:[%s10969_s15 + $0x4c0] ss:$16 sps:$4 sm:$0xff]  }
 0x673   :  { %5959 = vmatprep.subr.bf16.mxu0 %v7706_v33  ;;  %6000 = vmatprep.subr.bf16.mxu1 %v7709_v37  ;;  %v7743_v32 = vld [vmem:[%s10969_s15 + $0x6c0] ss:$16 sps:$4 sm:$0xff]   ;;  %v7748_v33 = vld [vmem:[%s10969_s15 + $0x4a4] ss:$16 sps:$4 sm:$0xff]  }
 0x674   :  { %v7751_v37 = vld [vmem:[%s10969_s15 + $0x6a4] ss:$16 sps:$4 sm:$0xff]  }
 0x676   :  { %5960 = vmatpush2.bf16.msra.mxu0 %v7704_v38  ;;  %6001 = vmatpush2.bf16.msra.mxu1 %v7707_v39  ;;  %v7746_v38 = vld [vmem:[%s10969_s15 + $0x4a0] ss:$16 sps:$4 sm:$0xff]  }
 0x677   :  { %5961 = vmatprep.subr.bf16.mxu0 %v7712_v40  ;;  %6002 = vmatprep.subr.bf16.mxu1 %v7715_v41  ;;  %v7749_v39 = vld [vmem:[%s10969_s15 + $0x6a0] ss:$16 sps:$4 sm:$0xff]   ;;  %v7754_v40 = vld [vmem:[%s10969_s15 + $0x484] ss:$16 sps:$4 sm:$0xff]  }
 0x678   :  { %v7757_v41 = vld [vmem:[%s10969_s15 + $0x684] ss:$16 sps:$4 sm:$0xff]  }
 0x67a   :  { %5962 = vmatpush2.bf16.msra.mxu0 %v7710_v44  ;;  %6003 = vmatpush2.bf16.msra.mxu1 %v7713_v45  ;;  %v7752_v44 = vld [vmem:[%s10969_s15 + $0x480] ss:$16 sps:$4 sm:$0xff]  }
 0x67b   :  { %5963 = vmatprep.subr.bf16.mxu0 %v7718_v46  ;;  %6004 = vmatprep.subr.bf16.mxu1 %v7721_v27  ;;  %v7755_v45 = vld [vmem:[%s10969_s15 + $0x680] ss:$16 sps:$4 sm:$0xff]   ;;  %v7760_v46 = vld [vmem:[%s10969_s15 + $0x464] ss:$16 sps:$4 sm:$0xff]  }
 0x67c   :  { %v7763_v27 = vld [vmem:[%s10969_s15 + $0x664] ss:$16 sps:$4 sm:$0xff]  }
 0x67e   :  { %5964 = vmatpush2.bf16.msra.mxu0 %v7716_v31  ;;  %6005 = vmatpush2.bf16.msra.mxu1 %v7719_v35  ;;  %v7758_v31 = vld [vmem:[%s10969_s15 + $0x460] ss:$16 sps:$4 sm:$0xff]  }
 0x67f   :  { %5965 = vmatprep.subr.bf16.mxu0 %v7724_v47  ;;  %6006 = vmatprep.subr.bf16.mxu1 %v7727_v48  ;;  %v7761_v35 = vld [vmem:[%s10969_s15 + $0x660] ss:$16 sps:$4 sm:$0xff]   ;;  %v7766_v47 = vld [vmem:[%s10969_s15 + $0x444] ss:$16 sps:$4 sm:$0xff]  }
 0x680   :  { %v7769_v48 = vld [vmem:[%s10969_s15 + $0x644] ss:$16 sps:$4 sm:$0xff]  }
 0x682   :  { %5966 = vmatpush2.bf16.msra.mxu0 %v7722_v16  ;;  %6007 = vmatpush2.bf16.msra.mxu1 %v7725_v49  ;;  %v7764_v16 = vld [vmem:[%s10969_s15 + $0x440] ss:$16 sps:$4 sm:$0xff]  }
 0x683   :  { %5967 = vmatprep.subr.bf16.mxu0 %v7730_v50  ;;  %6008 = vmatprep.subr.bf16.mxu1 %v7733_v51  ;;  %v7767_v49 = vld [vmem:[%s10969_s15 + $0x640] ss:$16 sps:$4 sm:$0xff]   ;;  %v7772_v50 = vld [vmem:[%s10969_s15 + $0x424] ss:$16 sps:$4 sm:$0xff]  }
 0x684   :  { %v7775_v51 = vld [vmem:[%s10969_s15 + $0x624] ss:$16 sps:$4 sm:$0xff]  }
 0x686   :  { %5968 = vmatpush2.bf16.msra.mxu0 %v7728_v26  ;;  %6009 = vmatpush2.bf16.msra.mxu1 %v7731_v52  ;;  %v7770_v26 = vld [vmem:[%s10969_s15 + $0x420] ss:$16 sps:$4 sm:$0xff]  }
 0x687   :  { %6019 = vmatprep.subr.bf16.mxu0 %v7736_v53  ;;  %6060 = vmatprep.subr.bf16.mxu1 %v7739_v58  ;;  %v7773_v52 = vld [vmem:[%s10969_s15 + $0x620] ss:$16 sps:$4 sm:$0xff]   ;;  %v7778_v53 = vld [vmem:[%s10969_s15 + $0x404] ss:$16 sps:$4 sm:$0xff]  }
 0x688   :  { %v7781_v58 = vld [vmem:[%s10969_s15 + $0x604] ss:$16 sps:$4 sm:$0xff]  }
 0x6c9   :  { %v4233_v34 = vpop.f32.mrf.mxu0  ;;  %v4274_v62 = vpop.f32.mrf.mxu1 }
 0x6ca   :  { %v4234_v63 = vadd.f32 %v4233_v34, %v3522_v59  ;;  %v4275_v0 = vadd.f32 %v4274_v62, %v3530_v57  ;;  %v7776_v59 = vld [vmem:[%s10969_s15 + $0x400] ss:$16 sps:$4 sm:$0xff]  }
 0x6cb   :  { %v4235_v1 = vpop.f32.mrf.mxu0  ;;  %v4276_v3 = vpop.f32.mrf.mxu1  ;;  %v7779_v57 = vld [vmem:[%s10969_s15 + $0x600] ss:$16 sps:$4 sm:$0xff]  }
 0x6cc   :  { %8052 = vtanh.f32 %v4234_v63  ;;  %v4236_v4 = vadd.f32 %v4235_v1, %v3526_v60  ;;  %v4277_v5 = vadd.f32 %v4276_v3, %v3534_v61  ;;  %v7784_v60 = vld [vmem:[%s10969_s15 + $0x5e4] ss:$16 sps:$4 sm:$0xff]   ;;  %v7782_v34 = vld [vmem:[%s10969_s15 + $0x5e0] ss:$16 sps:$4 sm:$0xff]  }
 0x6cd   :  { %8054 = vtanh.f32 %v4275_v0  ;;  %v4237_v7 = vpop.f32.mrf.mxu0  ;;  %v4278_v8 = vpop.f32.mrf.mxu1  ;;  %v7787_v61 = vld [vmem:[%s10969_s15 + $0x7e4] ss:$16 sps:$4 sm:$0xff]   ;;  %v7785_v62 = vld [vmem:[%s10969_s15 + $0x7e0] ss:$16 sps:$4 sm:$0xff]  }
 0x6ce   :  { %8056 = vtanh.f32 %v4236_v4  ;;  %v7790_v63 = vld [vmem:[%s10969_s15 + $0x5c4] ss:$16 sps:$4 sm:$0xff]   ;;  %v7788_v1 = vld [vmem:[%s10969_s15 + $0x5c0] ss:$16 sps:$4 sm:$0xff]  }
 0x6cf   :  { %8058 = vtanh.f32 %v4277_v5  ;;  %v4238_v9 = vpop.f32.mrf.mxu0  ;;  %v4279_v11 = vpop.f32.mrf.mxu1  ;;  %v7793_v0 = vld [vmem:[%s10969_s15 + $0x7c4] ss:$16 sps:$4 sm:$0xff]   ;;  %v7791_v3 = vld [vmem:[%s10969_s15 + $0x7c0] ss:$16 sps:$4 sm:$0xff]  }
 0x6d0   :  { %v7796_v4 = vld [vmem:[%s10969_s15 + $0x5a4] ss:$16 sps:$4 sm:$0xff]   ;;  %v7794_v7 = vld [vmem:[%s10969_s15 + $0x5a0] ss:$16 sps:$4 sm:$0xff]   ;;  %v3538_v11 = vrot.slane %v10253_v56, %v365_v2 }
 0x6d1   :  { %v7799_v5 = vld [vmem:[%s10969_s15 + $0x7a4] ss:$16 sps:$4 sm:$0xff]   ;;  %v7797_v8 = vld [vmem:[%s10969_s15 + $0x7a0] ss:$16 sps:$4 sm:$0xff]  }
 0x6d2   :  { %v7802_v9 = vld [vmem:[%s10969_s15 + $0x584] ss:$16 sps:$4 sm:$0xff]   ;;  %v7800_v2 = vld [vmem:[%s10969_s15 + $0x580] ss:$16 sps:$4 sm:$0xff]  }
 0x6d9   :  { %v8053_v12 = vpop.eup %8052 }
 0x6da   :  { %v8055_v13 = vpop.eup %8054  ;;  %v10268_v21 = vpack.c.bf16 %v8053_v12, %v8053_v12  ;;  %v3546_v12 = vrot.slane %v10253_v56, %v373_v42 }
 0x6db   :  { %v8057_v14 = vpop.eup %8056  ;;  %v10278_v25 = vpack.c.bf16 %v8055_v13, %v8055_v13  ;;  %v7805_v13 = vld [vmem:[%s10969_s15 + $0x784] ss:$16 sps:$4 sm:$0xff]  }
 0x6dc   :  { %v8059_v15 = vpop.eup %8058  ;;  %v10263_v18 = vpack.c.bf16 %v8057_v14, %v8057_v14  ;;  %v3542_v14 = vrot.slane %v10253_v56, %v369_v6  ;;  %v7808_v6 = vld [vmem:[%s10969_s15 + $0x564] ss:$16 sps:$4 sm:$0xff]  }
 0x6dd   :  { %v10270_v22 = vpack.c.bf16 %v8059_v15, %v8059_v15  ;;  %v3550_v15 = vrot.slane %v10253_v56, %v377_v43  ;;  %v7811_v43 = vld [vmem:[%s10969_s15 + $0x764] ss:$16 sps:$4 sm:$0xff]  }
 0x6de   :  { %5969 = vmatprep.mubr.bf16.mxu0 %v10263_v18 }
 0x6df   :  { %6010 = vmatprep.mubr.bf16.mxu1 %v10270_v22  ;;  %5970 = vmatmul.mubr.bf16.vlgmr.msra.gmra.mxu0 %v10268_v21 }
 0x6e0   :  { %6011 = vmatmul.mubr.bf16.vlgmr.msra.gmra.mxu1 %v10278_v25  ;;  %6020 = vmatpush1.bf16.msra.mxu0 %v7734_v20 }
 0x6e1   :  { %6061 = vmatpush1.bf16.msra.mxu1 %v7737_v23  ;;  %6021 = vmatprep.subr.bf16.mxu0 %v7742_v24  ;;  %v7803_v23 = vld [vmem:[%s10969_s15 + $0x780] ss:$16 sps:$4 sm:$0xff]  }
 0x6e2   :  { %6062 = vmatprep.subr.bf16.mxu1 %v7745_v28 }
 0x6e4   :  { %6022 = vmatpush1.bf16.msra.mxu0 %v7740_v30 }
 0x6e5   :  { %6063 = vmatpush1.bf16.msra.mxu1 %v7743_v32  ;;  %6023 = vmatprep.subr.bf16.mxu0 %v7748_v33  ;;  %v7806_v33 = vld [vmem:[%s10969_s15 + $0x560] ss:$16 sps:$4 sm:$0xff]  }
 0x6e6   :  { %6064 = vmatprep.subr.bf16.mxu1 %v7751_v37 }
 0x6e8   :  { %6024 = vmatpush1.bf16.msra.mxu0 %v7746_v38 }
 0x6e9   :  { %6065 = vmatpush1.bf16.msra.mxu1 %v7749_v39  ;;  %6025 = vmatprep.subr.bf16.mxu0 %v7754_v40  ;;  %v7809_v39 = vld [vmem:[%s10969_s15 + $0x760] ss:$16 sps:$4 sm:$0xff]   ;;  %v7814_v40 = vld [vmem:[%s10969_s15 + $0x544] ss:$16 sps:$4 sm:$0xff]  }
 0x6ea   :  { %6066 = vmatprep.subr.bf16.mxu1 %v7757_v41  ;;  %v7817_v41 = vld [vmem:[%s10969_s15 + $0x744] ss:$16 sps:$4 sm:$0xff]  }
 0x6ec   :  { %6026 = vmatpush1.bf16.msra.mxu0 %v7752_v44 }
 0x6ed   :  { %6067 = vmatpush1.bf16.msra.mxu1 %v7755_v45  ;;  %6027 = vmatprep.subr.bf16.mxu0 %v7760_v46  ;;  %v7812_v46 = vld [vmem:[%s10969_s15 + $0x540] ss:$16 sps:$4 sm:$0xff]  }
 0x6ee   :  { %6068 = vmatprep.subr.bf16.mxu1 %v7763_v27  ;;  %v7815_v27 = vld [vmem:[%s10969_s15 + $0x740] ss:$16 sps:$4 sm:$0xff]  }
 0x6f0   :  { %6028 = vmatpush1.bf16.msra.mxu0 %v7758_v31  ;;  %v7820_v31 = vld [vmem:[%s10969_s15 + $0x524] ss:$16 sps:$4 sm:$0xff]  }
 0x6f1   :  { %6069 = vmatpush1.bf16.msra.mxu1 %v7761_v35  ;;  %6029 = vmatprep.subr.bf16.mxu0 %v7766_v47  ;;  %v7823_v35 = vld [vmem:[%s10969_s15 + $0x724] ss:$16 sps:$4 sm:$0xff]   ;;  %v7818_v47 = vld [vmem:[%s10969_s15 + $0x520] ss:$16 sps:$4 sm:$0xff]  }
 0x6f2   :  { %6070 = vmatprep.subr.bf16.mxu1 %v7769_v48  ;;  %v7821_v48 = vld [vmem:[%s10969_s15 + $0x720] ss:$16 sps:$4 sm:$0xff]  }
 0x6f4   :  { %6030 = vmatpush1.bf16.msra.mxu0 %v7764_v16  ;;  %v7826_v16 = vld [vmem:[%s10969_s15 + $0x504] ss:$16 sps:$4 sm:$0xff]  }
 0x6f5   :  { %6071 = vmatpush1.bf16.msra.mxu1 %v7767_v49  ;;  %6031 = vmatprep.subr.bf16.mxu0 %v7772_v50  ;;  %v7829_v49 = vld [vmem:[%s10969_s15 + $0x704] ss:$16 sps:$4 sm:$0xff]   ;;  %v7824_v50 = vld [vmem:[%s10969_s15 + $0x500] ss:$16 sps:$4 sm:$0xff]  }
 0x6f6   :  { %6072 = vmatprep.subr.bf16.mxu1 %v7775_v51 }
 0x6f8   :  { %6032 = vmatpush1.bf16.msra.mxu0 %v7770_v26  ;;  %v7827_v26 = vld [vmem:[%s10969_s15 + $0x700] ss:$16 sps:$4 sm:$0xff]  }
 0x6f9   :  { %6073 = vmatpush1.bf16.msra.mxu1 %v7773_v52  ;;  %6033 = vmatprep.subr.bf16.mxu0 %v7778_v53  ;;  %v7832_v52 = vld [vmem:[%s10969_s15 + $0xec] ss:$16 sps:$4 sm:$0xff]  }
 0x6fa   :  { %6074 = vmatprep.subr.bf16.mxu1 %v7781_v58  ;;  %v7835_v58 = vld [vmem:[%s10969_s15 + $0x2ec] ss:$16 sps:$4 sm:$0xff]  }
 0x6fc   :  { %6034 = vmatpush1.bf16.msra.mxu0 %v7776_v59 }
 0x6fd   :  { %6075 = vmatpush1.bf16.msra.mxu1 %v7779_v57  ;;  %6035 = vmatprep.subr.bf16.mxu0 %v7784_v60 }
 0x6fe   :  { %6076 = vmatprep.subr.bf16.mxu1 %v7787_v61  ;;  %v7830_v61 = vld [vmem:[%s10969_s15 + $0xe8] ss:$16 sps:$4 sm:$0xff]  }
 0x700   :  { %6036 = vmatpush2.bf16.msra.mxu0 %v7782_v34 }
 0x701   :  { %6077 = vmatpush2.bf16.msra.mxu1 %v7785_v62  ;;  %6037 = vmatprep.subr.bf16.mxu0 %v7790_v63  ;;  %v7833_v63 = vld [vmem:[%s10969_s15 + $0x2e8] ss:$16 sps:$4 sm:$0xff]  }
 0x702   :  { %6078 = vmatprep.subr.bf16.mxu1 %v7793_v0 }
 0x704   :  { %6038 = vmatpush2.bf16.msra.mxu0 %v7788_v1  ;;  %v7838_v1 = vld [vmem:[%s10969_s15 + $0xcc] ss:$16 sps:$4 sm:$0xff]  }
 0x705   :  { %6079 = vmatpush2.bf16.msra.mxu1 %v7791_v3  ;;  %6039 = vmatprep.subr.bf16.mxu0 %v7796_v4  ;;  %v7841_v3 = vld [vmem:[%s10969_s15 + $0x2cc] ss:$16 sps:$4 sm:$0xff]   ;;  %v7836_v4 = vld [vmem:[%s10969_s15 + $0xc8] ss:$16 sps:$4 sm:$0xff]  }
 0x706   :  { %6080 = vmatprep.subr.bf16.mxu1 %v7799_v5  ;;  %v7839_v5 = vld [vmem:[%s10969_s15 + $0x2c8] ss:$16 sps:$4 sm:$0xff]  }
 0x708   :  { %6040 = vmatpush2.bf16.msra.mxu0 %v7794_v7  ;;  %v7844_v7 = vld [vmem:[%s10969_s15 + $0xac] ss:$16 sps:$4 sm:$0xff]  }
 0x709   :  { %6081 = vmatpush2.bf16.msra.mxu1 %v7797_v8  ;;  %v4315_v20 = vpop.f32.mrf.mxu0  ;;  %v4356_v42 = vpop.f32.mrf.mxu1  ;;  %6041 = vmatprep.subr.bf16.mxu0 %v7802_v9  ;;  %v7847_v8 = vld [vmem:[%s10969_s15 + $0x2ac] ss:$16 sps:$4 sm:$0xff]   ;;  %v7845_v9 = vld [vmem:[%s10969_s15 + $0x2a8] ss:$16 sps:$4 sm:$0xff]  }
 0x70a   :  { %v4316_v24 = vadd.f32 %v4315_v20, %v3538_v11  ;;  %v4357_v29 = vadd.f32 %v4356_v42, %v3546_v12  ;;  %6082 = vmatprep.subr.bf16.mxu1 %v7805_v13  ;;  %v7853_v11 = vld [vmem:[%s10969_s15 + $0x28c] ss:$16 sps:$4 sm:$0xff]   ;;  %v7848_v12 = vld [vmem:[%s10969_s15 + $0x88] ss:$16 sps:$4 sm:$0xff]  }
 0x70b   :  { %v4317_v56 = vpop.f32.mrf.mxu0  ;;  %v4358_v28 = vpop.f32.mrf.mxu1  ;;  %v7851_v13 = vld [vmem:[%s10969_s15 + $0x288] ss:$16 sps:$4 sm:$0xff]   ;;  %v7862_v42 = vld [vmem:[%s10969_s15 + $0x4c] ss:$16 sps:$4 sm:$0xff]  }
 0x70c   :  { %8060 = vtanh.f32 %v4316_v24  ;;  %v4318_v30 = vadd.f32 %v4317_v56, %v3542_v14  ;;  %v4359_v32 = vadd.f32 %v4358_v28, %v3550_v15  ;;  %6042 = vmatpush2.bf16.msra.mxu0 %v7800_v2  ;;  %v7856_v14 = vld [vmem:[%s10969_s15 + $0x6c] ss:$16 sps:$4 sm:$0xff]   ;;  %v7854_v2 = vld [vmem:[%s10969_s15 + $0x68] ss:$16 sps:$4 sm:$0xff]  }
 0x70d   :  { %8062 = vtanh.f32 %v4357_v29  ;;  %6083 = vmatpush2.bf16.msra.mxu1 %v7803_v23  ;;  %v4319_v37 = vpop.f32.mrf.mxu0  ;;  %v4360_v38 = vpop.f32.mrf.mxu1  ;;  %6043 = vmatprep.subr.bf16.mxu0 %v7808_v6  ;;  %v7859_v15 = vld [vmem:[%s10969_s15 + $0x26c] ss:$16 sps:$4 sm:$0xff]   ;;  %v7857_v20 = vld [vmem:[%s10969_s15 + $0x268] ss:$16 sps:$4 sm:$0xff]  }
 0x70e   :  { %8064 = vtanh.f32 %v4318_v30  ;;  %6084 = vmatprep.subr.bf16.mxu1 %v7811_v43  ;;  %v7865_v23 = vld [vmem:[%s10969_s15 + $0x24c] ss:$16 sps:$4 sm:$0xff]   ;;  %v7860_v6 = vld [vmem:[%s10969_s15 + $0x48] ss:$16 sps:$4 sm:$0xff]  }
 0x70f   :  { %8066 = vtanh.f32 %v4359_v32  ;;  %v4320_v44 = vpop.f32.mrf.mxu0  ;;  %v4361_v45 = vpop.f32.mrf.mxu1  ;;  %v7863_v24 = vld [vmem:[%s10969_s15 + $0x248] ss:$16 sps:$4 sm:$0xff]   ;;  %v7868_v29 = vld [vmem:[%s10969_s15 + $0x2c] ss:$16 sps:$4 sm:$0xff]  }
 0x710   :  { %6044 = vmatpush2.bf16.msra.mxu0 %v7806_v33  ;;  %v7871_v43 = vld [vmem:[%s10969_s15 + $0x22c] ss:$16 sps:$4 sm:$0xff]   ;;  %v7866_v56 = vld [vmem:[%s10969_s15 + $0x28] ss:$16 sps:$4 sm:$0xff]  }
 0x711   :  { %6085 = vmatpush2.bf16.msra.mxu1 %v7809_v39  ;;  %6045 = vmatprep.subr.bf16.mxu0 %v7814_v40  ;;  %v7869_v28 = vld [vmem:[%s10969_s15 + $0x228] ss:$16 sps:$4 sm:$0xff]   ;;  %v7874_v30 = vld [vmem:[%s10969_s15 + $0xc] ss:$16 sps:$4 sm:$0xff]  }
 0x712   :  { %6086 = vmatprep.subr.bf16.mxu1 %v7817_v41  ;;  %v7877_v32 = vld [vmem:[%s10969_s15 + $0x20c] ss:$16 sps:$4 sm:$0xff]   ;;  %v7872_v33 = vld [vmem:[%s10969_s15 + $0x8] ss:$16 sps:$4 sm:$0xff]  }
 0x713   :  { %v7875_v37 = vld [vmem:[%s10969_s15 + $0x208] ss:$16 sps:$4 sm:$0xff]   ;;  %v7880_v38 = vld [vmem:[%s10969_s15 + $0x1ec] ss:$16 sps:$4 sm:$0xff]  }
 0x714   :  { %6046 = vmatpush2.bf16.msra.mxu0 %v7812_v46  ;;  %v7883_v39 = vld [vmem:[%s10969_s15 + $0x3ec] ss:$16 sps:$4 sm:$0xff]   ;;  %v7878_v40 = vld [vmem:[%s10969_s15 + $0x1e8] ss:$16 sps:$4 sm:$0xff]  }
 0x715   :  { %6087 = vmatpush2.bf16.msra.mxu1 %v7815_v27  ;;  %6047 = vmatprep.subr.bf16.mxu0 %v7820_v31  ;;  %v7881_v41 = vld [vmem:[%s10969_s15 + $0x3e8] ss:$16 sps:$4 sm:$0xff]   ;;  %v7886_v44 = vld [vmem:[%s10969_s15 + $0x1cc] ss:$16 sps:$4 sm:$0xff]  }
 0x716   :  { %6088 = vmatprep.subr.bf16.mxu1 %v7823_v35  ;;  %v7889_v45 = vld [vmem:[%s10969_s15 + $0x3cc] ss:$16 sps:$4 sm:$0xff]   ;;  %v7884_v46 = vld [vmem:[%s10969_s15 + $0x1c8] ss:$16 sps:$4 sm:$0xff]  }
 0x717   :  { %v7887_v27 = vld [vmem:[%s10969_s15 + $0x3c8] ss:$16 sps:$4 sm:$0xff]   ;;  %v7892_v31 = vld [vmem:[%s10969_s15 + $0x1ac] ss:$16 sps:$4 sm:$0xff]  }
 0x718   :  { %6048 = vmatpush2.bf16.msra.mxu0 %v7818_v47  ;;  %v7895_v35 = vld [vmem:[%s10969_s15 + $0x3ac] ss:$16 sps:$4 sm:$0xff]   ;;  %v7890_v47 = vld [vmem:[%s10969_s15 + $0x1a8] ss:$16 sps:$4 sm:$0xff]  }
 0x719   :  { %v8061_v51 = vpop.eup %8060  ;;  %6089 = vmatpush2.bf16.msra.mxu1 %v7821_v48  ;;  %6049 = vmatprep.subr.bf16.mxu0 %v7826_v16  ;;  %v7893_v48 = vld [vmem:[%s10969_s15 + $0x3a8] ss:$16 sps:$4 sm:$0xff]   ;;  %v7898_v16 = vld [vmem:[%s10969_s15 + $0x18c] ss:$16 sps:$4 sm:$0xff]  }
 0x71a   :  { %v8063_v53 = vpop.eup %8062  ;;  %6090 = vmatprep.subr.bf16.mxu1 %v7829_v49  ;;  %v10484_v34 = vpack.c.bf16 %v8061_v51, %v8061_v51  ;;  %v7901_v49 = vld [vmem:[%s10969_s15 + $0x38c] ss:$16 sps:$4 sm:$0xff]   ;;  %v7899_v51 = vld [vmem:[%s10969_s15 + $0x388] ss:$16 sps:$4 sm:$0xff]  }
 0x71b   :  { %v8065_v59 = vpop.eup %8064  ;;  %v10491_v0 = vpack.c.bf16 %v8063_v53, %v8063_v53  ;;  %v7902_v53 = vld [vmem:[%s10969_s15 + $0x168] ss:$16 sps:$4 sm:$0xff]  }
 0x71c   :  { %v8067_v57 = vpop.eup %8066  ;;  %6050 = vmatpush2.bf16.msra.mxu0 %v7824_v50  ;;  %v10479_v60 = vpack.c.bf16 %v8065_v59, %v8065_v59  ;;  %v7896_v50 = vld [vmem:[%s10969_s15 + $0x188] ss:$16 sps:$4 sm:$0xff]   ;;  %v7910_v59 = vld [vmem:[%s10969_s15 + $0x14c] ss:$16 sps:$4 sm:$0xff]  }
 0x71d   :  { %6091 = vmatpush2.bf16.msra.mxu1 %v7827_v26  ;;  %v10486_v62 = vpack.c.bf16 %v8067_v57, %v8067_v57  ;;  %6101 = vmatprep.subr.bf16.mxu0 %v7832_v52  ;;  %v7904_v26 = vld [vmem:[%s10969_s15 + $0x16c] ss:$16 sps:$4 sm:$0xff]  }
 0x71e   :  { %6051 = vmatprep.mubr.bf16.mxu0 %v10479_v60  ;;  %6142 = vmatprep.subr.bf16.mxu1 %v7835_v58  ;;  %v7907_v52 = vld [vmem:[%s10969_s15 + $0x36c] ss:$16 sps:$4 sm:$0xff]   ;;  %v7905_v58 = vld [vmem:[%s10969_s15 + $0x368] ss:$16 sps:$4 sm:$0xff]  }
 0x71f   :  { %6092 = vmatprep.mubr.bf16.mxu1 %v10486_v62  ;;  %6052 = vmatmul.mubr.bf16.vlgmr.msra.gmra.mxu0 %v10484_v34  ;;  %v7913_v57 = vld [vmem:[%s10969_s15 + $0x34c] ss:$16 sps:$4 sm:$0xff]  }
 0x720   :  { %6093 = vmatmul.mubr.bf16.vlgmr.msra.gmra.mxu1 %v10491_v0  ;;  %6102 = vmatpush1.bf16.msra.mxu0 %v7830_v61  ;;  %v7908_v61 = vld [vmem:[%s10969_s15 + $0x148] ss:$16 sps:$4 sm:$0xff]  }
 0x721   :  { %6133 = vmatprep.mubr.bf16.mxu0 %v10263_v18  ;;  %6143 = vmatpush1.bf16.msra.mxu1 %v7833_v63  ;;  %v7842_v18 = vld [vmem:[%s10969_s15 + $0xa8] ss:$16 sps:$4 sm:$0xff]  }
 0x722   :  { %6174 = vmatprep.mubr.bf16.mxu1 %v10270_v22  ;;  %6103 = vmatprep.subr.bf16.mxu0 %v7838_v1  ;;  %v7850_v22 = vld [vmem:[%s10969_s15 + $0x8c] ss:$16 sps:$4 sm:$0xff]   ;;  %v7911_v63 = vld [vmem:[%s10969_s15 + $0x348] ss:$16 sps:$4 sm:$0xff]  }
 0x723   :  { %6144 = vmatprep.subr.bf16.mxu1 %v7841_v3  ;;  %v7916_v1 = vld [vmem:[%s10969_s15 + $0x12c] ss:$16 sps:$4 sm:$0xff]  }
 0x724   :  { %6104 = vmatpush1.bf16.msra.mxu0 %v7836_v4  ;;  %v7919_v3 = vld [vmem:[%s10969_s15 + $0x32c] ss:$16 sps:$4 sm:$0xff]   ;;  %v7914_v4 = vld [vmem:[%s10969_s15 + $0x128] ss:$16 sps:$4 sm:$0xff]  }
 0x725   :  { %6145 = vmatpush1.bf16.msra.mxu1 %v7839_v5  ;;  %6105 = vmatprep.subr.bf16.mxu0 %v7844_v7  ;;  %v7917_v5 = vld [vmem:[%s10969_s15 + $0x328] ss:$16 sps:$4 sm:$0xff]   ;;  %v7922_v7 = vld [vmem:[%s10969_s15 + $0x10c] ss:$16 sps:$4 sm:$0xff]  }
 0x726   :  { %6146 = vmatprep.subr.bf16.mxu1 %v7847_v8  ;;  %v7925_v8 = vld [vmem:[%s10969_s15 + $0x30c] ss:$16 sps:$4 sm:$0xff]  }
 0x728   :  { %6106 = vmatpush1.bf16.msra.mxu0 %v7842_v18  ;;  %v7920_v18 = vld [vmem:[%s10969_s15 + $0x108] ss:$16 sps:$4 sm:$0xff]  }
 0x729   :  { %6147 = vmatpush1.bf16.msra.mxu1 %v7845_v9  ;;  %6107 = vmatprep.subr.bf16.mxu0 %v7850_v22  ;;  %v7923_v9 = vld [vmem:[%s10969_s15 + $0x308] ss:$16 sps:$4 sm:$0xff]   ;;  %v7928_v22 = vld [vmem:[%s10969_s15 + $0x4ec] ss:$16 sps:$4 sm:$0xff]  }
 0x72a   :  { %6148 = vmatprep.subr.bf16.mxu1 %v7853_v11  ;;  %v7931_v11 = vld [vmem:[%s10969_s15 + $0x6ec] ss:$16 sps:$4 sm:$0xff]  }
 0x72c   :  { %6108 = vmatpush1.bf16.msra.mxu0 %v7848_v12  ;;  %v7926_v12 = vld [vmem:[%s10969_s15 + $0x4e8] ss:$16 sps:$4 sm:$0xff]  }
 0x72d   :  { %6149 = vmatpush1.bf16.msra.mxu1 %v7851_v13  ;;  %6109 = vmatprep.subr.bf16.mxu0 %v7856_v14  ;;  %v7929_v13 = vld [vmem:[%s10969_s15 + $0x6e8] ss:$16 sps:$4 sm:$0xff]   ;;  %v7934_v14 = vld [vmem:[%s10969_s15 + $0x4cc] ss:$16 sps:$4 sm:$0xff]  }
 0x72e   :  { %6150 = vmatprep.subr.bf16.mxu1 %v7859_v15  ;;  %v7937_v15 = vld [vmem:[%s10969_s15 + $0x6cc] ss:$16 sps:$4 sm:$0xff]  }
 0x730   :  { %6110 = vmatpush1.bf16.msra.mxu0 %v7854_v2  ;;  %v7932_v2 = vld [vmem:[%s10969_s15 + $0x4c8] ss:$16 sps:$4 sm:$0xff]  }
 0x731   :  { %6151 = vmatpush1.bf16.msra.mxu1 %v7857_v20  ;;  %6111 = vmatprep.subr.bf16.mxu0 %v7862_v42  ;;  %v7935_v20 = vld [vmem:[%s10969_s15 + $0x6c8] ss:$16 sps:$4 sm:$0xff]  }
 0x732   :  { %6152 = vmatprep.subr.bf16.mxu1 %v7865_v23  ;;  %v7941_v42 = vld [vmem:[%s10969_s15 + $0x6a8] ss:$16 sps:$4 sm:$0xff]   ;;  %v7949_v23 = vld [vmem:[%s10969_s15 + $0x68c] ss:$16 sps:$4 sm:$0xff]  }
 0x734   :  { %6112 = vmatpush1.bf16.msra.mxu0 %v7860_v6  ;;  %v7944_v6 = vld [vmem:[%s10969_s15 + $0x488] ss:$16 sps:$4 sm:$0xff]  }
 0x735   :  { %6153 = vmatpush1.bf16.msra.mxu1 %v7863_v24  ;;  %6113 = vmatprep.subr.bf16.mxu0 %v7868_v29  ;;  %v7947_v24 = vld [vmem:[%s10969_s15 + $0x688] ss:$16 sps:$4 sm:$0xff]   ;;  %v7952_v29 = vld [vmem:[%s10969_s15 + $0x46c] ss:$16 sps:$4 sm:$0xff]  }
 0x736   :  { %6154 = vmatprep.subr.bf16.mxu1 %v7871_v43  ;;  %v7955_v43 = vld [vmem:[%s10969_s15 + $0x66c] ss:$16 sps:$4 sm:$0xff]  }
 0x738   :  { %6114 = vmatpush1.bf16.msra.mxu0 %v7866_v56  ;;  %v7950_v56 = vld [vmem:[%s10969_s15 + $0x468] ss:$16 sps:$4 sm:$0xff]  }
 0x739   :  { %6155 = vmatpush1.bf16.msra.mxu1 %v7869_v28  ;;  %6115 = vmatprep.subr.bf16.mxu0 %v7874_v30  ;;  %v7953_v28 = vld [vmem:[%s10969_s15 + $0x668] ss:$16 sps:$4 sm:$0xff]   ;;  %v7958_v30 = vld [vmem:[%s10969_s15 + $0x44c] ss:$16 sps:$4 sm:$0xff]  }
 0x73a   :  { %6156 = vmatprep.subr.bf16.mxu1 %v7877_v32  ;;  %v7961_v32 = vld [vmem:[%s10969_s15 + $0x64c] ss:$16 sps:$4 sm:$0xff]  }
 0x73c   :  { %6116 = vmatpush1.bf16.msra.mxu0 %v7872_v33  ;;  %v7956_v33 = vld [vmem:[%s10969_s15 + $0x448] ss:$16 sps:$4 sm:$0xff]  }
 0x73d   :  { %6157 = vmatpush1.bf16.msra.mxu1 %v7875_v37  ;;  %6117 = vmatprep.subr.bf16.mxu0 %v7880_v38  ;;  %v7959_v37 = vld [vmem:[%s10969_s15 + $0x648] ss:$16 sps:$4 sm:$0xff]   ;;  %v7964_v38 = vld [vmem:[%s10969_s15 + $0x42c] ss:$16 sps:$4 sm:$0xff]  }
 0x73e   :  { %6158 = vmatprep.subr.bf16.mxu1 %v7883_v39  ;;  %v7967_v39 = vld [vmem:[%s10969_s15 + $0x62c] ss:$16 sps:$4 sm:$0xff]  }
 0x740   :  { %6118 = vmatpush2.bf16.msra.mxu0 %v7878_v40  ;;  %v7962_v40 = vld [vmem:[%s10969_s15 + $0x428] ss:$16 sps:$4 sm:$0xff]  }
 0x741   :  { %6159 = vmatpush2.bf16.msra.mxu1 %v7881_v41  ;;  %6119 = vmatprep.subr.bf16.mxu0 %v7886_v44  ;;  %v7965_v41 = vld [vmem:[%s10969_s15 + $0x628] ss:$16 sps:$4 sm:$0xff]   ;;  %v7970_v44 = vld [vmem:[%s10969_s15 + $0x40c] ss:$16 sps:$4 sm:$0xff]  }
 0x742   :  { %6160 = vmatprep.subr.bf16.mxu1 %v7889_v45  ;;  %v7973_v45 = vld [vmem:[%s10969_s15 + $0x60c] ss:$16 sps:$4 sm:$0xff]  }
 0x744   :  { %6120 = vmatpush2.bf16.msra.mxu0 %v7884_v46  ;;  %v7968_v46 = vld [vmem:[%s10969_s15 + $0x408] ss:$16 sps:$4 sm:$0xff]  }
 0x745   :  { %6161 = vmatpush2.bf16.msra.mxu1 %v7887_v27  ;;  %6121 = vmatprep.subr.bf16.mxu0 %v7892_v31  ;;  %v7971_v27 = vld [vmem:[%s10969_s15 + $0x608] ss:$16 sps:$4 sm:$0xff]   ;;  %v7976_v31 = vld [vmem:[%s10969_s15 + $0x5ec] ss:$16 sps:$4 sm:$0xff]  }
 0x746   :  { %6162 = vmatprep.subr.bf16.mxu1 %v7895_v35  ;;  %v7979_v35 = vld [vmem:[%s10969_s15 + $0x7ec] ss:$16 sps:$4 sm:$0xff]  }
 0x748   :  { %6122 = vmatpush2.bf16.msra.mxu0 %v7890_v47  ;;  %v7974_v47 = vld [vmem:[%s10969_s15 + $0x5e8] ss:$16 sps:$4 sm:$0xff]  }
 0x749   :  { %6163 = vmatpush2.bf16.msra.mxu1 %v7893_v48  ;;  %6123 = vmatprep.subr.bf16.mxu0 %v7898_v16  ;;  %v7977_v48 = vld [vmem:[%s10969_s15 + $0x7e8] ss:$16 sps:$4 sm:$0xff]   ;;  %v7982_v16 = vld [vmem:[%s10969_s15 + $0x5cc] ss:$16 sps:$4 sm:$0xff]  }
 0x74a   :  { %6164 = vmatprep.subr.bf16.mxu1 %v7901_v49  ;;  %v7985_v49 = vld [vmem:[%s10969_s15 + $0x7cc] ss:$16 sps:$4 sm:$0xff]  }
 0x74c   :  { %6124 = vmatpush2.bf16.msra.mxu0 %v7896_v50  ;;  %v7980_v50 = vld [vmem:[%s10969_s15 + $0x5c8] ss:$16 sps:$4 sm:$0xff]  }
 0x74d   :  { %6165 = vmatpush2.bf16.msra.mxu1 %v7899_v51  ;;  %6125 = vmatprep.subr.bf16.mxu0 %v7904_v26  ;;  %v7983_v51 = vld [vmem:[%s10969_s15 + $0x7c8] ss:$16 sps:$4 sm:$0xff]   ;;  %v7988_v26 = vld [vmem:[%s10969_s15 + $0x5ac] ss:$16 sps:$4 sm:$0xff]  }
 0x74e   :  { %6166 = vmatprep.subr.bf16.mxu1 %v7907_v52  ;;  %v7991_v52 = vld [vmem:[%s10969_s15 + $0x7ac] ss:$16 sps:$4 sm:$0xff]  }
 0x750   :  { %6126 = vmatpush2.bf16.msra.mxu0 %v7902_v53  ;;  %v7986_v53 = vld [vmem:[%s10969_s15 + $0x5a8] ss:$16 sps:$4 sm:$0xff]  }
 0x751   :  { %6167 = vmatpush2.bf16.msra.mxu1 %v7905_v58  ;;  %6127 = vmatprep.subr.bf16.mxu0 %v7910_v59  ;;  %v7989_v58 = vld [vmem:[%s10969_s15 + $0x7a8] ss:$16 sps:$4 sm:$0xff]   ;;  %v7994_v59 = vld [vmem:[%s10969_s15 + $0x58c] ss:$16 sps:$4 sm:$0xff]  }
 0x752   :  { %6168 = vmatprep.subr.bf16.mxu1 %v7913_v57  ;;  %v7997_v57 = vld [vmem:[%s10969_s15 + $0x78c] ss:$16 sps:$4 sm:$0xff]  }
 0x754   :  { %6128 = vmatpush2.bf16.msra.mxu0 %v7908_v61  ;;  %v7992_v61 = vld [vmem:[%s10969_s15 + $0x588] ss:$16 sps:$4 sm:$0xff]  }
 0x755   :  { %6169 = vmatpush2.bf16.msra.mxu1 %v7911_v63  ;;  %6129 = vmatprep.subr.bf16.mxu0 %v7916_v1  ;;  %v7995_v63 = vld [vmem:[%s10969_s15 + $0x788] ss:$16 sps:$4 sm:$0xff]   ;;  %v8000_v1 = vld [vmem:[%s10969_s15 + $0x56c] ss:$16 sps:$4 sm:$0xff]  }
 0x756   :  { %6170 = vmatprep.subr.bf16.mxu1 %v7919_v3  ;;  %v8003_v3 = vld [vmem:[%s10969_s15 + $0x76c] ss:$16 sps:$4 sm:$0xff]  }
 0x758   :  { %6130 = vmatpush2.bf16.msra.mxu0 %v7914_v4  ;;  %v7998_v4 = vld [vmem:[%s10969_s15 + $0x568] ss:$16 sps:$4 sm:$0xff]  }
 0x759   :  { %6171 = vmatpush2.bf16.msra.mxu1 %v7917_v5  ;;  %6131 = vmatprep.subr.bf16.mxu0 %v7922_v7  ;;  %v8001_v5 = vld [vmem:[%s10969_s15 + $0x768] ss:$16 sps:$4 sm:$0xff]   ;;  %v8006_v7 = vld [vmem:[%s10969_s15 + $0x54c] ss:$16 sps:$4 sm:$0xff]  }
 0x75a   :  { %6172 = vmatprep.subr.bf16.mxu1 %v7925_v8  ;;  %v8009_v8 = vld [vmem:[%s10969_s15 + $0x74c] ss:$16 sps:$4 sm:$0xff]  }
 0x75c   :  { %6132 = vmatpush2.bf16.msra.mxu0 %v7920_v18  ;;  %v8004_v18 = vld [vmem:[%s10969_s15 + $0x548] ss:$16 sps:$4 sm:$0xff]  }
 0x75d   :  { %6173 = vmatpush2.bf16.msra.mxu1 %v7923_v9  ;;  %6183 = vmatprep.subr.bf16.mxu0 %v7928_v22  ;;  %v8007_v9 = vld [vmem:[%s10969_s15 + $0x748] ss:$16 sps:$4 sm:$0xff]   ;;  %v8012_v22 = vld [vmem:[%s10969_s15 + $0x52c] ss:$16 sps:$4 sm:$0xff]  }
 0x75e   :  { %6224 = vmatprep.subr.bf16.mxu1 %v7931_v11  ;;  %v8015_v11 = vld [vmem:[%s10969_s15 + $0x72c] ss:$16 sps:$4 sm:$0xff]  }
 0x75f   :  { %6134 = vmatmul.mubr.bf16.vlgmr.msra.gmra.mxu0 %v10268_v21  ;;  %v7940_v21 = vld [vmem:[%s10969_s15 + $0x4ac] ss:$16 sps:$4 sm:$0xff]  }
 0x760   :  { %6175 = vmatmul.mubr.bf16.vlgmr.msra.gmra.mxu1 %v10278_v25  ;;  %6184 = vmatpush1.bf16.msra.mxu0 %v7926_v12  ;;  %v7943_v25 = vld [vmem:[%s10969_s15 + $0x6ac] ss:$16 sps:$4 sm:$0xff]   ;;  %v8010_v12 = vld [vmem:[%s10969_s15 + $0x528] ss:$16 sps:$4 sm:$0xff]  }
 0x761   :  { %6215 = vmatprep.mubr.bf16.mxu0 %v10479_v60  ;;  %6225 = vmatpush1.bf16.msra.mxu1 %v7929_v13  ;;  %v7938_v60 = vld [vmem:[%s10969_s15 + $0x4a8] ss:$16 sps:$4 sm:$0xff]  }
 0x762   :  { %6256 = vmatprep.mubr.bf16.mxu1 %v10486_v62  ;;  %6185 = vmatprep.subr.bf16.mxu0 %v7934_v14  ;;  %v7946_v62 = vld [vmem:[%s10969_s15 + $0x48c] ss:$16 sps:$4 sm:$0xff]   ;;  %v8013_v13 = vld [vmem:[%s10969_s15 + $0x728] ss:$16 sps:$4 sm:$0xff]  }
 0x763   :  { %6226 = vmatprep.subr.bf16.mxu1 %v7937_v15  ;;  %v8018_v14 = vld [vmem:[%s10969_s15 + $0x50c] ss:$16 sps:$4 sm:$0xff]  }
 0x764   :  { %6186 = vmatpush1.bf16.msra.mxu0 %v7932_v2  ;;  %v8021_v15 = vld [vmem:[%s10969_s15 + $0x70c] ss:$16 sps:$4 sm:$0xff]   ;;  %v8016_v2 = vld [vmem:[%s10969_s15 + $0x508] ss:$16 sps:$4 sm:$0xff]  }
 0x765   :  { %6227 = vmatpush1.bf16.msra.mxu1 %v7935_v20  ;;  %6187 = vmatprep.subr.bf16.mxu0 %v7940_v21  ;;  %v8019_v20 = vld [vmem:[%s10969_s15 + $0x708] ss:$16 sps:$4 sm:$0xff]   ;;  %v8022_v21 = vld [vmem:[%s10971_s17] sm:$0xff]  }
 0x766   :  { %6228 = vmatprep.subr.bf16.mxu1 %v7943_v25 }
 0x768   :  { %6188 = vmatpush1.bf16.msra.mxu0 %v7938_v60 }
 0x769   :  { %6229 = vmatpush1.bf16.msra.mxu1 %v7941_v42  ;;  %6189 = vmatprep.subr.bf16.mxu0 %v7946_v62 }
 0x76a   :  { %6230 = vmatprep.subr.bf16.mxu1 %v7949_v23 }
 0x76c   :  { %6190 = vmatpush1.bf16.msra.mxu0 %v7944_v6 }
 0x76d   :  { %6231 = vmatpush1.bf16.msra.mxu1 %v7947_v24  ;;  %6191 = vmatprep.subr.bf16.mxu0 %v7952_v29 }
 0x76e   :  { %6232 = vmatprep.subr.bf16.mxu1 %v7955_v43 }
 0x770   :  { %6192 = vmatpush1.bf16.msra.mxu0 %v7950_v56 }
 0x771   :  { %6233 = vmatpush1.bf16.msra.mxu1 %v7953_v28  ;;  %6193 = vmatprep.subr.bf16.mxu0 %v7958_v30  ;;  %v10893_v28 = vld [vmem:[%s10998_s28 + $0x10] sm:$0xff] }
 0x772   :  { %6234 = vmatprep.subr.bf16.mxu1 %v7961_v32  ;;  %v6276_v30 = vmul.f32 %v10893_v28, %v10893_v28  ;;  %v10902_v32 = vld [vmem:[%s10998_s28 + $0x18] sm:$0xff] }
 0x774   :  { %6194 = vmatpush1.bf16.msra.mxu0 %v7956_v33  ;;  %v6277_v33 = vmul.f32 %v10902_v32, %v10902_v32 }
 0x775   :  { %6235 = vmatpush1.bf16.msra.mxu1 %v7959_v37  ;;  %6195 = vmatprep.subr.bf16.mxu0 %v7964_v38 }
 0x776   :  { %6236 = vmatprep.subr.bf16.mxu1 %v7967_v39 }
 0x778   :  { %6196 = vmatpush1.bf16.msra.mxu0 %v7962_v40  ;;  %v4635_v40 = vld [vmem:[%s10970_s16] sm:$0xf] }
 0x779   :  { %6237 = vmatpush1.bf16.msra.mxu1 %v7965_v41  ;;  %6197 = vmatprep.subr.bf16.mxu0 %v7970_v44  ;;  %v4644_v41 = vrot.slane %v4635_v40, %v9110_v36 }
 0x77a   :  { %6238 = vmatprep.subr.bf16.mxu1 %v7973_v45 }
 0x77c   :  { %6198 = vmatpush1.bf16.msra.mxu0 %v7968_v46 }
 0x77d   :  { %6239 = vmatpush1.bf16.msra.mxu1 %v7971_v27  ;;  %6199 = vmatprep.subr.bf16.mxu0 %v7976_v31 }
 0x77e   :  { %6240 = vmatprep.subr.bf16.mxu1 %v7979_v35 }
 0x780   :  { %6200 = vmatpush2.bf16.msra.mxu0 %v7974_v47 }
 0x781   :  { %6241 = vmatpush2.bf16.msra.mxu1 %v7977_v48  ;;  %6201 = vmatprep.subr.bf16.mxu0 %v7982_v16 }
 0x782   :  { %6242 = vmatprep.subr.bf16.mxu1 %v7985_v49 }
 0x784   :  { %6202 = vmatpush2.bf16.msra.mxu0 %v7980_v50 }
 0x785   :  { %6243 = vmatpush2.bf16.msra.mxu1 %v7983_v51  ;;  %6203 = vmatprep.subr.bf16.mxu0 %v7988_v26 }
 0x786   :  { %6244 = vmatprep.subr.bf16.mxu1 %v7991_v52 }
 0x788   :  { %6204 = vmatpush2.bf16.msra.mxu0 %v7986_v53 }
 0x789   :  { %6245 = vmatpush2.bf16.msra.mxu1 %v7989_v58  ;;  %6205 = vmatprep.subr.bf16.mxu0 %v7994_v59 }
 0x78a   :  { %6246 = vmatprep.subr.bf16.mxu1 %v7997_v57 }
 0x78c   :  { %6206 = vmatpush2.bf16.msra.mxu0 %v7992_v61 }
 0x78d   :  { %6247 = vmatpush2.bf16.msra.mxu1 %v7995_v63  ;;  %6207 = vmatprep.subr.bf16.mxu0 %v8000_v1 }
 0x78e   :  { %6248 = vmatprep.subr.bf16.mxu1 %v8003_v3 }
 0x790   :  { %6208 = vmatpush2.bf16.msra.mxu0 %v7998_v4 }
 0x791   :  { %6249 = vmatpush2.bf16.msra.mxu1 %v8001_v5  ;;  %6209 = vmatprep.subr.bf16.mxu0 %v8006_v7 }
 0x792   :  { %6250 = vmatprep.subr.bf16.mxu1 %v8009_v8 }
 0x794   :  { %6210 = vmatpush2.bf16.msra.mxu0 %v8004_v18 }
 0x795   :  { %6251 = vmatpush2.bf16.msra.mxu1 %v8007_v9  ;;  %6211 = vmatprep.subr.bf16.mxu0 %v8012_v22 }
 0x796   :  { %6252 = vmatprep.subr.bf16.mxu1 %v8015_v11 }
 0x798   :  { %6212 = vmatpush2.bf16.msra.mxu0 %v8010_v12 }
 0x799   :  { %6253 = vmatpush2.bf16.msra.mxu1 %v8013_v13  ;;  %6213 = vmatprep.subr.bf16.mxu0 %v8018_v14 }
 0x79a   :  { %6254 = vmatprep.subr.bf16.mxu1 %v8021_v15  ;;  %v4648_v15 = vrot.slane %v4635_v40, %v9308_v19 }
 0x79c   :  { %6214 = vmatpush2.bf16.msra.mxu0 %v8016_v2  ;;  %v4652_v2 = vrot.slane %v4635_v40, %v9317_v55 }
 0x79d   :  { %6255 = vmatpush2.bf16.msra.mxu1 %v8019_v20  ;;  %7395 = vmatprep.subr.bf16.mxu0 %v8150_v54 }
 0x79f   :  { %6216 = vmatmul.mubr.bf16.vlgmr.msra.gmra.mxu0 %v10484_v34  ;;  %v5971_v25 = vpop.f32.mrf.mxu0  ;;  %v8082_v34 = vld [vmem:[%s10998_s28] sm:$0xff] }
 0x7a0   :  { %6257 = vmatmul.mubr.bf16.vlgmr.msra.gmra.mxu1 %v10491_v0  ;;  %v6012_v60 = vpop.f32.mrf.mxu1  ;;  %7396 = vmatpush3.bf16.msra.mxu0 %v8022_v21  ;;  %v6274_v43 = vmul.f32 %v8082_v34, %v8082_v34  ;;  %v8083_v0 = vld [vmem:[%s10998_s28 + $0x8] sm:$0xff] }
 0x7a1   :  { %v5973_v42 = vpop.f32.mrf.mxu0  ;;  %7397 = vmatprep.mubr.msk.bf16.mxu0 %vm8151_vm0, %v8150_v54  ;;  %7401 = vmatprep.subr.bf16.mxu0 %v8150_v54  ;;  %v6275_v56 = vmul.f32 %v8083_v0, %v8083_v0 }
 0x7a2   :  { %v6014_v62 = vpop.f32.mrf.mxu1  ;;  %v5974_v45 = vadd.f32 %v5973_v42, %v4644_v41 }
 0x7a3   :  { %v5975_v23 = vpop.f32.mrf.mxu0  ;;  %v6278_v37 = vadd.f32 %v6275_v56, %v6274_v43 }
 0x7a4   :  { %v6016_v6 = vpop.f32.mrf.mxu1  ;;  %v6015_v31 = vadd.f32 %v6014_v62, %v5974_v45 }
 0x7a5   :  { %v5976_v24 = vpop.f32.mrf.mxu0  ;;  %v6279_v38 = vadd.f32 %v6278_v37, %v6276_v30 }
 0x7a6   :  { %v6017_v29 = vpop.f32.mrf.mxu1 }
 0x7a7   :  { %7398 = vmatmul.mubr.msk.bf16.vlgmr.msra.gmra.mxu0 %vm3235_vm2, %v9612_v10  ;;  %v6280_v39 = vadd.f32 %v6279_v38, %v6277_v33  ;;  %v4640_v10 = vrot.slane %v4635_v40, %v9217_v17 }
 0x7a8   :  { %7403 = vmatprep.mubr.msk.bf16.mxu0 %vm8151_vm0, %v8150_v54 }
 0x7a9   :  { %6281 = vadd.xlane.f32.xlu0 %v6280_v39  ;;  %v5972_v44 = vadd.f32 %v5971_v25, %v4640_v10 }
 0x7ab   :  { %v6013_v46 = vadd.f32 %v6012_v60, %v5972_v44 }
 0x7df   :  { %v6053_v27 = vpop.f32.mrf.mxu0 }
 0x7e0   :  { %v6054_v35 = vadd.f32 %v6053_v27, %v6013_v46  ;;  %v6094_v47 = vpop.f32.mrf.mxu1 }
 0x7e1   :  { %v6055_v48 = vpop.f32.mrf.mxu0 }
 0x7e2   :  { %v6095_v54 = vadd.f32 %v6094_v47, %v6054_v35  ;;  %v6056_v16 = vadd.f32 %v6055_v48, %v6015_v31  ;;  %v6096_v49 = vpop.f32.mrf.mxu1 }
 0x7e3   :  { %v6057_v50 = vpop.f32.mrf.mxu0 }
 0x7e4   :  { %6480 = vst [vmem:[#allocation4] sm:$0xff] %v6095_v54  ;;  %v6097_v51 = vadd.f32 %v6096_v49, %v6056_v16  ;;  %v6098_v26 = vpop.f32.mrf.mxu1  ;;  %v6312_v52 = vsub.f32 %v8082_v34, %v6095_v54  ;;  %v6291_v58 = vmul.f32 %v6095_v54, %v6095_v54  ;;  %v6265_v61 = vmul.f32 %v8082_v34, %v6095_v54  ;;  %v8023_v16 = vld [vmem:[%s10975_s21] sm:$0x1f]  }
 0x7e5   :  { %v6058_v53 = vpop.f32.mrf.mxu0  ;;  %v6425_v49 = vsel %vm6423_vm3, %v8023_v16, 0 }
 0x7e6   :  { %6481 = vst [vmem:[#allocation4 + $0x8] sm:$0xff] %v6097_v51  ;;  %v6099_v36 = vpop.f32.mrf.mxu1  ;;  %v6292_v59 = vmul.f32 %v6097_v51, %v6097_v51  ;;  %v6313_v57 = vsub.f32 %v8083_v0, %v6097_v51  ;;  %v6266_v63 = vmul.f32 %v8083_v0, %v6097_v51  ;;  %v6316_v3 = vmul.f32 %v6312_v52, %v6312_v52 }
 0x7e7   :  { %7402 = vmatpush3.bf16.msra.mxu0 %v6425_v49 }
 0x7e8   :  { %v6295_v1 = vadd.f32 %v6292_v59, %v6291_v58  ;;  %v6317_v4 = vmul.f32 %v6313_v57, %v6313_v57  ;;  %v6269_v5 = vadd.f32 %v6266_v63, %v6265_v61 }
 0x7ea   :  { %v6320_v7 = vadd.f32 %v6317_v4, %v6316_v3 }
 0x81f   :  { %v6135_v8 = vpop.f32.mrf.mxu0 }
 0x820   :  { %v6176_v18 = vpop.f32.mrf.mxu1  ;;  %v6136_v20 = vadd.f32 %v6135_v8, %v4648_v15 }
 0x821   :  { %v6137_v9 = vpop.f32.mrf.mxu0 }
 0x822   :  { %v6178_v22 = vpop.f32.mrf.mxu1  ;;  %v6138_v21 = vadd.f32 %v6137_v9, %v4652_v2  ;;  %v6177_v25 = vadd.f32 %v6176_v18, %v6136_v20 }
 0x823   :  { %v6139_v11 = vpop.f32.mrf.mxu0 }
 0x824   :  { %v6180_v12 = vpop.f32.mrf.mxu1  ;;  %v6179_v42 = vadd.f32 %v6178_v22, %v6138_v21  ;;  %v6334_v11 = vld [vmem:[%s10972_s18] sm:$0x1] }
 0x825   :  { %v6140_v13 = vpop.f32.mrf.mxu0  ;;  %v6335_v12 = vunpack.c.l.bf16 %v6334_v11 }
 0x826   :  { %v6181_v14 = vpop.f32.mrf.mxu1  ;;  %v6387_v13 = vld [vmem:[%s10973_s19] sm:$0x1] }
 0x827   :  { %v6339_v14 = vrot.slane %v6335_v12, %v9217_v17  ;;  %v6388_v15 = vunpack.c.l.bf16 %v6387_v13 }
 0x832   :  { %v6282_v50 = vpop.xlane.xlu0 %6281 }
 0x833   :  { %8068 = vrsqrt.f32 %v6282_v50  ;;  %vm6285_vm4 = vcmp.eq.f32.partialorder %v6282_v50, inf  ;;  %v6288_v53 = vand.u32 2147483648, %v6282_v50  ;;  %vm6287_vm5 = vcmp.eq.f32.partialorder %v6282_v50, 0.0 }
 0x85f   :  { %v6217_v60 = vpop.f32.mrf.mxu0 }
 0x860   :  { %v6218_v62 = vadd.f32 %v6217_v60, %v6177_v25  ;;  %v6258_v23 = vpop.f32.mrf.mxu1  ;;  %v6392_v25 = vrot.slane %v6388_v15, %v9217_v17  ;;  %v7341_v17 = vld [vmem:[%s10976_s22] ss:$0 sm:$0xff]  ;;  %s8154_s22 = smov [#allocation2]  }
 0x861   :  { %v6219_v6 = vpop.f32.mrf.mxu0  ;;  %s6496_s14 = sshll.u32 %s8154_s22, 4  ;;  %s6497_s14 = int_to_ptr.vmem [resolvable:$true] %s6496_s14 }
 0x862   :  { %v6259_v24 = vadd.f32 %v6258_v23, %v6218_v62  ;;  %v6220_v29 = vadd.f32 %v6219_v6, %v6179_v42  ;;  %v6260_v34 = vpop.f32.mrf.mxu1  ;;  %v7340_v6 = vld [vmem:[%s10974_s20] ss:$0 sm:$0xff]  ;;  %s8153_s20 = smov [#allocation4]  }
 0x863   :  { %v6221_v43 = vpop.f32.mrf.mxu0  ;;  %s6506_s29 = sshll.u32 %s8153_s20, 4  ;;  %s6507_s29 = int_to_ptr.vmem [resolvable:$true] %s6506_s29 }
 0x864   :  { %6482 = vst [vmem:[#allocation4 + $0x10] sm:$0xff] %v6259_v24  ;;  %v6261_v0 = vadd.f32 %v6260_v34, %v6220_v29  ;;  %v6262_v56 = vpop.f32.mrf.mxu1  ;;  %v6293_v30 = vmul.f32 %v6259_v24, %v6259_v24  ;;  %v6314_v19 = vsub.f32 %v10893_v28, %v6259_v24  ;;  %v6267_v55 = vmul.f32 %v10893_v28, %v6259_v24  ;;  %s8086_s0 = scalar_lea.vmem %s6507_s29, 512  ;;  %p8091_p1 = scmp.lt.s32.totalorder %s6507_s29, %s6507_s29 }
 0x865   :  { %v6222_v33 = vpop.f32.mrf.mxu0  ;;  %p8087_p0 = scmp.ne.s32.totalorder %s6507_s29, %s8086_s0  ;;  %p8092_p2 = scmp.lt.s32.totalorder %s8086_s0, %s8086_s0 }
 0x866   :  { %6483 = vst [vmem:[#allocation4 + $0x18] sm:$0xff] %v6261_v0  ;;  %v6263_v37 = vpop.f32.mrf.mxu1  ;;  %v6294_v38 = vmul.f32 %v6261_v0, %v6261_v0  ;;  %v6296_v39 = vadd.f32 %v6295_v1, %v6293_v30  ;;  %v6315_v40 = vsub.f32 %v10902_v32, %v6261_v0  ;;  %v6318_v10 = vmul.f32 %v6314_v19, %v6314_v19 }
 0x867   :  { %v10918_v41 = vpop.f32.mrf.mxu0  ;;  %v6268_v35 = vmul.f32 %v10902_v32, %v6261_v0  ;;  %v6270_v47 = vadd.f32 %v6269_v5, %v6267_v55  ;;  %v8069_v32 = vpop.eup %8068  ;;  %p8093_p3 = por %p8092_p2, %p8091_p1 }
 0x868   :  { %v6297_v44 = vadd.f32 %v6296_v39, %v6294_v38  ;;  %v6319_v45 = vmul.f32 %v6315_v40, %v6315_v40  ;;  %v6321_v46 = vadd.f32 %v6320_v7, %v6318_v10  ;;  %v6284_v52 = vmul.f32 %v8069_v32, %v6282_v50 }
 0x869   :  { %v7399_v27 = vpop.f32.mrf.mxu0  ;;  %v6271_v54 = vadd.f32 %v6270_v47, %v6268_v35  ;;  %p8094_p4 = pnand %p8093_p3, %p8087_p0 }
 0x86a   :  { %6298 = vadd.xlane.f32.xlu0 %v6297_v44  ;;  %v6322_v31 = vadd.f32 %v6321_v46, %v6319_v45  ;;  %v6286_v58 = vsel %vm6285_vm4, %v6282_v50, %v6284_v52 }
 0x86b   :  { %v6384_v48 = vpop.f32.mrf.mxu0  ;;  %v6289_v61 = vsel %vm6287_vm5, %v6288_v53, %v6286_v58 }
 0x86c   :  { %6323 = vadd.xlane.f32.xlu1 %v6322_v31  ;;  %v6290_v7 = vmax.f32 %v6289_v61, 1e-08 }
 0x86d   :  { %v7400_v28 = vpop.f32.mrf.mxu0 }
 0x870   :  { %6272 = vadd.xlane.f32.xlu1 %v6271_v54 }
 0x8f3   :  { %v6299_v51 = vpop.xlane.xlu0 %6298 }
 0x8f4   :  { %8070 = vrsqrt.f32 %v6299_v51  ;;  %vm6302_vm6 = vcmp.eq.f32.partialorder %v6299_v51, inf  ;;  %v6305_v63 = vand.u32 2147483648, %v6299_v51  ;;  %vm6304_vm7 = vcmp.eq.f32.partialorder %v6299_v51, 0.0 }
 0x8f5   :  { %v6324_v26 = vpop.xlane.xlu1 %6323 }
 0x8f6   :  { %8072 = vrsqrt.f32 %v6324_v26  ;;  %vm6327_vm8 = vcmp.eq.f32.partialorder %v6324_v26, inf  ;;  %v6330_v5 = vand.u32 2147483648, %v6324_v26  ;;  %vm6329_vm10 = vcmp.eq.f32.partialorder %v6324_v26, 0.0 }
 0x8f9   :  { %v6273_v20 = vpop.xlane.xlu1 %6272 }
 0x901   :  { %v8071_v36 = vpop.eup %8070 }
 0x902   :  { %v6301_v59 = vmul.f32 %v8071_v36, %v6299_v51 }
 0x903   :  { %v8073_v57 = vpop.eup %8072 }
 0x904   :  { %v6303_v1 = vsel %vm6302_vm6, %v6299_v51, %v6301_v59  ;;  %v6326_v3 = vmul.f32 %v8073_v57, %v6324_v26 }
 0x905   :  { %v6306_v4 = vsel %vm6304_vm7, %v6305_v63, %v6303_v1 }
 0x906   :  { %v6307_v8 = vmax.f32 %v6306_v4, 1e-08  ;;  %v6328_v18 = vsel %vm6327_vm8, %v6324_v26, %v6326_v3 }
 0x907   :  { %v6331_v9 = vsel %vm6329_vm10, %v6330_v5, %v6328_v18 }
 0x908   :  { %v6308_v22 = vmul.f32 %v6307_v8, %v6290_v7  ;;  %6486 = vst.msk [vmem:[#allocation6] sm:$0xff] %vm6485_vm9, %v6331_v9  ;;  %v6340_v21 = vmul.f32 %v6339_v14, %v6331_v9 }
 0x90a   :  { %8074 = vrcp.f32 %v6308_v22  ;;  %v6382_v62 = vadd.f32 %v10918_v41, %v6340_v21 }
 0x917   :  { %v8075_v2 = vpop.eup %8074 }
 0x918   :  { %v6310_v60 = vmul.f32 %v8075_v2, %v6273_v20 }
 0x91a   :  { %v6311_v42 = vsub.f32 1.0, %v6310_v60 }
 0x91c   :  { %v6393_v23 = vmul.f32 %v6392_v25, %v6311_v42  ;;  %6488 = vst.msk [vmem:[#allocation6] sm:$0xff] %vm6487_vm11, %v6311_v42 }
 0x91e   :  { %v6394_v24 = vadd.f32 %v6393_v23, %v6382_v62 }
 0x920   :  { %v6402_v29 = vadd.f32 %v7340_v6, %v6394_v24 }
 0x922   :  { %8076 = vtanh.f32 %v6402_v29 }
 0x92f   :  { %v8077_v34 = vpop.eup %8076 }
 0x930   :  { %v6404_v43 = vpack.c.bf16 %v8077_v34, %v8077_v34 }
 0x932   :  { %7404 = vmatmul.mubr.msk.bf16.vlgmr.msra.gmra.mxu0 %vm6419_vm12, %v6404_v43 }
 0x9f2   :  { %v6461_v0 = vpop.f32.mrf.mxu0 }
 0x9f3   :  { %v6462_v56 = vadd.f32 %v7341_v17, %v6461_v0 }
 0x9f4   :  { %v7405_v30 = vpop.f32.mrf.mxu0 }
 0x9f5   :  { %v6468_v19 = vsel %vm6467_vm13, %v6462_v56, -inf }
 0x9f6   :  { %6469 = vmax.xlane.f32.xlu0 %v6468_v19  ;;  %v6464_v33 = vpop.f32.mrf.mxu0 }
 0x9f8   :  { %v7406_v55 = vpop.f32.mrf.mxu0 }
 0xa7f   :  { %v6470_v37 = vpop.xlane.xlu0 %6469 }
 0xa80   :  { %v6471_v38 = vsub.f32 %v6462_v56, %v6470_v37 }
 0xa82   :  { %v6472_v39 = vmul.f32 1.442695, %v6471_v38 }
 0xa84   :  { %8078 = vpow2.f32 %v6472_v39 }
 0xa91   :  { %v8079_v40 = vpop.eup %8078 }
 0xa92   :  { %v6474_v10 = vsel %vm6467_vm13, %v8079_v40, 0.0 }
 0xa93   :  { %6475 = vadd.xlane.f32.xlu1 %v6474_v10 }
 0xa94   :  { %8097 = shalt.err (!%p8094_p4)
}
 0xa95   :  { %6509 = dma.vmem_to_hbm [thread:$0]  %s6507_s29, 512, %s10978_s24, [#allocation5]  }
 0xa96   :  { %s8106_s15 = scalar_lea.vmem %s6497_s14, 128  ;;  %p8111_p6 = scmp.lt.s32.totalorder %s6497_s14, %s6497_s14 }
 0xa97   :  { %p8107_p5 = scmp.ne.s32.totalorder %s6497_s14, %s8106_s15  ;;  %p8112_p7 = scmp.lt.s32.totalorder %s8106_s15, %s8106_s15 }
 0xa99   :  { %p8113_p8 = por %p8112_p7, %p8111_p6 }
 0xa9b   :  { %p8114_p9 = pnand %p8113_p8, %p8107_p5 }
 0xa9d   :  { %8117 = shalt.err (!%p8114_p9)
}
 0xa9e   :  { %6499 = dma.vmem_to_hbm [thread:$0]  %s6497_s14, 128, %s10977_s23, [#allocation3]  }
 0xa9f   :  { %s8155_s2 = smov [#allocation6]  }
 0xaa0   :  { %s6516_s13 = sshll.u32 %s8155_s2, 4  ;;  %s6517_s13 = int_to_ptr.vmem [resolvable:$true] %s6516_s13 }
 0xaa1   :  { %s8126_s10 = scalar_lea.vmem %s6517_s13, 128  ;;  %p8131_p11 = scmp.lt.s32.totalorder %s6517_s13, %s6517_s13 }
 0xaa2   :  { %p8127_p10 = scmp.ne.s32.totalorder %s6517_s13, %s8126_s10  ;;  %p8132_p12 = scmp.lt.s32.totalorder %s8126_s10, %s8126_s10 }
 0xaa4   :  { %p8133_p13 = por %p8132_p12, %p8131_p11 }
 0xaa6   :  { %p8134_p0 = pnand %p8133_p13, %p8127_p10 }
 0xaa8   :  { %8137 = shalt.err (!%p8134_p0)
}
 0xaa9   :  { %6519 = dma.vmem_to_hbm [thread:$0]  %s6517_s13, 128, %s10979_s25, [#allocation5]  }
 0xb1c   :  { %v6476_v41 = vpop.xlane.xlu1 %6475 }
 0xb1d   :  { %8080 = vrcp.f32 %v6476_v41 }
 0xb2a   :  { %v8081_v44 = vpop.eup %8080 }
 0xb2b   :  { %v6478_v45 = vmul.f32 %v8081_v44, %v8079_v40 }
 0xb2d   :  { %6489 = vst.msk [vmem:[%s10980_s26] sm:$0xff] %vm6467_vm13, %v6478_v45 }
 0xb2e   :  { %8146 = dma.done.wait [#allocation3], 128  }
 0xb2f   :  { %8147 = vsyncadd [#allocation3], 4294967168 }
 0xb30   :  { %8148 = dma.done.wait [#allocation5], 640  }
 0xb31   :  { %8149 = vsyncadd [#allocation5], 4294966656 }
 0xb32   :  { %6533 = vsyncpa [#allocation3], 1 }
 0xb33   :  { %6534 = vsyncpa [#allocation5], 1 }

</bundles_post_ra>
